<compile_context>
chip_gen: v7x
topology: tpu7x:2x2x1
jax: 0.10.0
libtpu: 0.0.40
codegen_flags: <defaults>
</compile_context>

<pallas_src>
import functools

import jax
import jax.numpy as jnp
from jax.experimental import pallas as pl
from jax.experimental.pallas import tpu as pltpu

_NEG = -1e30  # finite "-inf" for padded policy logits (avoids inf-inf NaN risk)


# ------------------------------ fused kernel -------------------------------

def _fused_forward_kernel(patches_ref, wconv_ref, bconv_ref, w3_ref, b3_ref,
                          vw2_ref, vb2_ref, logp_ref, value_ref):
    """conv3x3+ReLU -> fused policy/value heads; activation stays on-chip."""
    hw, _, n_tot = w3_ref.shape
    bt, a_pad = logp_ref.shape
    dh = vw2_ref.shape[1]

    # ---- conv as one (bt*hw, K) @ (K, C_out) bf16 MXU matmul, f32 accumulate ----
    act = jnp.dot(patches_ref[...], wconv_ref[...],
                  preferred_element_type=jnp.float32)
    act = jnp.maximum(act + bconv_ref[...], 0.0)            # (bt*hw, C_out) f32

    # ---- heads: acc[b, :] = sum_p act[b*hw + p, :] @ w3[p] ----
    # Statically-unrolled per-position accumulation replaces the
    # (bt*hw, C_out) -> (bt, hw*C_out) relayout Mosaic may reject.  64 small
    # (bt, C_out) @ (C_out, 128+Dh) matmuls; w3 is streamed from VMEM once.
    acc = jnp.zeros((bt, n_tot), jnp.float32)
    for p in range(hw):
        rows = jnp.concatenate(
            [act[b * hw + p:b * hw + p + 1, :] for b in range(bt)], axis=0)
        acc = acc + jnp.dot(rows.astype(jnp.bfloat16), w3_ref[p],
                            preferred_element_type=jnp.float32)
    acc = acc + b3_ref[...]          # f32 bias add keeps the -1e30 padding trick sound

    # ---- policy head: stable log_softmax over the padded, lane-dense logits ----
    logits = acc[:, :a_pad]
    m = jnp.max(logits, axis=-1, keepdims=True)
    lse = m + jnp.log(jnp.sum(jnp.exp(logits - m), axis=-1, keepdims=True))
    logp_ref[...] = logits - lse

    # ---- value head: ReLU -> VPU multiply + lane reduce -> tanh (EUP) ----
    h = jnp.maximum(acc[:, a_pad:a_pad + dh], 0.0)
    v = jnp.sum(h * vw2_ref[...], axis=-1, keepdims=True) + vb2_ref[0, 0]
    value_ref[...] = jnp.tanh(v)


# ------------------------- one-time weight repack ---------------------------

def prepare_params(params, board_hw):
    """Host-side, one-time repack of torch-convention parameters.

    * conv weight -> ((kh,kw,c_in)-minor, C_out) matmul matrix, rows zero-padded
      from 9*C_in to a multiple of 16 (bf16 sublane pack).
    * policy / value-hidden weights fused into one (F, 128+Dh) matrix (policy
      columns zero-padded to 128, bias padded with -1e30), then reshaped to
      (HW, C_out, 128+Dh) so the kernel can index it per board position without
      any activation relayout.
    * MXU operands cast to bfloat16; biases / vw2 / vb2 kept float32.
    """
    conv_w, conv_b, pw, pb, vw1, vb1, vw2, vb2 = params
    H, W = board_hw
    c_out, c_in, kh, kw = conv_w.shape
    hw = H * W
    f = c_out * hw
    a = pw.shape[1]
    dh = vw1.shape[1]
    a_pad = ((a + 127) // 128) * 128
    k_real = kh * kw * c_in
    k_pad = ((k_real + 15) // 16) * 16

    # conv weight: (C_out, C_in, 3, 3) -> ((kh,kw,c_in), C_out), rows padded to k_pad
    w_mat = conv_w.transpose(2, 3, 1, 0).reshape(k_real, c_out)
    w_mat = jnp.pad(w_mat, ((0, k_pad - k_real), (0, 0))).astype(jnp.bfloat16)
    conv_b_row = conv_b.reshape(1, c_out).astype(jnp.float32)

    # fused head weight in torch NCHW-flatten row order (feature = c*HW + p)
    pw_pad = jnp.pad(pw, ((0, 0), (0, a_pad - a)))                 # zero weight cols
    pb_pad = jnp.pad(pb.reshape(1, a), ((0, 0), (0, a_pad - a)),
                     constant_values=_NEG)                         # -inf-ish bias cols
    w_fused = jnp.concatenate([pw_pad, vw1], axis=1)               # (F, a_pad + Dh)
    b_fused = jnp.concatenate([pb_pad, vb1.reshape(1, dh)], axis=1).astype(jnp.float32)

    # (F, N) with row = c*HW + p  ->  (HW, C_out, N) indexed [p, c, :]
    n_tot = a_pad + dh
    w3 = jnp.transpose(w_fused.reshape(c_out, hw, n_tot), (1, 0, 2)).astype(jnp.bfloat16)

    vw2_row = vw2.reshape(1, dh).astype(jnp.float32)
    vb2_s = vb2.reshape(1, 1).astype(jnp.float32)
    return (w_mat, conv_b_row, w3, b_fused, vw2_row, vb2_s)


# ------------------------------ forward pass -------------------------------

@functools.partial(jax.jit, static_argnames=("action_size",))
def policy_value_forward(x, packed, *, action_size):
    """x: (B, C_in, H, W) float32 NCHW.  Returns (log_probs (B, A), value (B, 1))."""
    w_mat, conv_b_row, w3, b3, vw2_row, vb2_s = packed
    B, C, H, W = x.shape
    k_pad, c_out = w_mat.shape
    hw, _, n_tot = w3.shape
    dh = vw2_row.shape[1]
    a_pad = n_tot - dh

    # im2col on the host/XLA side (tiny tensor, fuses into one op); rows are
    # b-major (row = b*HW + p), K padded with a zero tap block to k_pad.
    x_nhwc = jnp.transpose(x, (0, 2, 3, 1))
    xp = jnp.pad(x_nhwc, ((0, 0), (1, 1), (1, 1), (0, 0)))
    taps = [xp[:, i:i + H, j:j + W, :] for i in range(3) for j in range(3)]
    if k_pad > 9 * C:
        taps.append(jnp.zeros((B, H, W, k_pad - 9 * C), x.dtype))
    patches = jnp.concatenate(taps, axis=-1).reshape(B * hw, k_pad).astype(jnp.bfloat16)

    b_tile = B                      # whole batch in one tile at B=2
    nb = B // b_tile

    logp_pad, value = pl.pallas_call(
        _fused_forward_kernel,
        out_shape=(jax.ShapeDtypeStruct((B, a_pad), jnp.float32),
                   jax.ShapeDtypeStruct((B, 1), jnp.float32)),
        grid=(nb,),
        in_specs=[
            pl.BlockSpec((b_tile * hw, k_pad), lambda i: (i, 0)),     # patches
            pl.BlockSpec((k_pad, c_out), lambda i: (0, 0)),           # conv weight
            pl.BlockSpec((1, c_out), lambda i: (0, 0)),               # conv bias
            pl.BlockSpec((hw, c_out, n_tot), lambda i: (0, 0, 0)),    # fused head W
            pl.BlockSpec((1, n_tot), lambda i: (0, 0)),               # fused head bias
            pl.BlockSpec((1, dh), lambda i: (0, 0)),                  # value W2 row
            pl.BlockSpec(memory_space=pltpu.MemorySpace.SMEM),        # value b2 scalar
        ],
        out_specs=(pl.BlockSpec((b_tile, a_pad), lambda i: (i, 0)),
                   pl.BlockSpec((b_tile, 1), lambda i: (i, 0))),
        compiler_params=pltpu.CompilerParams(
            dimension_semantics=("parallel",)),   # megacore-ready once B is tiled
    )(patches, w_mat, conv_b_row, w3, b3, vw2_row, vb2_s)

    # The padded (B, 128) block is also a valid return (exp(pad) == 0); we slice
    # to keep the module's exact (B, action_size) contract.
    return logp_pad[:, :action_size], value


# -------------------------- pure-JAX reference -----------------------------

def _ref_forward(x, params):
    conv_w, conv_b, pw, pb, vw1, vb1, vw2, vb2 = params
    y = jax.lax.conv_general_dilated(
        x, conv_w, window_strides=(1, 1), padding="SAME",
        dimension_numbers=("NCHW", "OIHW", "NCHW"))
    y = jnp.maximum(y + conv_b[None, :, None, None], 0.0)
    feat = y.reshape(x.shape[0], -1)
    logits = feat @ pw + pb
    logp = jax.nn.log_softmax(logits, axis=-1)
    v = jnp.tanh(jnp.maximum(feat @ vw1 + vb1, 0.0) @ vw2 + vb2)
    return logp, v


# --------------------------------- main -------------------------------------

if __name__ == "__main__":
    # Small shapes consistent with an AlphaZero board game:
    B, C_in, H, W = 2, 4, 8, 8          # batch, input planes, 8x8 board
    C_hid = 32                          # conv channels
    A = H * W + 1                       # action size (board cells + pass move)
    Dh = 64                             # value-head hidden size
    F = C_hid * H * W

    key = jax.random.PRNGKey(0)
    keys = jax.random.split(key, 9)

    x = jax.random.normal(keys[0], (B, C_in, H, W), dtype=jnp.float32)

    # Deterministic synthetic parameters in torch conventions.
    conv_w = 0.1 * jax.random.normal(keys[1], (C_hid, C_in, 3, 3), jnp.float32)
    conv_b = 0.1 * jax.random.normal(keys[2], (C_hid,), jnp.float32)
    pw = 0.02 * jax.random.normal(keys[3], (F, A), jnp.float32)
    pb = jnp.zeros((1, A), jnp.float32)
    vw1 = 0.02 * jax.random.normal(keys[4], (F, Dh), jnp.float32)
    vb1 = 0.1 * jax.random.normal(keys[5], (1, Dh), jnp.float32)
    vw2 = 0.1 * jax.random.normal(keys[6], (Dh, 1), jnp.float32)
    vb2 = jnp.zeros((1, 1), jnp.float32)

    params = (conv_w, conv_b, pw, pb, vw1, vb1, vw2, vb2)

    # One-time host-side weight repack (permute / pad / fuse / bf16-cast).
    packed = jax.block_until_ready(prepare_params(params, (H, W)))

    log_probs, value = jax.block_until_ready(
        policy_value_forward(x, packed, action_size=A))

    # Sanity checks against the pure-JAX f32 reference (`predict` semantics:
    # exp(log_probs) is a probability distribution, value in [-1, 1]).
    ref_lp, ref_v = jax.block_until_ready(_ref_forward(x, params))
    assert log_probs.shape == (B, A) and value.shape == (B, 1)
    probs = jnp.exp(log_probs)
    assert jnp.all(jnp.abs(probs.sum(axis=-1) - 1.0) < 1e-3)
    assert jnp.all(jnp.abs(value) <= 1.0)
    # bf16 MXU operands => a few 1e-3 of noise; a wrong weight permutation,
    # position-indexing bug or softmax-padding bug would produce O(0.1..1)
    # errors and trip these.
    assert jnp.max(jnp.abs(log_probs - ref_lp)) < 2e-2
    assert jnp.max(jnp.abs(value - ref_v)) < 2e-2

    print("KERNEL_OK")
</pallas_src>

<mosaic_0001>
module attributes {stable_mosaic.version = 11 : i64} {
  func.func @_fused_forward_kernel(%arg0: i32, %arg1: memref<128x48xbf16, #tpu.memory_space<vmem>>, %arg2: memref<48x32xbf16, #tpu.memory_space<vmem>>, %arg3: memref<1x32xf32, #tpu.memory_space<vmem>>, %arg4: memref<64x32x192xbf16, #tpu.memory_space<vmem>>, %arg5: memref<1x192xf32, #tpu.memory_space<vmem>>, %arg6: memref<1x64xf32, #tpu.memory_space<vmem>>, %arg7: memref<1x1xf32, #tpu.memory_space<smem>>, %arg8: memref<2x128xf32, #tpu.memory_space<vmem>>, %arg9: memref<2x1xf32, #tpu.memory_space<vmem>>) attributes {dimension_semantics = [#tpu.dimension_semantics<parallel>], iteration_bounds = array<i64: 1>, scalar_prefetch = 0 : i64, scratch_operands = 0 : i64, tpu.core_type = #tpu.core_type<tc>, window_params = [{transform_indices = @transform_0, window_bounds = array<i64: 128, 48>}, {pipeline_mode = #tpu.pipeline_mode<synchronous>, transform_indices = @transform_1, window_bounds = array<i64: 48, 32>}, {pipeline_mode = #tpu.pipeline_mode<synchronous>, transform_indices = @transform_2, window_bounds = array<i64: 1, 32>}, {pipeline_mode = #tpu.pipeline_mode<synchronous>, transform_indices = @transform_3, window_bounds = array<i64: 64, 32, 192>}, {pipeline_mode = #tpu.pipeline_mode<synchronous>, transform_indices = @transform_4, window_bounds = array<i64: 1, 192>}, {pipeline_mode = #tpu.pipeline_mode<synchronous>, transform_indices = @transform_5, window_bounds = array<i64: 1, 64>}, {transform_indices = @transform_6, window_bounds = array<i64: 1, 1>}, {transform_indices = @transform_7, window_bounds = array<i64: 2, 128>}, {transform_indices = @transform_8, window_bounds = array<i64: 2, 1>}]} {
    %c0 = arith.constant 0 : index
    %c0_0 = arith.constant 0 : index
    %0 = vector.load %arg1[%c0, %c0_0] : memref<128x48xbf16, #tpu.memory_space<vmem>>, vector<128x48xbf16>
    %c0_1 = arith.constant 0 : index
    %c0_2 = arith.constant 0 : index
    %1 = vector.load %arg2[%c0_1, %c0_2] : memref<48x32xbf16, #tpu.memory_space<vmem>>, vector<48x32xbf16>
    %cst = arith.constant dense<0.000000e+00> : vector<128x32xf32>
    %2 = tpu.matmul %0, %1, %cst {dimension_numbers = #tpu.dot_dimension_numbers<[1], [0], [0], [1], [0, 0, 1, 1], [], []>} : vector<128x48xbf16>, vector<48x32xbf16>, vector<128x32xf32> -> vector<128x32xf32>
    %c0_3 = arith.constant 0 : index
    %c0_4 = arith.constant 0 : index
    %3 = vector.load %arg3[%c0_3, %c0_4] : memref<1x32xf32, #tpu.memory_space<vmem>>, vector<1x32xf32>
    %4 = vector.broadcast %3 : vector<1x32xf32> to vector<128x32xf32>
    %5 = arith.addf %2, %4 : vector<128x32xf32>
    %cst_5 = arith.constant 0.000000e+00 : f32
    %6 = vector.broadcast %cst_5 : f32 to vector<128x32xf32>
    %7 = arith.maximumf %5, %6 : vector<128x32xf32>
    %cst_6 = arith.constant 0.000000e+00 : f32
    %8 = vector.broadcast %cst_6 : f32 to vector<2x192xf32>
    %9 = vector.extract_strided_slice %7 {offsets = [0, 0], sizes = [1, 32], strides = [1, 1]} : vector<128x32xf32> to vector<1x32xf32>
    %10 = vector.extract_strided_slice %7 {offsets = [64, 0], sizes = [1, 32], strides = [1, 1]} : vector<128x32xf32> to vector<1x32xf32>
    %11 = tpu.concatenate %9, %10 in 0 : vector<1x32xf32>, vector<1x32xf32> -> vector<2x32xf32>
    %12 = arith.truncf %11 : vector<2x32xf32> to vector<2x32xbf16>
    %c0_7 = arith.constant 0 : index
    %c0_8 = arith.constant 0 : index
    %c0_9 = arith.constant 0 : index
    %13 = vector.load %arg4[%c0_7, %c0_8, %c0_9] : memref<64x32x192xbf16, #tpu.memory_space<vmem>>, vector<1x32x192xbf16>
    %14 = vector.shape_cast %13 : vector<1x32x192xbf16> to vector<32x192xbf16>
    %cst_10 = arith.constant dense<0.000000e+00> : vector<2x192xf32>
    %15 = tpu.matmul %12, %14, %cst_10 {dimension_numbers = #tpu.dot_dimension_numbers<[1], [0], [0], [1], [0, 0, 1, 1], [], []>} : vector<2x32xbf16>, vector<32x192xbf16>, vector<2x192xf32> -> vector<2x192xf32>
    %16 = arith.addf %8, %15 : vector<2x192xf32>
    %17 = vector.extract_strided_slice %7 {offsets = [1, 0], sizes = [1, 32], strides = [1, 1]} : vector<128x32xf32> to vector<1x32xf32>
    %18 = vector.extract_strided_slice %7 {offsets = [65, 0], sizes = [1, 32], strides = [1, 1]} : vector<128x32xf32> to vector<1x32xf32>
    %19 = tpu.concatenate %17, %18 in 0 : vector<1x32xf32>, vector<1x32xf32> -> vector<2x32xf32>
    %20 = arith.truncf %19 : vector<2x32xf32> to vector<2x32xbf16>
    %c1 = arith.constant 1 : index
    %c0_11 = arith.constant 0 : index
    %c0_12 = arith.constant 0 : index
    %21 = vector.load %arg4[%c1, %c0_11, %c0_12] : memref<64x32x192xbf16, #tpu.memory_space<vmem>>, vector<1x32x192xbf16>
    %22 = vector.shape_cast %21 : vector<1x32x192xbf16> to vector<32x192xbf16>
    %cst_13 = arith.constant dense<0.000000e+00> : vector<2x192xf32>
    %23 = tpu.matmul %20, %22, %cst_13 {dimension_numbers = #tpu.dot_dimension_numbers<[1], [0], [0], [1], [0, 0, 1, 1], [], []>} : vector<2x32xbf16>, vector<32x192xbf16>, vector<2x192xf32> -> vector<2x192xf32>
    %24 = arith.addf %16, %23 : vector<2x192xf32>
    %25 = vector.extract_strided_slice %7 {offsets = [2, 0], sizes = [1, 32], strides = [1, 1]} : vector<128x32xf32> to vector<1x32xf32>
    %26 = vector.extract_strided_slice %7 {offsets = [66, 0], sizes = [1, 32], strides = [1, 1]} : vector<128x32xf32> to vector<1x32xf32>
    %27 = tpu.concatenate %25, %26 in 0 : vector<1x32xf32>, vector<1x32xf32> -> vector<2x32xf32>
    %28 = arith.truncf %27 : vector<2x32xf32> to vector<2x32xbf16>
    %c2 = arith.constant 2 : index
    %c0_14 = arith.constant 0 : index
    %c0_15 = arith.constant 0 : index
    %29 = vector.load %arg4[%c2, %c0_14, %c0_15] : memref<64x32x192xbf16, #tpu.memory_space<vmem>>, vector<1x32x192xbf16>
    %30 = vector.shape_cast %29 : vector<1x32x192xbf16> to vector<32x192xbf16>
    %cst_16 = arith.constant dense<0.000000e+00> : vector<2x192xf32>
    %31 = tpu.matmul %28, %30, %cst_16 {dimension_numbers = #tpu.dot_dimension_numbers<[1], [0], [0], [1], [0, 0, 1, 1], [], []>} : vector<2x32xbf16>, vector<32x192xbf16>, vector<2x192xf32> -> vector<2x192xf32>
    %32 = arith.addf %24, %31 : vector<2x192xf32>
    %33 = vector.extract_strided_slice %7 {offsets = [3, 0], sizes = [1, 32], strides = [1, 1]} : vector<128x32xf32> to vector<1x32xf32>
    %34 = vector.extract_strided_slice %7 {offsets = [67, 0], sizes = [1, 32], strides = [1, 1]} : vector<128x32xf32> to vector<1x32xf32>
    %35 = tpu.concatenate %33, %34 in 0 : vector<1x32xf32>, vector<1x32xf32> -> vector<2x32xf32>
    %36 = arith.truncf %35 : vector<2x32xf32> to vector<2x32xbf16>
    %c3 = arith.constant 3 : index
    %c0_17 = arith.constant 0 : index
    %c0_18 = arith.constant 0 : index
    %37 = vector.load %arg4[%c3, %c0_17, %c0_18] : memref<64x32x192xbf16, #tpu.memory_space<vmem>>, vector<1x32x192xbf16>
    %38 = vector.shape_cast %37 : vector<1x32x192xbf16> to vector<32x192xbf16>
    %cst_19 = arith.constant dense<0.000000e+00> : vector<2x192xf32>
    %39 = tpu.matmul %36, %38, %cst_19 {dimension_numbers = #tpu.dot_dimension_numbers<[1], [0], [0], [1], [0, 0, 1, 1], [], []>} : vector<2x32xbf16>, vector<32x192xbf16>, vector<2x192xf32> -> vector<2x192xf32>
    %40 = arith.addf %32, %39 : vector<2x192xf32>
    %41 = vector.extract_strided_slice %7 {offsets = [4, 0], sizes = [1, 32], strides = [1, 1]} : vector<128x32xf32> to vector<1x32xf32>
    %42 = vector.extract_strided_slice %7 {offsets = [68, 0], sizes = [1, 32], strides = [1, 1]} : vector<128x32xf32> to vector<1x32xf32>
    %43 = tpu.concatenate %41, %42 in 0 : vector<1x32xf32>, vector<1x32xf32> -> vector<2x32xf32>
    %44 = arith.truncf %43 : vector<2x32xf32> to vector<2x32xbf16>
    %c4 = arith.constant 4 : index
    %c0_20 = arith.constant 0 : index
    %c0_21 = arith.constant 0 : index
    %45 = vector.load %arg4[%c4, %c0_20, %c0_21] : memref<64x32x192xbf16, #tpu.memory_space<vmem>>, vector<1x32x192xbf16>
    %46 = vector.shape_cast %45 : vector<1x32x192xbf16> to vector<32x192xbf16>
    %cst_22 = arith.constant dense<0.000000e+00> : vector<2x192xf32>
    %47 = tpu.matmul %44, %46, %cst_22 {dimension_numbers = #tpu.dot_dimension_numbers<[1], [0], [0], [1], [0, 0, 1, 1], [], []>} : vector<2x32xbf16>, vector<32x192xbf16>, vector<2x192xf32> -> vector<2x192xf32>
    %48 = arith.addf %40, %47 : vector<2x192xf32>
    %49 = vector.extract_strided_slice %7 {offsets = [5, 0], sizes = [1, 32], strides = [1, 1]} : vector<128x32xf32> to vector<1x32xf32>
    %50 = vector.extract_strided_slice %7 {offsets = [69, 0], sizes = [1, 32], strides = [1, 1]} : vector<128x32xf32> to vector<1x32xf32>
    %51 = tpu.concatenate %49, %50 in 0 : vector<1x32xf32>, vector<1x32xf32> -> vector<2x32xf32>
    %52 = arith.truncf %51 : vector<2x32xf32> to vector<2x32xbf16>
    %c5 = arith.constant 5 : index
    %c0_23 = arith.constant 0 : index
    %c0_24 = arith.constant 0 : index
    %53 = vector.load %arg4[%c5, %c0_23, %c0_24] : memref<64x32x192xbf16, #tpu.memory_space<vmem>>, vector<1x32x192xbf16>
    %54 = vector.shape_cast %53 : vector<1x32x192xbf16> to vector<32x192xbf16>
    %cst_25 = arith.constant dense<0.000000e+00> : vector<2x192xf32>
    %55 = tpu.matmul %52, %54, %cst_25 {dimension_numbers = #tpu.dot_dimension_numbers<[1], [0], [0], [1], [0, 0, 1, 1], [], []>} : vector<2x32xbf16>, vector<32x192xbf16>, vector<2x192xf32> -> vector<2x192xf32>
    %56 = arith.addf %48, %55 : vector<2x192xf32>
    %57 = vector.extract_strided_slice %7 {offsets = [6, 0], sizes = [1, 32], strides = [1, 1]} : vector<128x32xf32> to vector<1x32xf32>
    %58 = vector.extract_strided_slice %7 {offsets = [70, 0], sizes = [1, 32], strides = [1, 1]} : vector<128x32xf32> to vector<1x32xf32>
    %59 = tpu.concatenate %57, %58 in 0 : vector<1x32xf32>, vector<1x32xf32> -> vector<2x32xf32>
    %60 = arith.truncf %59 : vector<2x32xf32> to vector<2x32xbf16>
    %c6 = arith.constant 6 : index
    %c0_26 = arith.constant 0 : index
    %c0_27 = arith.constant 0 : index
    %61 = vector.load %arg4[%c6, %c0_26, %c0_27] : memref<64x32x192xbf16, #tpu.memory_space<vmem>>, vector<1x32x192xbf16>
    %62 = vector.shape_cast %61 : vector<1x32x192xbf16> to vector<32x192xbf16>
    %cst_28 = arith.constant dense<0.000000e+00> : vector<2x192xf32>
    %63 = tpu.matmul %60, %62, %cst_28 {dimension_numbers = #tpu.dot_dimension_numbers<[1], [0], [0], [1], [0, 0, 1, 1], [], []>} : vector<2x32xbf16>, vector<32x192xbf16>, vector<2x192xf32> -> vector<2x192xf32>
    %64 = arith.addf %56, %63 : vector<2x192xf32>
    %65 = vector.extract_strided_slice %7 {offsets = [7, 0], sizes = [1, 32], strides = [1, 1]} : vector<128x32xf32> to vector<1x32xf32>
    %66 = vector.extract_strided_slice %7 {offsets = [71, 0], sizes = [1, 32], strides = [1, 1]} : vector<128x32xf32> to vector<1x32xf32>
    %67 = tpu.concatenate %65, %66 in 0 : vector<1x32xf32>, vector<1x32xf32> -> vector<2x32xf32>
    %68 = arith.truncf %67 : vector<2x32xf32> to vector<2x32xbf16>
    %c7 = arith.constant 7 : index
    %c0_29 = arith.constant 0 : index
    %c0_30 = arith.constant 0 : index
    %69 = vector.load %arg4[%c7, %c0_29, %c0_30] : memref<64x32x192xbf16, #tpu.memory_space<vmem>>, vector<1x32x192xbf16>
    %70 = vector.shape_cast %69 : vector<1x32x192xbf16> to vector<32x192xbf16>
    %cst_31 = arith.constant dense<0.000000e+00> : vector<2x192xf32>
    %71 = tpu.matmul %68, %70, %cst_31 {dimension_numbers = #tpu.dot_dimension_numbers<[1], [0], [0], [1], [0, 0, 1, 1], [], []>} : vector<2x32xbf16>, vector<32x192xbf16>, vector<2x192xf32> -> vector<2x192xf32>
    %72 = arith.addf %64, %71 : vector<2x192xf32>
    %73 = vector.extract_strided_slice %7 {offsets = [8, 0], sizes = [1, 32], strides = [1, 1]} : vector<128x32xf32> to vector<1x32xf32>
    %74 = vector.extract_strided_slice %7 {offsets = [72, 0], sizes = [1, 32], strides = [1, 1]} : vector<128x32xf32> to vector<1x32xf32>
    %75 = tpu.concatenate %73, %74 in 0 : vector<1x32xf32>, vector<1x32xf32> -> vector<2x32xf32>
    %76 = arith.truncf %75 : vector<2x32xf32> to vector<2x32xbf16>
    %c8 = arith.constant 8 : index
    %c0_32 = arith.constant 0 : index
    %c0_33 = arith.constant 0 : index
    %77 = vector.load %arg4[%c8, %c0_32, %c0_33] : memref<64x32x192xbf16, #tpu.memory_space<vmem>>, vector<1x32x192xbf16>
    %78 = vector.shape_cast %77 : vector<1x32x192xbf16> to vector<32x192xbf16>
    %cst_34 = arith.constant dense<0.000000e+00> : vector<2x192xf32>
    %79 = tpu.matmul %76, %78, %cst_34 {dimension_numbers = #tpu.dot_dimension_numbers<[1], [0], [0], [1], [0, 0, 1, 1], [], []>} : vector<2x32xbf16>, vector<32x192xbf16>, vector<2x192xf32> -> vector<2x192xf32>
    %80 = arith.addf %72, %79 : vector<2x192xf32>
    %81 = vector.extract_strided_slice %7 {offsets = [9, 0], sizes = [1, 32], strides = [1, 1]} : vector<128x32xf32> to vector<1x32xf32>
    %82 = vector.extract_strided_slice %7 {offsets = [73, 0], sizes = [1, 32], strides = [1, 1]} : vector<128x32xf32> to vector<1x32xf32>
    %83 = tpu.concatenate %81, %82 in 0 : vector<1x32xf32>, vector<1x32xf32> -> vector<2x32xf32>
    %84 = arith.truncf %83 : vector<2x32xf32> to vector<2x32xbf16>
    %c9 = arith.constant 9 : index
    %c0_35 = arith.constant 0 : index
    %c0_36 = arith.constant 0 : index
    %85 = vector.load %arg4[%c9, %c0_35, %c0_36] : memref<64x32x192xbf16, #tpu.memory_space<vmem>>, vector<1x32x192xbf16>
    %86 = vector.shape_cast %85 : vector<1x32x192xbf16> to vector<32x192xbf16>
    %cst_37 = arith.constant dense<0.000000e+00> : vector<2x192xf32>
    %87 = tpu.matmul %84, %86, %cst_37 {dimension_numbers = #tpu.dot_dimension_numbers<[1], [0], [0], [1], [0, 0, 1, 1], [], []>} : vector<2x32xbf16>, vector<32x192xbf16>, vector<2x192xf32> -> vector<2x192xf32>
    %88 = arith.addf %80, %87 : vector<2x192xf32>
    %89 = vector.extract_strided_slice %7 {offsets = [10, 0], sizes = [1, 32], strides = [1, 1]} : vector<128x32xf32> to vector<1x32xf32>
    %90 = vector.extract_strided_slice %7 {offsets = [74, 0], sizes = [1, 32], strides = [1, 1]} : vector<128x32xf32> to vector<1x32xf32>
    %91 = tpu.concatenate %89, %90 in 0 : vector<1x32xf32>, vector<1x32xf32> -> vector<2x32xf32>
    %92 = arith.truncf %91 : vector<2x32xf32> to vector<2x32xbf16>
    %c10 = arith.constant 10 : index
    %c0_38 = arith.constant 0 : index
    %c0_39 = arith.constant 0 : index
    %93 = vector.load %arg4[%c10, %c0_38, %c0_39] : memref<64x32x192xbf16, #tpu.memory_space<vmem>>, vector<1x32x192xbf16>
    %94 = vector.shape_cast %93 : vector<1x32x192xbf16> to vector<32x192xbf16>
    %cst_40 = arith.constant dense<0.000000e+00> : vector<2x192xf32>
    %95 = tpu.matmul %92, %94, %cst_40 {dimension_numbers = #tpu.dot_dimension_numbers<[1], [0], [0], [1], [0, 0, 1, 1], [], []>} : vector<2x32xbf16>, vector<32x192xbf16>, vector<2x192xf32> -> vector<2x192xf32>
    %96 = arith.addf %88, %95 : vector<2x192xf32>
    %97 = vector.extract_strided_slice %7 {offsets = [11, 0], sizes = [1, 32], strides = [1, 1]} : vector<128x32xf32> to vector<1x32xf32>
    %98 = vector.extract_strided_slice %7 {offsets = [75, 0], sizes = [1, 32], strides = [1, 1]} : vector<128x32xf32> to vector<1x32xf32>
    %99 = tpu.concatenate %97, %98 in 0 : vector<1x32xf32>, vector<1x32xf32> -> vector<2x32xf32>
    %100 = arith.truncf %99 : vector<2x32xf32> to vector<2x32xbf16>
    %c11 = arith.constant 11 : index
    %c0_41 = arith.constant 0 : index
    %c0_42 = arith.constant 0 : index
    %101 = vector.load %arg4[%c11, %c0_41, %c0_42] : memref<64x32x192xbf16, #tpu.memory_space<vmem>>, vector<1x32x192xbf16>
    %102 = vector.shape_cast %101 : vector<1x32x192xbf16> to vector<32x192xbf16>
    %cst_43 = arith.constant dense<0.000000e+00> : vector<2x192xf32>
    %103 = tpu.matmul %100, %102, %cst_43 {dimension_numbers = #tpu.dot_dimension_numbers<[1], [0], [0], [1], [0, 0, 1, 1], [], []>} : vector<2x32xbf16>, vector<32x192xbf16>, vector<2x192xf32> -> vector<2x192xf32>
    %104 = arith.addf %96, %103 : vector<2x192xf32>
    %105 = vector.extract_strided_slice %7 {offsets = [12, 0], sizes = [1, 32], strides = [1, 1]} : vector<128x32xf32> to vector<1x32xf32>
    %106 = vector.extract_strided_slice %7 {offsets = [76, 0], sizes = [1, 32], strides = [1, 1]} : vector<128x32xf32> to vector<1x32xf32>
    %107 = tpu.concatenate %105, %106 in 0 : vector<1x32xf32>, vector<1x32xf32> -> vector<2x32xf32>
    %108 = arith.truncf %107 : vector<2x32xf32> to vector<2x32xbf16>
    %c12 = arith.constant 12 : index
    %c0_44 = arith.constant 0 : index
    %c0_45 = arith.constant 0 : index
    %109 = vector.load %arg4[%c12, %c0_44, %c0_45] : memref<64x32x192xbf16, #tpu.memory_space<vmem>>, vector<1x32x192xbf16>
    %110 = vector.shape_cast %109 : vector<1x32x192xbf16> to vector<32x192xbf16>
    %cst_46 = arith.constant dense<0.000000e+00> : vector<2x192xf32>
    %111 = tpu.matmul %108, %110, %cst_46 {dimension_numbers = #tpu.dot_dimension_numbers<[1], [0], [0], [1], [0, 0, 1, 1], [], []>} : vector<2x32xbf16>, vector<32x192xbf16>, vector<2x192xf32> -> vector<2x192xf32>
    %112 = arith.addf %104, %111 : vector<2x192xf32>
    %113 = vector.extract_strided_slice %7 {offsets = [13, 0], sizes = [1, 32], strides = [1, 1]} : vector<128x32xf32> to vector<1x32xf32>
    %114 = vector.extract_strided_slice %7 {offsets = [77, 0], sizes = [1, 32], strides = [1, 1]} : vector<128x32xf32> to vector<1x32xf32>
    %115 = tpu.concatenate %113, %114 in 0 : vector<1x32xf32>, vector<1x32xf32> -> vector<2x32xf32>
    %116 = arith.truncf %115 : vector<2x32xf32> to vector<2x32xbf16>
    %c13 = arith.constant 13 : index
    %c0_47 = arith.constant 0 : index
    %c0_48 = arith.constant 0 : index
    %117 = vector.load %arg4[%c13, %c0_47, %c0_48] : memref<64x32x192xbf16, #tpu.memory_space<vmem>>, vector<1x32x192xbf16>
    %118 = vector.shape_cast %117 : vector<1x32x192xbf16> to vector<32x192xbf16>
    %cst_49 = arith.constant dense<0.000000e+00> : vector<2x192xf32>
    %119 = tpu.matmul %116, %118, %cst_49 {dimension_numbers = #tpu.dot_dimension_numbers<[1], [0], [0], [1], [0, 0, 1, 1], [], []>} : vector<2x32xbf16>, vector<32x192xbf16>, vector<2x192xf32> -> vector<2x192xf32>
    %120 = arith.addf %112, %119 : vector<2x192xf32>
    %121 = vector.extract_strided_slice %7 {offsets = [14, 0], sizes = [1, 32], strides = [1, 1]} : vector<128x32xf32> to vector<1x32xf32>
    %122 = vector.extract_strided_slice %7 {offsets = [78, 0], sizes = [1, 32], strides = [1, 1]} : vector<128x32xf32> to vector<1x32xf32>
    %123 = tpu.concatenate %121, %122 in 0 : vector<1x32xf32>, vector<1x32xf32> -> vector<2x32xf32>
    %124 = arith.truncf %123 : vector<2x32xf32> to vector<2x32xbf16>
    %c14 = arith.constant 14 : index
    %c0_50 = arith.constant 0 : index
    %c0_51 = arith.constant 0 : index
    %125 = vector.load %arg4[%c14, %c0_50, %c0_51] : memref<64x32x192xbf16, #tpu.memory_space<vmem>>, vector<1x32x192xbf16>
    %126 = vector.shape_cast %125 : vector<1x32x192xbf16> to vector<32x192xbf16>
    %cst_52 = arith.constant dense<0.000000e+00> : vector<2x192xf32>
    %127 = tpu.matmul %124, %126, %cst_52 {dimension_numbers = #tpu.dot_dimension_numbers<[1], [0], [0], [1], [0, 0, 1, 1], [], []>} : vector<2x32xbf16>, vector<32x192xbf16>, vector<2x192xf32> -> vector<2x192xf32>
    %128 = arith.addf %120, %127 : vector<2x192xf32>
    %129 = vector.extract_strided_slice %7 {offsets = [15, 0], sizes = [1, 32], strides = [1, 1]} : vector<128x32xf32> to vector<1x32xf32>
    %130 = vector.extract_strided_slice %7 {offsets = [79, 0], sizes = [1, 32], strides = [1, 1]} : vector<128x32xf32> to vector<1x32xf32>
    %131 = tpu.concatenate %129, %130 in 0 : vector<1x32xf32>, vector<1x32xf32> -> vector<2x32xf32>
    %132 = arith.truncf %131 : vector<2x32xf32> to vector<2x32xbf16>
    %c15 = arith.constant 15 : index
    %c0_53 = arith.constant 0 : index
    %c0_54 = arith.constant 0 : index
    %133 = vector.load %arg4[%c15, %c0_53, %c0_54] : memref<64x32x192xbf16, #tpu.memory_space<vmem>>, vector<1x32x192xbf16>
    %134 = vector.shape_cast %133 : vector<1x32x192xbf16> to vector<32x192xbf16>
    %cst_55 = arith.constant dense<0.000000e+00> : vector<2x192xf32>
    %135 = tpu.matmul %132, %134, %cst_55 {dimension_numbers = #tpu.dot_dimension_numbers<[1], [0], [0], [1], [0, 0, 1, 1], [], []>} : vector<2x32xbf16>, vector<32x192xbf16>, vector<2x192xf32> -> vector<2x192xf32>
    %136 = arith.addf %128, %135 : vector<2x192xf32>
    %137 = vector.extract_strided_slice %7 {offsets = [16, 0], sizes = [1, 32], strides = [1, 1]} : vector<128x32xf32> to vector<1x32xf32>
    %138 = vector.extract_strided_slice %7 {offsets = [80, 0], sizes = [1, 32], strides = [1, 1]} : vector<128x32xf32> to vector<1x32xf32>
    %139 = tpu.concatenate %137, %138 in 0 : vector<1x32xf32>, vector<1x32xf32> -> vector<2x32xf32>
    %140 = arith.truncf %139 : vector<2x32xf32> to vector<2x32xbf16>
    %c16 = arith.constant 16 : index
    %c0_56 = arith.constant 0 : index
    %c0_57 = arith.constant 0 : index
    %141 = vector.load %arg4[%c16, %c0_56, %c0_57] : memref<64x32x192xbf16, #tpu.memory_space<vmem>>, vector<1x32x192xbf16>
    %142 = vector.shape_cast %141 : vector<1x32x192xbf16> to vector<32x192xbf16>
    %cst_58 = arith.constant dense<0.000000e+00> : vector<2x192xf32>
    %143 = tpu.matmul %140, %142, %cst_58 {dimension_numbers = #tpu.dot_dimension_numbers<[1], [0], [0], [1], [0, 0, 1, 1], [], []>} : vector<2x32xbf16>, vector<32x192xbf16>, vector<2x192xf32> -> vector<2x192xf32>
    %144 = arith.addf %136, %143 : vector<2x192xf32>
    %145 = vector.extract_strided_slice %7 {offsets = [17, 0], sizes = [1, 32], strides = [1, 1]} : vector<128x32xf32> to vector<1x32xf32>
    %146 = vector.extract_strided_slice %7 {offsets = [81, 0], sizes = [1, 32], strides = [1, 1]} : vector<128x32xf32> to vector<1x32xf32>
    %147 = tpu.concatenate %145, %146 in 0 : vector<1x32xf32>, vector<1x32xf32> -> vector<2x32xf32>
    %148 = arith.truncf %147 : vector<2x32xf32> to vector<2x32xbf16>
    %c17 = arith.constant 17 : index
    %c0_59 = arith.constant 0 : index
    %c0_60 = arith.constant 0 : index
    %149 = vector.load %arg4[%c17, %c0_59, %c0_60] : memref<64x32x192xbf16, #tpu.memory_space<vmem>>, vector<1x32x192xbf16>
    %150 = vector.shape_cast %149 : vector<1x32x192xbf16> to vector<32x192xbf16>
    %cst_61 = arith.constant dense<0.000000e+00> : vector<2x192xf32>
    %151 = tpu.matmul %148, %150, %cst_61 {dimension_numbers = #tpu.dot_dimension_numbers<[1], [0], [0], [1], [0, 0, 1, 1], [], []>} : vector<2x32xbf16>, vector<32x192xbf16>, vector<2x192xf32> -> vector<2x192xf32>
    %152 = arith.addf %144, %151 : vector<2x192xf32>
    %153 = vector.extract_strided_slice %7 {offsets = [18, 0], sizes = [1, 32], strides = [1, 1]} : vector<128x32xf32> to vector<1x32xf32>
    %154 = vector.extract_strided_slice %7 {offsets = [82, 0], sizes = [1, 32], strides = [1, 1]} : vector<128x32xf32> to vector<1x32xf32>
    %155 = tpu.concatenate %153, %154 in 0 : vector<1x32xf32>, vector<1x32xf32> -> vector<2x32xf32>
    %156 = arith.truncf %155 : vector<2x32xf32> to vector<2x32xbf16>
    %c18 = arith.constant 18 : index
    %c0_62 = arith.constant 0 : index
    %c0_63 = arith.constant 0 : index
    %157 = vector.load %arg4[%c18, %c0_62, %c0_63] : memref<64x32x192xbf16, #tpu.memory_space<vmem>>, vector<1x32x192xbf16>
    %158 = vector.shape_cast %157 : vector<1x32x192xbf16> to vector<32x192xbf16>
    %cst_64 = arith.constant dense<0.000000e+00> : vector<2x192xf32>
    %159 = tpu.matmul %156, %158, %cst_64 {dimension_numbers = #tpu.dot_dimension_numbers<[1], [0], [0], [1], [0, 0, 1, 1], [], []>} : vector<2x32xbf16>, vector<32x192xbf16>, vector<2x192xf32> -> vector<2x192xf32>
    %160 = arith.addf %152, %159 : vector<2x192xf32>
    %161 = vector.extract_strided_slice %7 {offsets = [19, 0], sizes = [1, 32], strides = [1, 1]} : vector<128x32xf32> to vector<1x32xf32>
    %162 = vector.extract_strided_slice %7 {offsets = [83, 0], sizes = [1, 32], strides = [1, 1]} : vector<128x32xf32> to vector<1x32xf32>
    %163 = tpu.concatenate %161, %162 in 0 : vector<1x32xf32>, vector<1x32xf32> -> vector<2x32xf32>
    %164 = arith.truncf %163 : vector<2x32xf32> to vector<2x32xbf16>
    %c19 = arith.constant 19 : index
    %c0_65 = arith.constant 0 : index
    %c0_66 = arith.constant 0 : index
    %165 = vector.load %arg4[%c19, %c0_65, %c0_66] : memref<64x32x192xbf16, #tpu.memory_space<vmem>>, vector<1x32x192xbf16>
    %166 = vector.shape_cast %165 : vector<1x32x192xbf16> to vector<32x192xbf16>
    %cst_67 = arith.constant dense<0.000000e+00> : vector<2x192xf32>
    %167 = tpu.matmul %164, %166, %cst_67 {dimension_numbers = #tpu.dot_dimension_numbers<[1], [0], [0], [1], [0, 0, 1, 1], [], []>} : vector<2x32xbf16>, vector<32x192xbf16>, vector<2x192xf32> -> vector<2x192xf32>
    %168 = arith.addf %160, %167 : vector<2x192xf32>
    %169 = vector.extract_strided_slice %7 {offsets = [20, 0], sizes = [1, 32], strides = [1, 1]} : vector<128x32xf32> to vector<1x32xf32>
    %170 = vector.extract_strided_slice %7 {offsets = [84, 0], sizes = [1, 32], strides = [1, 1]} : vector<128x32xf32> to vector<1x32xf32>
    %171 = tpu.concatenate %169, %170 in 0 : vector<1x32xf32>, vector<1x32xf32> -> vector<2x32xf32>
    %172 = arith.truncf %171 : vector<2x32xf32> to vector<2x32xbf16>
    %c20 = arith.constant 20 : index
    %c0_68 = arith.constant 0 : index
    %c0_69 = arith.constant 0 : index
    %173 = vector.load %arg4[%c20, %c0_68, %c0_69] : memref<64x32x192xbf16, #tpu.memory_space<vmem>>, vector<1x32x192xbf16>
    %174 = vector.shape_cast %173 : vector<1x32x192xbf16> to vector<32x192xbf16>
    %cst_70 = arith.constant dense<0.000000e+00> : vector<2x192xf32>
    %175 = tpu.matmul %172, %174, %cst_70 {dimension_numbers = #tpu.dot_dimension_numbers<[1], [0], [0], [1], [0, 0, 1, 1], [], []>} : vector<2x32xbf16>, vector<32x192xbf16>, vector<2x192xf32> -> vector<2x192xf32>
    %176 = arith.addf %168, %175 : vector<2x192xf32>
    %177 = vector.extract_strided_slice %7 {offsets = [21, 0], sizes = [1, 32], strides = [1, 1]} : vector<128x32xf32> to vector<1x32xf32>
    %178 = vector.extract_strided_slice %7 {offsets = [85, 0], sizes = [1, 32], strides = [1, 1]} : vector<128x32xf32> to vector<1x32xf32>
    %179 = tpu.concatenate %177, %178 in 0 : vector<1x32xf32>, vector<1x32xf32> -> vector<2x32xf32>
    %180 = arith.truncf %179 : vector<2x32xf32> to vector<2x32xbf16>
    %c21 = arith.constant 21 : index
    %c0_71 = arith.constant 0 : index
    %c0_72 = arith.constant 0 : index
    %181 = vector.load %arg4[%c21, %c0_71, %c0_72] : memref<64x32x192xbf16, #tpu.memory_space<vmem>>, vector<1x32x192xbf16>
    %182 = vector.shape_cast %181 : vector<1x32x192xbf16> to vector<32x192xbf16>
    %cst_73 = arith.constant dense<0.000000e+00> : vector<2x192xf32>
    %183 = tpu.matmul %180, %182, %cst_73 {dimension_numbers = #tpu.dot_dimension_numbers<[1], [0], [0], [1], [0, 0, 1, 1], [], []>} : vector<2x32xbf16>, vector<32x192xbf16>, vector<2x192xf32> -> vector<2x192xf32>
    %184 = arith.addf %176, %183 : vector<2x192xf32>
    %185 = vector.extract_strided_slice %7 {offsets = [22, 0], sizes = [1, 32], strides = [1, 1]} : vector<128x32xf32> to vector<1x32xf32>
    %186 = vector.extract_strided_slice %7 {offsets = [86, 0], sizes = [1, 32], strides = [1, 1]} : vector<128x32xf32> to vector<1x32xf32>
    %187 = tpu.concatenate %185, %186 in 0 : vector<1x32xf32>, vector<1x32xf32> -> vector<2x32xf32>
    %188 = arith.truncf %187 : vector<2x32xf32> to vector<2x32xbf16>
    %c22 = arith.constant 22 : index
    %c0_74 = arith.constant 0 : index
    %c0_75 = arith.constant 0 : index
    %189 = vector.load %arg4[%c22, %c0_74, %c0_75] : memref<64x32x192xbf16, #tpu.memory_space<vmem>>, vector<1x32x192xbf16>
    %190 = vector.shape_cast %189 : vector<1x32x192xbf16> to vector<32x192xbf16>
    %cst_76 = arith.constant dense<0.000000e+00> : vector<2x192xf32>
    %191 = tpu.matmul %188, %190, %cst_76 {dimension_numbers = #tpu.dot_dimension_numbers<[1], [0], [0], [1], [0, 0, 1, 1], [], []>} : vector<2x32xbf16>, vector<32x192xbf16>, vector<2x192xf32> -> vector<2x192xf32>
    %192 = arith.addf %184, %191 : vector<2x192xf32>
    %193 = vector.extract_strided_slice %7 {offsets = [23, 0], sizes = [1, 32], strides = [1, 1]} : vector<128x32xf32> to vector<1x32xf32>
    %194 = vector.extract_strided_slice %7 {offsets = [87, 0], sizes = [1, 32], strides = [1, 1]} : vector<128x32xf32> to vector<1x32xf32>
    %195 = tpu.concatenate %193, %194 in 0 : vector<1x32xf32>, vector<1x32xf32> -> vector<2x32xf32>
    %196 = arith.truncf %195 : vector<2x32xf32> to vector<2x32xbf16>
    %c23 = arith.constant 23 : index
    %c0_77 = arith.constant 0 : index
    %c0_78 = arith.constant 0 : index
    %197 = vector.load %arg4[%c23, %c0_77, %c0_78] : memref<64x32x192xbf16, #tpu.memory_space<vmem>>, vector<1x32x192xbf16>
    %198 = vector.shape_cast %197 : vector<1x32x192xbf16> to vector<32x192xbf16>
    %cst_79 = arith.constant dense<0.000000e+00> : vector<2x192xf32>
    %199 = tpu.matmul %196, %198, %cst_79 {dimension_numbers = #tpu.dot_dimension_numbers<[1], [0], [0], [1], [0, 0, 1, 1], [], []>} : vector<2x32xbf16>, vector<32x192xbf16>, vector<2x192xf32> -> vector<2x192xf32>
    %200 = arith.addf %192, %199 : vector<2x192xf32>
    %201 = vector.extract_strided_slice %7 {offsets = [24, 0], sizes = [1, 32], strides = [1, 1]} : vector<128x32xf32> to vector<1x32xf32>
    %202 = vector.extract_strided_slice %7 {offsets = [88, 0], sizes = [1, 32], strides = [1, 1]} : vector<128x32xf32> to vector<1x32xf32>
    %203 = tpu.concatenate %201, %202 in 0 : vector<1x32xf32>, vector<1x32xf32> -> vector<2x32xf32>
    %204 = arith.truncf %203 : vector<2x32xf32> to vector<2x32xbf16>
    %c24 = arith.constant 24 : index
    %c0_80 = arith.constant 0 : index
    %c0_81 = arith.constant 0 : index
    %205 = vector.load %arg4[%c24, %c0_80, %c0_81] : memref<64x32x192xbf16, #tpu.memory_space<vmem>>, vector<1x32x192xbf16>
    %206 = vector.shape_cast %205 : vector<1x32x192xbf16> to vector<32x192xbf16>
    %cst_82 = arith.constant dense<0.000000e+00> : vector<2x192xf32>
    %207 = tpu.matmul %204, %206, %cst_82 {dimension_numbers = #tpu.dot_dimension_numbers<[1], [0], [0], [1], [0, 0, 1, 1], [], []>} : vector<2x32xbf16>, vector<32x192xbf16>, vector<2x192xf32> -> vector<2x192xf32>
    %208 = arith.addf %200, %207 : vector<2x192xf32>
    %209 = vector.extract_strided_slice %7 {offsets = [25, 0], sizes = [1, 32], strides = [1, 1]} : vector<128x32xf32> to vector<1x32xf32>
    %210 = vector.extract_strided_slice %7 {offsets = [89, 0], sizes = [1, 32], strides = [1, 1]} : vector<128x32xf32> to vector<1x32xf32>
    %211 = tpu.concatenate %209, %210 in 0 : vector<1x32xf32>, vector<1x32xf32> -> vector<2x32xf32>
    %212 = arith.truncf %211 : vector<2x32xf32> to vector<2x32xbf16>
    %c25 = arith.constant 25 : index
    %c0_83 = arith.constant 0 : index
    %c0_84 = arith.constant 0 : index
    %213 = vector.load %arg4[%c25, %c0_83, %c0_84] : memref<64x32x192xbf16, #tpu.memory_space<vmem>>, vector<1x32x192xbf16>
    %214 = vector.shape_cast %213 : vector<1x32x192xbf16> to vector<32x192xbf16>
    %cst_85 = arith.constant dense<0.000000e+00> : vector<2x192xf32>
    %215 = tpu.matmul %212, %214, %cst_85 {dimension_numbers = #tpu.dot_dimension_numbers<[1], [0], [0], [1], [0, 0, 1, 1], [], []>} : vector<2x32xbf16>, vector<32x192xbf16>, vector<2x192xf32> -> vector<2x192xf32>
    %216 = arith.addf %208, %215 : vector<2x192xf32>
    %217 = vector.extract_strided_slice %7 {offsets = [26, 0], sizes = [1, 32], strides = [1, 1]} : vector<128x32xf32> to vector<1x32xf32>
    %218 = vector.extract_strided_slice %7 {offsets = [90, 0], sizes = [1, 32], strides = [1, 1]} : vector<128x32xf32> to vector<1x32xf32>
    %219 = tpu.concatenate %217, %218 in 0 : vector<1x32xf32>, vector<1x32xf32> -> vector<2x32xf32>
    %220 = arith.truncf %219 : vector<2x32xf32> to vector<2x32xbf16>
    %c26 = arith.constant 26 : index
    %c0_86 = arith.constant 0 : index
    %c0_87 = arith.constant 0 : index
    %221 = vector.load %arg4[%c26, %c0_86, %c0_87] : memref<64x32x192xbf16, #tpu.memory_space<vmem>>, vector<1x32x192xbf16>
    %222 = vector.shape_cast %221 : vector<1x32x192xbf16> to vector<32x192xbf16>
    %cst_88 = arith.constant dense<0.000000e+00> : vector<2x192xf32>
    %223 = tpu.matmul %220, %222, %cst_88 {dimension_numbers = #tpu.dot_dimension_numbers<[1], [0], [0], [1], [0, 0, 1, 1], [], []>} : vector<2x32xbf16>, vector<32x192xbf16>, vector<2x192xf32> -> vector<2x192xf32>
    %224 = arith.addf %216, %223 : vector<2x192xf32>
    %225 = vector.extract_strided_slice %7 {offsets = [27, 0], sizes = [1, 32], strides = [1, 1]} : vector<128x32xf32> to vector<1x32xf32>
    %226 = vector.extract_strided_slice %7 {offsets = [91, 0], sizes = [1, 32], strides = [1, 1]} : vector<128x32xf32> to vector<1x32xf32>
    %227 = tpu.concatenate %225, %226 in 0 : vector<1x32xf32>, vector<1x32xf32> -> vector<2x32xf32>
    %228 = arith.truncf %227 : vector<2x32xf32> to vector<2x32xbf16>
    %c27 = arith.constant 27 : index
    %c0_89 = arith.constant 0 : index
    %c0_90 = arith.constant 0 : index
    %229 = vector.load %arg4[%c27, %c0_89, %c0_90] : memref<64x32x192xbf16, #tpu.memory_space<vmem>>, vector<1x32x192xbf16>
    %230 = vector.shape_cast %229 : vector<1x32x192xbf16> to vector<32x192xbf16>
    %cst_91 = arith.constant dense<0.000000e+00> : vector<2x192xf32>
    %231 = tpu.matmul %228, %230, %cst_91 {dimension_numbers = #tpu.dot_dimension_numbers<[1], [0], [0], [1], [0, 0, 1, 1], [], []>} : vector<2x32xbf16>, vector<32x192xbf16>, vector<2x192xf32> -> vector<2x192xf32>
    %232 = arith.addf %224, %231 : vector<2x192xf32>
    %233 = vector.extract_strided_slice %7 {offsets = [28, 0], sizes = [1, 32], strides = [1, 1]} : vector<128x32xf32> to vector<1x32xf32>
    %234 = vector.extract_strided_slice %7 {offsets = [92, 0], sizes = [1, 32], strides = [1, 1]} : vector<128x32xf32> to vector<1x32xf32>
    %235 = tpu.concatenate %233, %234 in 0 : vector<1x32xf32>, vector<1x32xf32> -> vector<2x32xf32>
    %236 = arith.truncf %235 : vector<2x32xf32> to vector<2x32xbf16>
    %c28 = arith.constant 28 : index
    %c0_92 = arith.constant 0 : index
    %c0_93 = arith.constant 0 : index
    %237 = vector.load %arg4[%c28, %c0_92, %c0_93] : memref<64x32x192xbf16, #tpu.memory_space<vmem>>, vector<1x32x192xbf16>
    %238 = vector.shape_cast %237 : vector<1x32x192xbf16> to vector<32x192xbf16>
    %cst_94 = arith.constant dense<0.000000e+00> : vector<2x192xf32>
    %239 = tpu.matmul %236, %238, %cst_94 {dimension_numbers = #tpu.dot_dimension_numbers<[1], [0], [0], [1], [0, 0, 1, 1], [], []>} : vector<2x32xbf16>, vector<32x192xbf16>, vector<2x192xf32> -> vector<2x192xf32>
    %240 = arith.addf %232, %239 : vector<2x192xf32>
    %241 = vector.extract_strided_slice %7 {offsets = [29, 0], sizes = [1, 32], strides = [1, 1]} : vector<128x32xf32> to vector<1x32xf32>
    %242 = vector.extract_strided_slice %7 {offsets = [93, 0], sizes = [1, 32], strides = [1, 1]} : vector<128x32xf32> to vector<1x32xf32>
    %243 = tpu.concatenate %241, %242 in 0 : vector<1x32xf32>, vector<1x32xf32> -> vector<2x32xf32>
    %244 = arith.truncf %243 : vector<2x32xf32> to vector<2x32xbf16>
    %c29 = arith.constant 29 : index
    %c0_95 = arith.constant 0 : index
    %c0_96 = arith.constant 0 : index
    %245 = vector.load %arg4[%c29, %c0_95, %c0_96] : memref<64x32x192xbf16, #tpu.memory_space<vmem>>, vector<1x32x192xbf16>
    %246 = vector.shape_cast %245 : vector<1x32x192xbf16> to vector<32x192xbf16>
    %cst_97 = arith.constant dense<0.000000e+00> : vector<2x192xf32>
    %247 = tpu.matmul %244, %246, %cst_97 {dimension_numbers = #tpu.dot_dimension_numbers<[1], [0], [0], [1], [0, 0, 1, 1], [], []>} : vector<2x32xbf16>, vector<32x192xbf16>, vector<2x192xf32> -> vector<2x192xf32>
    %248 = arith.addf %240, %247 : vector<2x192xf32>
    %249 = vector.extract_strided_slice %7 {offsets = [30, 0], sizes = [1, 32], strides = [1, 1]} : vector<128x32xf32> to vector<1x32xf32>
    %250 = vector.extract_strided_slice %7 {offsets = [94, 0], sizes = [1, 32], strides = [1, 1]} : vector<128x32xf32> to vector<1x32xf32>
    %251 = tpu.concatenate %249, %250 in 0 : vector<1x32xf32>, vector<1x32xf32> -> vector<2x32xf32>
    %252 = arith.truncf %251 : vector<2x32xf32> to vector<2x32xbf16>
    %c30 = arith.constant 30 : index
    %c0_98 = arith.constant 0 : index
    %c0_99 = arith.constant 0 : index
    %253 = vector.load %arg4[%c30, %c0_98, %c0_99] : memref<64x32x192xbf16, #tpu.memory_space<vmem>>, vector<1x32x192xbf16>
    %254 = vector.shape_cast %253 : vector<1x32x192xbf16> to vector<32x192xbf16>
    %cst_100 = arith.constant dense<0.000000e+00> : vector<2x192xf32>
    %255 = tpu.matmul %252, %254, %cst_100 {dimension_numbers = #tpu.dot_dimension_numbers<[1], [0], [0], [1], [0, 0, 1, 1], [], []>} : vector<2x32xbf16>, vector<32x192xbf16>, vector<2x192xf32> -> vector<2x192xf32>
    %256 = arith.addf %248, %255 : vector<2x192xf32>
    %257 = vector.extract_strided_slice %7 {offsets = [31, 0], sizes = [1, 32], strides = [1, 1]} : vector<128x32xf32> to vector<1x32xf32>
    %258 = vector.extract_strided_slice %7 {offsets = [95, 0], sizes = [1, 32], strides = [1, 1]} : vector<128x32xf32> to vector<1x32xf32>
    %259 = tpu.concatenate %257, %258 in 0 : vector<1x32xf32>, vector<1x32xf32> -> vector<2x32xf32>
    %260 = arith.truncf %259 : vector<2x32xf32> to vector<2x32xbf16>
    %c31 = arith.constant 31 : index
    %c0_101 = arith.constant 0 : index
    %c0_102 = arith.constant 0 : index
    %261 = vector.load %arg4[%c31, %c0_101, %c0_102] : memref<64x32x192xbf16, #tpu.memory_space<vmem>>, vector<1x32x192xbf16>
    %262 = vector.shape_cast %261 : vector<1x32x192xbf16> to vector<32x192xbf16>
    %cst_103 = arith.constant dense<0.000000e+00> : vector<2x192xf32>
    %263 = tpu.matmul %260, %262, %cst_103 {dimension_numbers = #tpu.dot_dimension_numbers<[1], [0], [0], [1], [0, 0, 1, 1], [], []>} : vector<2x32xbf16>, vector<32x192xbf16>, vector<2x192xf32> -> vector<2x192xf32>
    %264 = arith.addf %256, %263 : vector<2x192xf32>
    %265 = vector.extract_strided_slice %7 {offsets = [32, 0], sizes = [1, 32], strides = [1, 1]} : vector<128x32xf32> to vector<1x32xf32>
    %266 = vector.extract_strided_slice %7 {offsets = [96, 0], sizes = [1, 32], strides = [1, 1]} : vector<128x32xf32> to vector<1x32xf32>
    %267 = tpu.concatenate %265, %266 in 0 : vector<1x32xf32>, vector<1x32xf32> -> vector<2x32xf32>
    %268 = arith.truncf %267 : vector<2x32xf32> to vector<2x32xbf16>
    %c32 = arith.constant 32 : index
    %c0_104 = arith.constant 0 : index
    %c0_105 = arith.constant 0 : index
    %269 = vector.load %arg4[%c32, %c0_104, %c0_105] : memref<64x32x192xbf16, #tpu.memory_space<vmem>>, vector<1x32x192xbf16>
    %270 = vector.shape_cast %269 : vector<1x32x192xbf16> to vector<32x192xbf16>
    %cst_106 = arith.constant dense<0.000000e+00> : vector<2x192xf32>
    %271 = tpu.matmul %268, %270, %cst_106 {dimension_numbers = #tpu.dot_dimension_numbers<[1], [0], [0], [1], [0, 0, 1, 1], [], []>} : vector<2x32xbf16>, vector<32x192xbf16>, vector<2x192xf32> -> vector<2x192xf32>
    %272 = arith.addf %264, %271 : vector<2x192xf32>
    %273 = vector.extract_strided_slice %7 {offsets = [33, 0], sizes = [1, 32], strides = [1, 1]} : vector<128x32xf32> to vector<1x32xf32>
    %274 = vector.extract_strided_slice %7 {offsets = [97, 0], sizes = [1, 32], strides = [1, 1]} : vector<128x32xf32> to vector<1x32xf32>
    %275 = tpu.concatenate %273, %274 in 0 : vector<1x32xf32>, vector<1x32xf32> -> vector<2x32xf32>
    %276 = arith.truncf %275 : vector<2x32xf32> to vector<2x32xbf16>
    %c33 = arith.constant 33 : index
    %c0_107 = arith.constant 0 : index
    %c0_108 = arith.constant 0 : index
    %277 = vector.load %arg4[%c33, %c0_107, %c0_108] : memref<64x32x192xbf16, #tpu.memory_space<vmem>>, vector<1x32x192xbf16>
    %278 = vector.shape_cast %277 : vector<1x32x192xbf16> to vector<32x192xbf16>
    %cst_109 = arith.constant dense<0.000000e+00> : vector<2x192xf32>
    %279 = tpu.matmul %276, %278, %cst_109 {dimension_numbers = #tpu.dot_dimension_numbers<[1], [0], [0], [1], [0, 0, 1, 1], [], []>} : vector<2x32xbf16>, vector<32x192xbf16>, vector<2x192xf32> -> vector<2x192xf32>
    %280 = arith.addf %272, %279 : vector<2x192xf32>
    %281 = vector.extract_strided_slice %7 {offsets = [34, 0], sizes = [1, 32], strides = [1, 1]} : vector<128x32xf32> to vector<1x32xf32>
    %282 = vector.extract_strided_slice %7 {offsets = [98, 0], sizes = [1, 32], strides = [1, 1]} : vector<128x32xf32> to vector<1x32xf32>
    %283 = tpu.concatenate %281, %282 in 0 : vector<1x32xf32>, vector<1x32xf32> -> vector<2x32xf32>
    %284 = arith.truncf %283 : vector<2x32xf32> to vector<2x32xbf16>
    %c34 = arith.constant 34 : index
    %c0_110 = arith.constant 0 : index
    %c0_111 = arith.constant 0 : index
    %285 = vector.load %arg4[%c34, %c0_110, %c0_111] : memref<64x32x192xbf16, #tpu.memory_space<vmem>>, vector<1x32x192xbf16>
    %286 = vector.shape_cast %285 : vector<1x32x192xbf16> to vector<32x192xbf16>
    %cst_112 = arith.constant dense<0.000000e+00> : vector<2x192xf32>
    %287 = tpu.matmul %284, %286, %cst_112 {dimension_numbers = #tpu.dot_dimension_numbers<[1], [0], [0], [1], [0, 0, 1, 1], [], []>} : vector<2x32xbf16>, vector<32x192xbf16>, vector<2x192xf32> -> vector<2x192xf32>
    %288 = arith.addf %280, %287 : vector<2x192xf32>
    %289 = vector.extract_strided_slice %7 {offsets = [35, 0], sizes = [1, 32], strides = [1, 1]} : vector<128x32xf32> to vector<1x32xf32>
    %290 = vector.extract_strided_slice %7 {offsets = [99, 0], sizes = [1, 32], strides = [1, 1]} : vector<128x32xf32> to vector<1x32xf32>
    %291 = tpu.concatenate %289, %290 in 0 : vector<1x32xf32>, vector<1x32xf32> -> vector<2x32xf32>
    %292 = arith.truncf %291 : vector<2x32xf32> to vector<2x32xbf16>
    %c35 = arith.constant 35 : index
    %c0_113 = arith.constant 0 : index
    %c0_114 = arith.constant 0 : index
    %293 = vector.load %arg4[%c35, %c0_113, %c0_114] : memref<64x32x192xbf16, #tpu.memory_space<vmem>>, vector<1x32x192xbf16>
    %294 = vector.shape_cast %293 : vector<1x32x192xbf16> to vector<32x192xbf16>
    %cst_115 = arith.constant dense<0.000000e+00> : vector<2x192xf32>
    %295 = tpu.matmul %292, %294, %cst_115 {dimension_numbers = #tpu.dot_dimension_numbers<[1], [0], [0], [1], [0, 0, 1, 1], [], []>} : vector<2x32xbf16>, vector<32x192xbf16>, vector<2x192xf32> -> vector<2x192xf32>
    %296 = arith.addf %288, %295 : vector<2x192xf32>
    %297 = vector.extract_strided_slice %7 {offsets = [36, 0], sizes = [1, 32], strides = [1, 1]} : vector<128x32xf32> to vector<1x32xf32>
    %298 = vector.extract_strided_slice %7 {offsets = [100, 0], sizes = [1, 32], strides = [1, 1]} : vector<128x32xf32> to vector<1x32xf32>
    %299 = tpu.concatenate %297, %298 in 0 : vector<1x32xf32>, vector<1x32xf32> -> vector<2x32xf32>
    %300 = arith.truncf %299 : vector<2x32xf32> to vector<2x32xbf16>
    %c36 = arith.constant 36 : index
    %c0_116 = arith.constant 0 : index
    %c0_117 = arith.constant 0 : index
    %301 = vector.load %arg4[%c36, %c0_116, %c0_117] : memref<64x32x192xbf16, #tpu.memory_space<vmem>>, vector<1x32x192xbf16>
    %302 = vector.shape_cast %301 : vector<1x32x192xbf16> to vector<32x192xbf16>
    %cst_118 = arith.constant dense<0.000000e+00> : vector<2x192xf32>
    %303 = tpu.matmul %300, %302, %cst_118 {dimension_numbers = #tpu.dot_dimension_numbers<[1], [0], [0], [1], [0, 0, 1, 1], [], []>} : vector<2x32xbf16>, vector<32x192xbf16>, vector<2x192xf32> -> vector<2x192xf32>
    %304 = arith.addf %296, %303 : vector<2x192xf32>
    %305 = vector.extract_strided_slice %7 {offsets = [37, 0], sizes = [1, 32], strides = [1, 1]} : vector<128x32xf32> to vector<1x32xf32>
    %306 = vector.extract_strided_slice %7 {offsets = [101, 0], sizes = [1, 32], strides = [1, 1]} : vector<128x32xf32> to vector<1x32xf32>
    %307 = tpu.concatenate %305, %306 in 0 : vector<1x32xf32>, vector<1x32xf32> -> vector<2x32xf32>
    %308 = arith.truncf %307 : vector<2x32xf32> to vector<2x32xbf16>
    %c37 = arith.constant 37 : index
    %c0_119 = arith.constant 0 : index
    %c0_120 = arith.constant 0 : index
    %309 = vector.load %arg4[%c37, %c0_119, %c0_120] : memref<64x32x192xbf16, #tpu.memory_space<vmem>>, vector<1x32x192xbf16>
    %310 = vector.shape_cast %309 : vector<1x32x192xbf16> to vector<32x192xbf16>
    %cst_121 = arith.constant dense<0.000000e+00> : vector<2x192xf32>
    %311 = tpu.matmul %308, %310, %cst_121 {dimension_numbers = #tpu.dot_dimension_numbers<[1], [0], [0], [1], [0, 0, 1, 1], [], []>} : vector<2x32xbf16>, vector<32x192xbf16>, vector<2x192xf32> -> vector<2x192xf32>
    %312 = arith.addf %304, %311 : vector<2x192xf32>
    %313 = vector.extract_strided_slice %7 {offsets = [38, 0], sizes = [1, 32], strides = [1, 1]} : vector<128x32xf32> to vector<1x32xf32>
    %314 = vector.extract_strided_slice %7 {offsets = [102, 0], sizes = [1, 32], strides = [1, 1]} : vector<128x32xf32> to vector<1x32xf32>
    %315 = tpu.concatenate %313, %314 in 0 : vector<1x32xf32>, vector<1x32xf32> -> vector<2x32xf32>
    %316 = arith.truncf %315 : vector<2x32xf32> to vector<2x32xbf16>
    %c38 = arith.constant 38 : index
    %c0_122 = arith.constant 0 : index
    %c0_123 = arith.constant 0 : index
    %317 = vector.load %arg4[%c38, %c0_122, %c0_123] : memref<64x32x192xbf16, #tpu.memory_space<vmem>>, vector<1x32x192xbf16>
    %318 = vector.shape_cast %317 : vector<1x32x192xbf16> to vector<32x192xbf16>
    %cst_124 = arith.constant dense<0.000000e+00> : vector<2x192xf32>
    %319 = tpu.matmul %316, %318, %cst_124 {dimension_numbers = #tpu.dot_dimension_numbers<[1], [0], [0], [1], [0, 0, 1, 1], [], []>} : vector<2x32xbf16>, vector<32x192xbf16>, vector<2x192xf32> -> vector<2x192xf32>
    %320 = arith.addf %312, %319 : vector<2x192xf32>
    %321 = vector.extract_strided_slice %7 {offsets = [39, 0], sizes = [1, 32], strides = [1, 1]} : vector<128x32xf32> to vector<1x32xf32>
    %322 = vector.extract_strided_slice %7 {offsets = [103, 0], sizes = [1, 32], strides = [1, 1]} : vector<128x32xf32> to vector<1x32xf32>
    %323 = tpu.concatenate %321, %322 in 0 : vector<1x32xf32>, vector<1x32xf32> -> vector<2x32xf32>
    %324 = arith.truncf %323 : vector<2x32xf32> to vector<2x32xbf16>
    %c39 = arith.constant 39 : index
    %c0_125 = arith.constant 0 : index
    %c0_126 = arith.constant 0 : index
    %325 = vector.load %arg4[%c39, %c0_125, %c0_126] : memref<64x32x192xbf16, #tpu.memory_space<vmem>>, vector<1x32x192xbf16>
    %326 = vector.shape_cast %325 : vector<1x32x192xbf16> to vector<32x192xbf16>
    %cst_127 = arith.constant dense<0.000000e+00> : vector<2x192xf32>
    %327 = tpu.matmul %324, %326, %cst_127 {dimension_numbers = #tpu.dot_dimension_numbers<[1], [0], [0], [1], [0, 0, 1, 1], [], []>} : vector<2x32xbf16>, vector<32x192xbf16>, vector<2x192xf32> -> vector<2x192xf32>
    %328 = arith.addf %320, %327 : vector<2x192xf32>
    %329 = vector.extract_strided_slice %7 {offsets = [40, 0], sizes = [1, 32], strides = [1, 1]} : vector<128x32xf32> to vector<1x32xf32>
    %330 = vector.extract_strided_slice %7 {offsets = [104, 0], sizes = [1, 32], strides = [1, 1]} : vector<128x32xf32> to vector<1x32xf32>
    %331 = tpu.concatenate %329, %330 in 0 : vector<1x32xf32>, vector<1x32xf32> -> vector<2x32xf32>
    %332 = arith.truncf %331 : vector<2x32xf32> to vector<2x32xbf16>
    %c40 = arith.constant 40 : index
    %c0_128 = arith.constant 0 : index
    %c0_129 = arith.constant 0 : index
    %333 = vector.load %arg4[%c40, %c0_128, %c0_129] : memref<64x32x192xbf16, #tpu.memory_space<vmem>>, vector<1x32x192xbf16>
    %334 = vector.shape_cast %333 : vector<1x32x192xbf16> to vector<32x192xbf16>
    %cst_130 = arith.constant dense<0.000000e+00> : vector<2x192xf32>
    %335 = tpu.matmul %332, %334, %cst_130 {dimension_numbers = #tpu.dot_dimension_numbers<[1], [0], [0], [1], [0, 0, 1, 1], [], []>} : vector<2x32xbf16>, vector<32x192xbf16>, vector<2x192xf32> -> vector<2x192xf32>
    %336 = arith.addf %328, %335 : vector<2x192xf32>
    %337 = vector.extract_strided_slice %7 {offsets = [41, 0], sizes = [1, 32], strides = [1, 1]} : vector<128x32xf32> to vector<1x32xf32>
    %338 = vector.extract_strided_slice %7 {offsets = [105, 0], sizes = [1, 32], strides = [1, 1]} : vector<128x32xf32> to vector<1x32xf32>
    %339 = tpu.concatenate %337, %338 in 0 : vector<1x32xf32>, vector<1x32xf32> -> vector<2x32xf32>
    %340 = arith.truncf %339 : vector<2x32xf32> to vector<2x32xbf16>
    %c41 = arith.constant 41 : index
    %c0_131 = arith.constant 0 : index
    %c0_132 = arith.constant 0 : index
    %341 = vector.load %arg4[%c41, %c0_131, %c0_132] : memref<64x32x192xbf16, #tpu.memory_space<vmem>>, vector<1x32x192xbf16>
    %342 = vector.shape_cast %341 : vector<1x32x192xbf16> to vector<32x192xbf16>
    %cst_133 = arith.constant dense<0.000000e+00> : vector<2x192xf32>
    %343 = tpu.matmul %340, %342, %cst_133 {dimension_numbers = #tpu.dot_dimension_numbers<[1], [0], [0], [1], [0, 0, 1, 1], [], []>} : vector<2x32xbf16>, vector<32x192xbf16>, vector<2x192xf32> -> vector<2x192xf32>
    %344 = arith.addf %336, %343 : vector<2x192xf32>
    %345 = vector.extract_strided_slice %7 {offsets = [42, 0], sizes = [1, 32], strides = [1, 1]} : vector<128x32xf32> to vector<1x32xf32>
    %346 = vector.extract_strided_slice %7 {offsets = [106, 0], sizes = [1, 32], strides = [1, 1]} : vector<128x32xf32> to vector<1x32xf32>
    %347 = tpu.concatenate %345, %346 in 0 : vector<1x32xf32>, vector<1x32xf32> -> vector<2x32xf32>
    %348 = arith.truncf %347 : vector<2x32xf32> to vector<2x32xbf16>
    %c42 = arith.constant 42 : index
    %c0_134 = arith.constant 0 : index
    %c0_135 = arith.constant 0 : index
    %349 = vector.load %arg4[%c42, %c0_134, %c0_135] : memref<64x32x192xbf16, #tpu.memory_space<vmem>>, vector<1x32x192xbf16>
    %350 = vector.shape_cast %349 : vector<1x32x192xbf16> to vector<32x192xbf16>
    %cst_136 = arith.constant dense<0.000000e+00> : vector<2x192xf32>
    %351 = tpu.matmul %348, %350, %cst_136 {dimension_numbers = #tpu.dot_dimension_numbers<[1], [0], [0], [1], [0, 0, 1, 1], [], []>} : vector<2x32xbf16>, vector<32x192xbf16>, vector<2x192xf32> -> vector<2x192xf32>
    %352 = arith.addf %344, %351 : vector<2x192xf32>
    %353 = vector.extract_strided_slice %7 {offsets = [43, 0], sizes = [1, 32], strides = [1, 1]} : vector<128x32xf32> to vector<1x32xf32>
    %354 = vector.extract_strided_slice %7 {offsets = [107, 0], sizes = [1, 32], strides = [1, 1]} : vector<128x32xf32> to vector<1x32xf32>
    %355 = tpu.concatenate %353, %354 in 0 : vector<1x32xf32>, vector<1x32xf32> -> vector<2x32xf32>
    %356 = arith.truncf %355 : vector<2x32xf32> to vector<2x32xbf16>
    %c43 = arith.constant 43 : index
    %c0_137 = arith.constant 0 : index
    %c0_138 = arith.constant 0 : index
    %357 = vector.load %arg4[%c43, %c0_137, %c0_138] : memref<64x32x192xbf16, #tpu.memory_space<vmem>>, vector<1x32x192xbf16>
    %358 = vector.shape_cast %357 : vector<1x32x192xbf16> to vector<32x192xbf16>
    %cst_139 = arith.constant dense<0.000000e+00> : vector<2x192xf32>
    %359 = tpu.matmul %356, %358, %cst_139 {dimension_numbers = #tpu.dot_dimension_numbers<[1], [0], [0], [1], [0, 0, 1, 1], [], []>} : vector<2x32xbf16>, vector<32x192xbf16>, vector<2x192xf32> -> vector<2x192xf32>
    %360 = arith.addf %352, %359 : vector<2x192xf32>
    %361 = vector.extract_strided_slice %7 {offsets = [44, 0], sizes = [1, 32], strides = [1, 1]} : vector<128x32xf32> to vector<1x32xf32>
    %362 = vector.extract_strided_slice %7 {offsets = [108, 0], sizes = [1, 32], strides = [1, 1]} : vector<128x32xf32> to vector<1x32xf32>
    %363 = tpu.concatenate %361, %362 in 0 : vector<1x32xf32>, vector<1x32xf32> -> vector<2x32xf32>
    %364 = arith.truncf %363 : vector<2x32xf32> to vector<2x32xbf16>
    %c44 = arith.constant 44 : index
    %c0_140 = arith.constant 0 : index
    %c0_141 = arith.constant 0 : index
    %365 = vector.load %arg4[%c44, %c0_140, %c0_141] : memref<64x32x192xbf16, #tpu.memory_space<vmem>>, vector<1x32x192xbf16>
    %366 = vector.shape_cast %365 : vector<1x32x192xbf16> to vector<32x192xbf16>
    %cst_142 = arith.constant dense<0.000000e+00> : vector<2x192xf32>
    %367 = tpu.matmul %364, %366, %cst_142 {dimension_numbers = #tpu.dot_dimension_numbers<[1], [0], [0], [1], [0, 0, 1, 1], [], []>} : vector<2x32xbf16>, vector<32x192xbf16>, vector<2x192xf32> -> vector<2x192xf32>
    %368 = arith.addf %360, %367 : vector<2x192xf32>
    %369 = vector.extract_strided_slice %7 {offsets = [45, 0], sizes = [1, 32], strides = [1, 1]} : vector<128x32xf32> to vector<1x32xf32>
    %370 = vector.extract_strided_slice %7 {offsets = [109, 0], sizes = [1, 32], strides = [1, 1]} : vector<128x32xf32> to vector<1x32xf32>
    %371 = tpu.concatenate %369, %370 in 0 : vector<1x32xf32>, vector<1x32xf32> -> vector<2x32xf32>
    %372 = arith.truncf %371 : vector<2x32xf32> to vector<2x32xbf16>
    %c45 = arith.constant 45 : index
    %c0_143 = arith.constant 0 : index
    %c0_144 = arith.constant 0 : index
    %373 = vector.load %arg4[%c45, %c0_143, %c0_144] : memref<64x32x192xbf16, #tpu.memory_space<vmem>>, vector<1x32x192xbf16>
    %374 = vector.shape_cast %373 : vector<1x32x192xbf16> to vector<32x192xbf16>
    %cst_145 = arith.constant dense<0.000000e+00> : vector<2x192xf32>
    %375 = tpu.matmul %372, %374, %cst_145 {dimension_numbers = #tpu.dot_dimension_numbers<[1], [0], [0], [1], [0, 0, 1, 1], [], []>} : vector<2x32xbf16>, vector<32x192xbf16>, vector<2x192xf32> -> vector<2x192xf32>
    %376 = arith.addf %368, %375 : vector<2x192xf32>
    %377 = vector.extract_strided_slice %7 {offsets = [46, 0], sizes = [1, 32], strides = [1, 1]} : vector<128x32xf32> to vector<1x32xf32>
    %378 = vector.extract_strided_slice %7 {offsets = [110, 0], sizes = [1, 32], strides = [1, 1]} : vector<128x32xf32> to vector<1x32xf32>
    %379 = tpu.concatenate %377, %378 in 0 : vector<1x32xf32>, vector<1x32xf32> -> vector<2x32xf32>
    %380 = arith.truncf %379 : vector<2x32xf32> to vector<2x32xbf16>
    %c46 = arith.constant 46 : index
    %c0_146 = arith.constant 0 : index
    %c0_147 = arith.constant 0 : index
    %381 = vector.load %arg4[%c46, %c0_146, %c0_147] : memref<64x32x192xbf16, #tpu.memory_space<vmem>>, vector<1x32x192xbf16>
    %382 = vector.shape_cast %381 : vector<1x32x192xbf16> to vector<32x192xbf16>
    %cst_148 = arith.constant dense<0.000000e+00> : vector<2x192xf32>
    %383 = tpu.matmul %380, %382, %cst_148 {dimension_numbers = #tpu.dot_dimension_numbers<[1], [0], [0], [1], [0, 0, 1, 1], [], []>} : vector<2x32xbf16>, vector<32x192xbf16>, vector<2x192xf32> -> vector<2x192xf32>
    %384 = arith.addf %376, %383 : vector<2x192xf32>
    %385 = vector.extract_strided_slice %7 {offsets = [47, 0], sizes = [1, 32], strides = [1, 1]} : vector<128x32xf32> to vector<1x32xf32>
    %386 = vector.extract_strided_slice %7 {offsets = [111, 0], sizes = [1, 32], strides = [1, 1]} : vector<128x32xf32> to vector<1x32xf32>
    %387 = tpu.concatenate %385, %386 in 0 : vector<1x32xf32>, vector<1x32xf32> -> vector<2x32xf32>
    %388 = arith.truncf %387 : vector<2x32xf32> to vector<2x32xbf16>
    %c47 = arith.constant 47 : index
    %c0_149 = arith.constant 0 : index
    %c0_150 = arith.constant 0 : index
    %389 = vector.load %arg4[%c47, %c0_149, %c0_150] : memref<64x32x192xbf16, #tpu.memory_space<vmem>>, vector<1x32x192xbf16>
    %390 = vector.shape_cast %389 : vector<1x32x192xbf16> to vector<32x192xbf16>
    %cst_151 = arith.constant dense<0.000000e+00> : vector<2x192xf32>
    %391 = tpu.matmul %388, %390, %cst_151 {dimension_numbers = #tpu.dot_dimension_numbers<[1], [0], [0], [1], [0, 0, 1, 1], [], []>} : vector<2x32xbf16>, vector<32x192xbf16>, vector<2x192xf32> -> vector<2x192xf32>
    %392 = arith.addf %384, %391 : vector<2x192xf32>
    %393 = vector.extract_strided_slice %7 {offsets = [48, 0], sizes = [1, 32], strides = [1, 1]} : vector<128x32xf32> to vector<1x32xf32>
    %394 = vector.extract_strided_slice %7 {offsets = [112, 0], sizes = [1, 32], strides = [1, 1]} : vector<128x32xf32> to vector<1x32xf32>
    %395 = tpu.concatenate %393, %394 in 0 : vector<1x32xf32>, vector<1x32xf32> -> vector<2x32xf32>
    %396 = arith.truncf %395 : vector<2x32xf32> to vector<2x32xbf16>
    %c48 = arith.constant 48 : index
    %c0_152 = arith.constant 0 : index
    %c0_153 = arith.constant 0 : index
    %397 = vector.load %arg4[%c48, %c0_152, %c0_153] : memref<64x32x192xbf16, #tpu.memory_space<vmem>>, vector<1x32x192xbf16>
    %398 = vector.shape_cast %397 : vector<1x32x192xbf16> to vector<32x192xbf16>
    %cst_154 = arith.constant dense<0.000000e+00> : vector<2x192xf32>
    %399 = tpu.matmul %396, %398, %cst_154 {dimension_numbers = #tpu.dot_dimension_numbers<[1], [0], [0], [1], [0, 0, 1, 1], [], []>} : vector<2x32xbf16>, vector<32x192xbf16>, vector<2x192xf32> -> vector<2x192xf32>
    %400 = arith.addf %392, %399 : vector<2x192xf32>
    %401 = vector.extract_strided_slice %7 {offsets = [49, 0], sizes = [1, 32], strides = [1, 1]} : vector<128x32xf32> to vector<1x32xf32>
    %402 = vector.extract_strided_slice %7 {offsets = [113, 0], sizes = [1, 32], strides = [1, 1]} : vector<128x32xf32> to vector<1x32xf32>
    %403 = tpu.concatenate %401, %402 in 0 : vector<1x32xf32>, vector<1x32xf32> -> vector<2x32xf32>
    %404 = arith.truncf %403 : vector<2x32xf32> to vector<2x32xbf16>
    %c49 = arith.constant 49 : index
    %c0_155 = arith.constant 0 : index
    %c0_156 = arith.constant 0 : index
    %405 = vector.load %arg4[%c49, %c0_155, %c0_156] : memref<64x32x192xbf16, #tpu.memory_space<vmem>>, vector<1x32x192xbf16>
    %406 = vector.shape_cast %405 : vector<1x32x192xbf16> to vector<32x192xbf16>
    %cst_157 = arith.constant dense<0.000000e+00> : vector<2x192xf32>
    %407 = tpu.matmul %404, %406, %cst_157 {dimension_numbers = #tpu.dot_dimension_numbers<[1], [0], [0], [1], [0, 0, 1, 1], [], []>} : vector<2x32xbf16>, vector<32x192xbf16>, vector<2x192xf32> -> vector<2x192xf32>
    %408 = arith.addf %400, %407 : vector<2x192xf32>
    %409 = vector.extract_strided_slice %7 {offsets = [50, 0], sizes = [1, 32], strides = [1, 1]} : vector<128x32xf32> to vector<1x32xf32>
    %410 = vector.extract_strided_slice %7 {offsets = [114, 0], sizes = [1, 32], strides = [1, 1]} : vector<128x32xf32> to vector<1x32xf32>
    %411 = tpu.concatenate %409, %410 in 0 : vector<1x32xf32>, vector<1x32xf32> -> vector<2x32xf32>
    %412 = arith.truncf %411 : vector<2x32xf32> to vector<2x32xbf16>
    %c50 = arith.constant 50 : index
    %c0_158 = arith.constant 0 : index
    %c0_159 = arith.constant 0 : index
    %413 = vector.load %arg4[%c50, %c0_158, %c0_159] : memref<64x32x192xbf16, #tpu.memory_space<vmem>>, vector<1x32x192xbf16>
    %414 = vector.shape_cast %413 : vector<1x32x192xbf16> to vector<32x192xbf16>
    %cst_160 = arith.constant dense<0.000000e+00> : vector<2x192xf32>
    %415 = tpu.matmul %412, %414, %cst_160 {dimension_numbers = #tpu.dot_dimension_numbers<[1], [0], [0], [1], [0, 0, 1, 1], [], []>} : vector<2x32xbf16>, vector<32x192xbf16>, vector<2x192xf32> -> vector<2x192xf32>
    %416 = arith.addf %408, %415 : vector<2x192xf32>
    %417 = vector.extract_strided_slice %7 {offsets = [51, 0], sizes = [1, 32], strides = [1, 1]} : vector<128x32xf32> to vector<1x32xf32>
    %418 = vector.extract_strided_slice %7 {offsets = [115, 0], sizes = [1, 32], strides = [1, 1]} : vector<128x32xf32> to vector<1x32xf32>
    %419 = tpu.concatenate %417, %418 in 0 : vector<1x32xf32>, vector<1x32xf32> -> vector<2x32xf32>
    %420 = arith.truncf %419 : vector<2x32xf32> to vector<2x32xbf16>
    %c51 = arith.constant 51 : index
    %c0_161 = arith.constant 0 : index
    %c0_162 = arith.constant 0 : index
    %421 = vector.load %arg4[%c51, %c0_161, %c0_162] : memref<64x32x192xbf16, #tpu.memory_space<vmem>>, vector<1x32x192xbf16>
    %422 = vector.shape_cast %421 : vector<1x32x192xbf16> to vector<32x192xbf16>
    %cst_163 = arith.constant dense<0.000000e+00> : vector<2x192xf32>
    %423 = tpu.matmul %420, %422, %cst_163 {dimension_numbers = #tpu.dot_dimension_numbers<[1], [0], [0], [1], [0, 0, 1, 1], [], []>} : vector<2x32xbf16>, vector<32x192xbf16>, vector<2x192xf32> -> vector<2x192xf32>
    %424 = arith.addf %416, %423 : vector<2x192xf32>
    %425 = vector.extract_strided_slice %7 {offsets = [52, 0], sizes = [1, 32], strides = [1, 1]} : vector<128x32xf32> to vector<1x32xf32>
    %426 = vector.extract_strided_slice %7 {offsets = [116, 0], sizes = [1, 32], strides = [1, 1]} : vector<128x32xf32> to vector<1x32xf32>
    %427 = tpu.concatenate %425, %426 in 0 : vector<1x32xf32>, vector<1x32xf32> -> vector<2x32xf32>
    %428 = arith.truncf %427 : vector<2x32xf32> to vector<2x32xbf16>
    %c52 = arith.constant 52 : index
    %c0_164 = arith.constant 0 : index
    %c0_165 = arith.constant 0 : index
    %429 = vector.load %arg4[%c52, %c0_164, %c0_165] : memref<64x32x192xbf16, #tpu.memory_space<vmem>>, vector<1x32x192xbf16>
    %430 = vector.shape_cast %429 : vector<1x32x192xbf16> to vector<32x192xbf16>
    %cst_166 = arith.constant dense<0.000000e+00> : vector<2x192xf32>
    %431 = tpu.matmul %428, %430, %cst_166 {dimension_numbers = #tpu.dot_dimension_numbers<[1], [0], [0], [1], [0, 0, 1, 1], [], []>} : vector<2x32xbf16>, vector<32x192xbf16>, vector<2x192xf32> -> vector<2x192xf32>
    %432 = arith.addf %424, %431 : vector<2x192xf32>
    %433 = vector.extract_strided_slice %7 {offsets = [53, 0], sizes = [1, 32], strides = [1, 1]} : vector<128x32xf32> to vector<1x32xf32>
    %434 = vector.extract_strided_slice %7 {offsets = [117, 0], sizes = [1, 32], strides = [1, 1]} : vector<128x32xf32> to vector<1x32xf32>
    %435 = tpu.concatenate %433, %434 in 0 : vector<1x32xf32>, vector<1x32xf32> -> vector<2x32xf32>
    %436 = arith.truncf %435 : vector<2x32xf32> to vector<2x32xbf16>
    %c53 = arith.constant 53 : index
    %c0_167 = arith.constant 0 : index
    %c0_168 = arith.constant 0 : index
    %437 = vector.load %arg4[%c53, %c0_167, %c0_168] : memref<64x32x192xbf16, #tpu.memory_space<vmem>>, vector<1x32x192xbf16>
    %438 = vector.shape_cast %437 : vector<1x32x192xbf16> to vector<32x192xbf16>
    %cst_169 = arith.constant dense<0.000000e+00> : vector<2x192xf32>
    %439 = tpu.matmul %436, %438, %cst_169 {dimension_numbers = #tpu.dot_dimension_numbers<[1], [0], [0], [1], [0, 0, 1, 1], [], []>} : vector<2x32xbf16>, vector<32x192xbf16>, vector<2x192xf32> -> vector<2x192xf32>
    %440 = arith.addf %432, %439 : vector<2x192xf32>
    %441 = vector.extract_strided_slice %7 {offsets = [54, 0], sizes = [1, 32], strides = [1, 1]} : vector<128x32xf32> to vector<1x32xf32>
    %442 = vector.extract_strided_slice %7 {offsets = [118, 0], sizes = [1, 32], strides = [1, 1]} : vector<128x32xf32> to vector<1x32xf32>
    %443 = tpu.concatenate %441, %442 in 0 : vector<1x32xf32>, vector<1x32xf32> -> vector<2x32xf32>
    %444 = arith.truncf %443 : vector<2x32xf32> to vector<2x32xbf16>
    %c54 = arith.constant 54 : index
    %c0_170 = arith.constant 0 : index
    %c0_171 = arith.constant 0 : index
    %445 = vector.load %arg4[%c54, %c0_170, %c0_171] : memref<64x32x192xbf16, #tpu.memory_space<vmem>>, vector<1x32x192xbf16>
    %446 = vector.shape_cast %445 : vector<1x32x192xbf16> to vector<32x192xbf16>
    %cst_172 = arith.constant dense<0.000000e+00> : vector<2x192xf32>
    %447 = tpu.matmul %444, %446, %cst_172 {dimension_numbers = #tpu.dot_dimension_numbers<[1], [0], [0], [1], [0, 0, 1, 1], [], []>} : vector<2x32xbf16>, vector<32x192xbf16>, vector<2x192xf32> -> vector<2x192xf32>
    %448 = arith.addf %440, %447 : vector<2x192xf32>
    %449 = vector.extract_strided_slice %7 {offsets = [55, 0], sizes = [1, 32], strides = [1, 1]} : vector<128x32xf32> to vector<1x32xf32>
    %450 = vector.extract_strided_slice %7 {offsets = [119, 0], sizes = [1, 32], strides = [1, 1]} : vector<128x32xf32> to vector<1x32xf32>
    %451 = tpu.concatenate %449, %450 in 0 : vector<1x32xf32>, vector<1x32xf32> -> vector<2x32xf32>
    %452 = arith.truncf %451 : vector<2x32xf32> to vector<2x32xbf16>
    %c55 = arith.constant 55 : index
    %c0_173 = arith.constant 0 : index
    %c0_174 = arith.constant 0 : index
    %453 = vector.load %arg4[%c55, %c0_173, %c0_174] : memref<64x32x192xbf16, #tpu.memory_space<vmem>>, vector<1x32x192xbf16>
    %454 = vector.shape_cast %453 : vector<1x32x192xbf16> to vector<32x192xbf16>
    %cst_175 = arith.constant dense<0.000000e+00> : vector<2x192xf32>
    %455 = tpu.matmul %452, %454, %cst_175 {dimension_numbers = #tpu.dot_dimension_numbers<[1], [0], [0], [1], [0, 0, 1, 1], [], []>} : vector<2x32xbf16>, vector<32x192xbf16>, vector<2x192xf32> -> vector<2x192xf32>
    %456 = arith.addf %448, %455 : vector<2x192xf32>
    %457 = vector.extract_strided_slice %7 {offsets = [56, 0], sizes = [1, 32], strides = [1, 1]} : vector<128x32xf32> to vector<1x32xf32>
    %458 = vector.extract_strided_slice %7 {offsets = [120, 0], sizes = [1, 32], strides = [1, 1]} : vector<128x32xf32> to vector<1x32xf32>
    %459 = tpu.concatenate %457, %458 in 0 : vector<1x32xf32>, vector<1x32xf32> -> vector<2x32xf32>
    %460 = arith.truncf %459 : vector<2x32xf32> to vector<2x32xbf16>
    %c56 = arith.constant 56 : index
    %c0_176 = arith.constant 0 : index
    %c0_177 = arith.constant 0 : index
    %461 = vector.load %arg4[%c56, %c0_176, %c0_177] : memref<64x32x192xbf16, #tpu.memory_space<vmem>>, vector<1x32x192xbf16>
    %462 = vector.shape_cast %461 : vector<1x32x192xbf16> to vector<32x192xbf16>
    %cst_178 = arith.constant dense<0.000000e+00> : vector<2x192xf32>
    %463 = tpu.matmul %460, %462, %cst_178 {dimension_numbers = #tpu.dot_dimension_numbers<[1], [0], [0], [1], [0, 0, 1, 1], [], []>} : vector<2x32xbf16>, vector<32x192xbf16>, vector<2x192xf32> -> vector<2x192xf32>
    %464 = arith.addf %456, %463 : vector<2x192xf32>
    %465 = vector.extract_strided_slice %7 {offsets = [57, 0], sizes = [1, 32], strides = [1, 1]} : vector<128x32xf32> to vector<1x32xf32>
    %466 = vector.extract_strided_slice %7 {offsets = [121, 0], sizes = [1, 32], strides = [1, 1]} : vector<128x32xf32> to vector<1x32xf32>
    %467 = tpu.concatenate %465, %466 in 0 : vector<1x32xf32>, vector<1x32xf32> -> vector<2x32xf32>
    %468 = arith.truncf %467 : vector<2x32xf32> to vector<2x32xbf16>
    %c57 = arith.constant 57 : index
    %c0_179 = arith.constant 0 : index
    %c0_180 = arith.constant 0 : index
    %469 = vector.load %arg4[%c57, %c0_179, %c0_180] : memref<64x32x192xbf16, #tpu.memory_space<vmem>>, vector<1x32x192xbf16>
    %470 = vector.shape_cast %469 : vector<1x32x192xbf16> to vector<32x192xbf16>
    %cst_181 = arith.constant dense<0.000000e+00> : vector<2x192xf32>
    %471 = tpu.matmul %468, %470, %cst_181 {dimension_numbers = #tpu.dot_dimension_numbers<[1], [0], [0], [1], [0, 0, 1, 1], [], []>} : vector<2x32xbf16>, vector<32x192xbf16>, vector<2x192xf32> -> vector<2x192xf32>
    %472 = arith.addf %464, %471 : vector<2x192xf32>
    %473 = vector.extract_strided_slice %7 {offsets = [58, 0], sizes = [1, 32], strides = [1, 1]} : vector<128x32xf32> to vector<1x32xf32>
    %474 = vector.extract_strided_slice %7 {offsets = [122, 0], sizes = [1, 32], strides = [1, 1]} : vector<128x32xf32> to vector<1x32xf32>
    %475 = tpu.concatenate %473, %474 in 0 : vector<1x32xf32>, vector<1x32xf32> -> vector<2x32xf32>
    %476 = arith.truncf %475 : vector<2x32xf32> to vector<2x32xbf16>
    %c58 = arith.constant 58 : index
    %c0_182 = arith.constant 0 : index
    %c0_183 = arith.constant 0 : index
    %477 = vector.load %arg4[%c58, %c0_182, %c0_183] : memref<64x32x192xbf16, #tpu.memory_space<vmem>>, vector<1x32x192xbf16>
    %478 = vector.shape_cast %477 : vector<1x32x192xbf16> to vector<32x192xbf16>
    %cst_184 = arith.constant dense<0.000000e+00> : vector<2x192xf32>
    %479 = tpu.matmul %476, %478, %cst_184 {dimension_numbers = #tpu.dot_dimension_numbers<[1], [0], [0], [1], [0, 0, 1, 1], [], []>} : vector<2x32xbf16>, vector<32x192xbf16>, vector<2x192xf32> -> vector<2x192xf32>
    %480 = arith.addf %472, %479 : vector<2x192xf32>
    %481 = vector.extract_strided_slice %7 {offsets = [59, 0], sizes = [1, 32], strides = [1, 1]} : vector<128x32xf32> to vector<1x32xf32>
    %482 = vector.extract_strided_slice %7 {offsets = [123, 0], sizes = [1, 32], strides = [1, 1]} : vector<128x32xf32> to vector<1x32xf32>
    %483 = tpu.concatenate %481, %482 in 0 : vector<1x32xf32>, vector<1x32xf32> -> vector<2x32xf32>
    %484 = arith.truncf %483 : vector<2x32xf32> to vector<2x32xbf16>
    %c59 = arith.constant 59 : index
    %c0_185 = arith.constant 0 : index
    %c0_186 = arith.constant 0 : index
    %485 = vector.load %arg4[%c59, %c0_185, %c0_186] : memref<64x32x192xbf16, #tpu.memory_space<vmem>>, vector<1x32x192xbf16>
    %486 = vector.shape_cast %485 : vector<1x32x192xbf16> to vector<32x192xbf16>
    %cst_187 = arith.constant dense<0.000000e+00> : vector<2x192xf32>
    %487 = tpu.matmul %484, %486, %cst_187 {dimension_numbers = #tpu.dot_dimension_numbers<[1], [0], [0], [1], [0, 0, 1, 1], [], []>} : vector<2x32xbf16>, vector<32x192xbf16>, vector<2x192xf32> -> vector<2x192xf32>
    %488 = arith.addf %480, %487 : vector<2x192xf32>
    %489 = vector.extract_strided_slice %7 {offsets = [60, 0], sizes = [1, 32], strides = [1, 1]} : vector<128x32xf32> to vector<1x32xf32>
    %490 = vector.extract_strided_slice %7 {offsets = [124, 0], sizes = [1, 32], strides = [1, 1]} : vector<128x32xf32> to vector<1x32xf32>
    %491 = tpu.concatenate %489, %490 in 0 : vector<1x32xf32>, vector<1x32xf32> -> vector<2x32xf32>
    %492 = arith.truncf %491 : vector<2x32xf32> to vector<2x32xbf16>
    %c60 = arith.constant 60 : index
    %c0_188 = arith.constant 0 : index
    %c0_189 = arith.constant 0 : index
    %493 = vector.load %arg4[%c60, %c0_188, %c0_189] : memref<64x32x192xbf16, #tpu.memory_space<vmem>>, vector<1x32x192xbf16>
    %494 = vector.shape_cast %493 : vector<1x32x192xbf16> to vector<32x192xbf16>
    %cst_190 = arith.constant dense<0.000000e+00> : vector<2x192xf32>
    %495 = tpu.matmul %492, %494, %cst_190 {dimension_numbers = #tpu.dot_dimension_numbers<[1], [0], [0], [1], [0, 0, 1, 1], [], []>} : vector<2x32xbf16>, vector<32x192xbf16>, vector<2x192xf32> -> vector<2x192xf32>
    %496 = arith.addf %488, %495 : vector<2x192xf32>
    %497 = vector.extract_strided_slice %7 {offsets = [61, 0], sizes = [1, 32], strides = [1, 1]} : vector<128x32xf32> to vector<1x32xf32>
    %498 = vector.extract_strided_slice %7 {offsets = [125, 0], sizes = [1, 32], strides = [1, 1]} : vector<128x32xf32> to vector<1x32xf32>
    %499 = tpu.concatenate %497, %498 in 0 : vector<1x32xf32>, vector<1x32xf32> -> vector<2x32xf32>
    %500 = arith.truncf %499 : vector<2x32xf32> to vector<2x32xbf16>
    %c61 = arith.constant 61 : index
    %c0_191 = arith.constant 0 : index
    %c0_192 = arith.constant 0 : index
    %501 = vector.load %arg4[%c61, %c0_191, %c0_192] : memref<64x32x192xbf16, #tpu.memory_space<vmem>>, vector<1x32x192xbf16>
    %502 = vector.shape_cast %501 : vector<1x32x192xbf16> to vector<32x192xbf16>
    %cst_193 = arith.constant dense<0.000000e+00> : vector<2x192xf32>
    %503 = tpu.matmul %500, %502, %cst_193 {dimension_numbers = #tpu.dot_dimension_numbers<[1], [0], [0], [1], [0, 0, 1, 1], [], []>} : vector<2x32xbf16>, vector<32x192xbf16>, vector<2x192xf32> -> vector<2x192xf32>
    %504 = arith.addf %496, %503 : vector<2x192xf32>
    %505 = vector.extract_strided_slice %7 {offsets = [62, 0], sizes = [1, 32], strides = [1, 1]} : vector<128x32xf32> to vector<1x32xf32>
    %506 = vector.extract_strided_slice %7 {offsets = [126, 0], sizes = [1, 32], strides = [1, 1]} : vector<128x32xf32> to vector<1x32xf32>
    %507 = tpu.concatenate %505, %506 in 0 : vector<1x32xf32>, vector<1x32xf32> -> vector<2x32xf32>
    %508 = arith.truncf %507 : vector<2x32xf32> to vector<2x32xbf16>
    %c62 = arith.constant 62 : index
    %c0_194 = arith.constant 0 : index
    %c0_195 = arith.constant 0 : index
    %509 = vector.load %arg4[%c62, %c0_194, %c0_195] : memref<64x32x192xbf16, #tpu.memory_space<vmem>>, vector<1x32x192xbf16>
    %510 = vector.shape_cast %509 : vector<1x32x192xbf16> to vector<32x192xbf16>
    %cst_196 = arith.constant dense<0.000000e+00> : vector<2x192xf32>
    %511 = tpu.matmul %508, %510, %cst_196 {dimension_numbers = #tpu.dot_dimension_numbers<[1], [0], [0], [1], [0, 0, 1, 1], [], []>} : vector<2x32xbf16>, vector<32x192xbf16>, vector<2x192xf32> -> vector<2x192xf32>
    %512 = arith.addf %504, %511 : vector<2x192xf32>
    %513 = vector.extract_strided_slice %7 {offsets = [63, 0], sizes = [1, 32], strides = [1, 1]} : vector<128x32xf32> to vector<1x32xf32>
    %514 = vector.extract_strided_slice %7 {offsets = [127, 0], sizes = [1, 32], strides = [1, 1]} : vector<128x32xf32> to vector<1x32xf32>
    %515 = tpu.concatenate %513, %514 in 0 : vector<1x32xf32>, vector<1x32xf32> -> vector<2x32xf32>
    %516 = arith.truncf %515 : vector<2x32xf32> to vector<2x32xbf16>
    %c63 = arith.constant 63 : index
    %c0_197 = arith.constant 0 : index
    %c0_198 = arith.constant 0 : index
    %517 = vector.load %arg4[%c63, %c0_197, %c0_198] : memref<64x32x192xbf16, #tpu.memory_space<vmem>>, vector<1x32x192xbf16>
    %518 = vector.shape_cast %517 : vector<1x32x192xbf16> to vector<32x192xbf16>
    %cst_199 = arith.constant dense<0.000000e+00> : vector<2x192xf32>
    %519 = tpu.matmul %516, %518, %cst_199 {dimension_numbers = #tpu.dot_dimension_numbers<[1], [0], [0], [1], [0, 0, 1, 1], [], []>} : vector<2x32xbf16>, vector<32x192xbf16>, vector<2x192xf32> -> vector<2x192xf32>
    %520 = arith.addf %512, %519 : vector<2x192xf32>
    %c0_200 = arith.constant 0 : index
    %c0_201 = arith.constant 0 : index
    %521 = vector.load %arg5[%c0_200, %c0_201] : memref<1x192xf32, #tpu.memory_space<vmem>>, vector<1x192xf32>
    %522 = vector.broadcast %521 : vector<1x192xf32> to vector<2x192xf32>
    %523 = arith.addf %520, %522 : vector<2x192xf32>
    %524 = vector.extract_strided_slice %523 {offsets = [0, 0], sizes = [2, 128], strides = [1, 1]} : vector<2x192xf32> to vector<2x128xf32>
    %cst_202 = arith.constant dense<0xFF800000> : vector<2xf32>
    %525 = vector.multi_reduction <maximumf>, %524, %cst_202 [1] : vector<2x128xf32> to vector<2xf32>
    %526 = vector.shape_cast %525 : vector<2xf32> to vector<2x1xf32>
    %527 = vector.broadcast %526 : vector<2x1xf32> to vector<2x128xf32>
    %528 = arith.subf %524, %527 : vector<2x128xf32>
    %529 = math.exp %528 : vector<2x128xf32>
    %cst_203 = arith.constant dense<0.000000e+00> : vector<2xf32>
    %530 = vector.multi_reduction <add>, %529, %cst_203 [1] : vector<2x128xf32> to vector<2xf32>
    %531 = vector.shape_cast %530 : vector<2xf32> to vector<2x1xf32>
    %532 = math.log %531 : vector<2x1xf32>
    %533 = arith.addf %526, %532 : vector<2x1xf32>
    %534 = vector.broadcast %533 : vector<2x1xf32> to vector<2x128xf32>
    %535 = arith.subf %524, %534 : vector<2x128xf32>
    %c0_204 = arith.constant 0 : index
    %c0_205 = arith.constant 0 : index
    %536 = vector.load %arg8[%c0_204, %c0_205] : memref<2x128xf32, #tpu.memory_space<vmem>>, vector<2x128xf32>
    tpu.vector_store %arg8[%c0_204, %c0_205], %535 {strides = array<i32>} : memref<2x128xf32, #tpu.memory_space<vmem>>, vector<2x128xf32>,
    %537 = vector.extract_strided_slice %523 {offsets = [0, 128], sizes = [2, 64], strides = [1, 1]} : vector<2x192xf32> to vector<2x64xf32>
    %cst_206 = arith.constant 0.000000e+00 : f32
    %538 = vector.broadcast %cst_206 : f32 to vector<2x64xf32>
    %539 = arith.maximumf %537, %538 : vector<2x64xf32>
    %c0_207 = arith.constant 0 : index
    %c0_208 = arith.constant 0 : index
    %540 = vector.load %arg6[%c0_207, %c0_208] : memref<1x64xf32, #tpu.memory_space<vmem>>, vector<1x64xf32>
    %541 = vector.broadcast %540 : vector<1x64xf32> to vector<2x64xf32>
    %542 = arith.mulf %539, %541 : vector<2x64xf32>
    %cst_209 = arith.constant dense<0.000000e+00> : vector<2xf32>
    %543 = vector.multi_reduction <add>, %542, %cst_209 [1] : vector<2x64xf32> to vector<2xf32>
    %544 = vector.shape_cast %543 : vector<2xf32> to vector<2x1xf32>
    %c0_210 = arith.constant 0 : index
    %c0_211 = arith.constant 0 : index
    %545 = memref.load %arg7[%c0_210, %c0_211] : memref<1x1xf32, #tpu.memory_space<smem>>
    %546 = vector.broadcast %545 : f32 to vector<2x1xf32>
    %547 = arith.addf %544, %546 : vector<2x1xf32>
    %548 = math.tanh %547 : vector<2x1xf32>
    %c0_212 = arith.constant 0 : index
    %c0_213 = arith.constant 0 : index
    %549 = vector.load %arg9[%c0_212, %c0_213] : memref<2x1xf32, #tpu.memory_space<vmem>>, vector<2x1xf32>
    tpu.vector_store %arg9[%c0_212, %c0_213], %548 {strides = array<i32>} : memref<2x1xf32, #tpu.memory_space<vmem>>, vector<2x1xf32>,
    return
  }
  func.func @transform_0(%arg0: i32) -> (i32, i32) {
    %c0_i32 = arith.constant 0 : i32
    %c0_i32_0 = arith.constant 0 : i32
    return %arg0, %c0_i32 : i32, i32
  }
  func.func @transform_1(%arg0: i32) -> (i32, i32) {
    %c0_i32 = arith.constant 0 : i32
    %c0_i32_0 = arith.constant 0 : i32
    %c0_i32_1 = arith.constant 0 : i32
    return %c0_i32, %c0_i32_0 : i32, i32
  }
  func.func @transform_2(%arg0: i32) -> (i32, i32) {
    %c0_i32 = arith.constant 0 : i32
    %c0_i32_0 = arith.constant 0 : i32
    %c0_i32_1 = arith.constant 0 : i32
    return %c0_i32, %c0_i32_0 : i32, i32
  }
  func.func @transform_3(%arg0: i32) -> (i32, i32, i32) {
    %c0_i32 = arith.constant 0 : i32
    %c0_i32_0 = arith.constant 0 : i32
    %c0_i32_1 = arith.constant 0 : i32
    %c0_i32_2 = arith.constant 0 : i32
    return %c0_i32, %c0_i32_0, %c0_i32_1 : i32, i32, i32
  }
  func.func @transform_4(%arg0: i32) -> (i32, i32) {
    %c0_i32 = arith.constant 0 : i32
    %c0_i32_0 = arith.constant 0 : i32
    %c0_i32_1 = arith.constant 0 : i32
    return %c0_i32, %c0_i32_0 : i32, i32
  }
  func.func @transform_5(%arg0: i32) -> (i32, i32) {
    %c0_i32 = arith.constant 0 : i32
    %c0_i32_0 = arith.constant 0 : i32
    %c0_i32_1 = arith.constant 0 : i32
    return %c0_i32, %c0_i32_0 : i32, i32
  }
  func.func @transform_6(%arg0: i32) -> (i32, i32) {
    %c0_i32 = arith.constant 0 : i32
    %c0_i32_0 = arith.constant 0 : i32
    %c0_i32_1 = arith.constant 0 : i32
    return %c0_i32, %c0_i32_0 : i32, i32
  }
  func.func @transform_7(%arg0: i32) -> (i32, i32) {
    %c0_i32 = arith.constant 0 : i32
    %c0_i32_0 = arith.constant 0 : i32
    return %arg0, %c0_i32 : i32, i32
  }
  func.func @transform_8(%arg0: i32) -> (i32, i32) {
    %c0_i32 = arith.constant 0 : i32
    %c0_i32_0 = arith.constant 0 : i32
    return %arg0, %c0_i32 : i32, i32
  }
}

</mosaic_0001>

<bundles_post_ra>
// kernel: policy_value_forward.1
= control target key start
LH: loop header
LB: loop body
LE: loop exit
PB: predicated region body
PF: predicated region fallthrough
CT: control target
= control target key end

     0   :  { %vm118_vm0 = vcmask 392192   ;;  %s7851_s0 = inlined_call_operand.vmem [shape: bf16[128,48], index: 0, kind: input, shape index: {}]   ;;  %s7852_s1 = inlined_call_operand.vmem [shape: bf16[48,32], index: 1, kind: input, shape index: {}]   ;;  %s7853_s2 = inlined_call_operand.vmem [shape: f32[1,32], index: 2, kind: input, shape index: {}]   ;;  %s7854_s3 = inlined_call_operand.vmem [shape: bf16[64,32,192], index: 3, kind: input, shape index: {}]   ;;  %s7855_s4 = inlined_call_operand.vmem [shape: f32[1,192], index: 4, kind: input, shape index: {}]   ;;  %s7856_s5 = inlined_call_operand.vmem [shape: f32[1,64], index: 5, kind: input, shape index: {}]   ;;  %s7857_s6 = inlined_call_operand.<no memory space> [shape: f32[1,1], index: 6, kind: input, shape index: {}]   ;;  %s7858_s7 = inlined_call_operand.hbm [shape: f32[2,128], index: 7, kind: output, shape index: {0}]   ;;  %s7859_s8 = inlined_call_operand.vmem [shape: f32[2,1], index: 8, kind: output, shape index: {1}]  }
   0x1   :  { %v5859_v0 = vld [vmem:[%s7852_s1] sm:$0xff]   ;;  %v5860_v1 = vld [vmem:[%s7852_s1 + $0x8] sm:$0xff]   ;;  %v5861_v3 = vld [vmem:[%s7852_s1 + $0x10] sm:$0xff]  }
   0x2   :  { %5835 = vmatprep.subr.bf16.mxu0 %v5859_v0  ;;  %v5862_v2 = vld [vmem:[%s7851_s0] sm:$0xff]   ;;  %v5863_v4 = vld [vmem:[%s7851_s0 + $0x8] sm:$0xff]   ;;  %v5864_v5 = vld [vmem:[%s7851_s0 + $0x10] sm:$0xff]  }
   0x3   :  { %5836 = vmatpush3.bf16.msra.mxu0 %v5859_v0  ;;  %5841 = vmatprep.mubr.msk.bf16.mxu0 %vm118_vm0, %v5862_v2  ;;  %v5865_v6 = vld [vmem:[%s7851_s0 + $0x18] sm:$0xff]   ;;  %v5866_v7 = vld [vmem:[%s7851_s0 + $0x20] sm:$0xff]   ;;  %v5867_v8 = vld [vmem:[%s7851_s0 + $0x28] sm:$0xff]  }
   0x4   :  { %5837 = vmatprep.subr.bf16.mxu0 %v5860_v1  ;;  %v5868_v9 = vld [vmem:[%s7851_s0 + $0x30] sm:$0xff]   ;;  %v5869_v10 = vld [vmem:[%s7851_s0 + $0x38] sm:$0xff]  }
   0x7   :  { %5838 = vmatpush3.bf16.msra.mxu0 %v5860_v1 }
   0x8   :  { %5839 = vmatprep.subr.bf16.mxu0 %v5861_v3 }
   0xb   :  { %5840 = vmatpush3.bf16.msra.mxu0 %v5861_v3 }
   0xe   :  { %5842 = vmatmul.mubr.msk.bf16.vlgmr.msra.gmra.mrb[0].mxu0 %vm118_vm0, %v5863_v4 }
   0xf   :  { %5845 = vmatprep.mubr.msk.bf16.mxu0 %vm118_vm0, %v5864_v5 }
  0x16   :  { %5846 = vmatmul.mubr.msk.bf16.gmra.mrb[4].mxu0 %vm118_vm0, %v5865_v6 }
  0x17   :  { %5849 = vmatprep.mubr.msk.bf16.mxu0 %vm118_vm0, %v5866_v7 }
  0x1e   :  { %5850 = vmatmul.mubr.msk.bf16.gmra.mrb[8].mxu0 %vm118_vm0, %v5867_v8 }
  0x1f   :  { %5853 = vmatprep.mubr.msk.bf16.mxu0 %vm118_vm0, %v5868_v9 }
  0x26   :  { %5854 = vmatmul.mubr.msk.bf16.gmra.mrb[12].mxu0 %vm118_vm0, %v5869_v10 }
  0x27   :  { %15 = vsyncpa [#allocation4], 0  ;;  %v5870_v11 = vld [vmem:[%s7854_s3 + $0x24] ss:$8 sps:$4 sm:$0xff]   ;;  %v5872_v12 = vld [vmem:[%s7854_s3 + $0x20] ss:$8 sps:$4 sm:$0xff]  }
  0x28   :  { %300 = vmatprep.subr.bf16.mxu1 %v5870_v11  ;;  %v5875_v13 = vld [vmem:[%s7854_s3 + $0xa4] ss:$8 sps:$4 sm:$0xff]   ;;  %v5873_v14 = vld [vmem:[%s7854_s3 + $0xa0] ss:$8 sps:$4 sm:$0xff]   ;;  %v5876_v15 = vld [vmem:[%s7854_s3 + $0x34] ss:$8 sps:$4 sm:$0xff]  }
  0x29   :  { %301 = vmatpush1.bf16.msra.mxu1 %v5872_v12  ;;  %670 = vmatprep.subr.bf16.mxu0 %v5875_v13  ;;  %v5878_v16 = vld [vmem:[%s7854_s3 + $0x30] ss:$8 sps:$4 sm:$0xff]   ;;  %v5881_v17 = vld [vmem:[%s7854_s3 + $0xb4] ss:$8 sps:$4 sm:$0xff]   ;;  %v5884_v19 = vld [vmem:[%s7854_s3 + $0x4] ss:$8 sps:$4 sm:$0xff]  }
  0x2a   :  { %671 = vmatpush1.bf16.msra.mxu0 %v5873_v14  ;;  %302 = vmatprep.subr.bf16.mxu1 %v5876_v15  ;;  %v5879_v18 = vld [vmem:[%s7854_s3 + $0xb0] ss:$8 sps:$4 sm:$0xff]   ;;  %v7860_v20 = vmov 0   ;;  %v5887_v21 = vld [vmem:[%s7854_s3 + $0xe4] ss:$8 sps:$4 sm:$0xff]   ;;  %vm259_vm1 = vcmask 1040384  }
  0x2b   :  { %672 = vmatprep.subr.bf16.mxu0 %v5881_v17  ;;  %332 = vmatprep.mubr.bf16.mxu1 %v7860_v20  ;;  %v6407_v24 = vld [vmem:[%s7853_s2] ss:$0 sm:$0xff]  ;;  %vm296_vm2 = vcmask 261120   ;;  %v5890_v8 = vld [vmem:[%s7854_s3 + $0x14] ss:$8 sps:$4 sm:$0xff]   ;;  %vm5179_vm3 = vcmask 1041408  }
  0x2c   :  { %702 = vmatprep.mubr.bf16.mxu0 %v7860_v20  ;;  %v5882_v3 = vld [vmem:[%s7854_s3] ss:$8 sps:$4 sm:$0xff]   ;;  %vm5203_vm4 = vcmask 517120   ;;  %vm5211_vm5 = vcmask 1024   ;;  %s6285_s21 = smov [#allocation3]  }
  0x2d   :  { %303 = vmatpush1.bf16.msra.mxu1 %v5878_v16  ;;  %v5885_v14 = vld [vmem:[%s7854_s3 + $0xe0] ss:$8 sps:$4 sm:$0xff]  }
  0x2e   :  { %673 = vmatpush1.bf16.msra.mxu0 %v5879_v18  ;;  %364 = vmatprep.subr.bf16.mxu1 %v5884_v19 }
  0x2f   :  { %824 = vmatprep.subr.bf16.mxu0 %v5887_v21 }
  0xe1   :  { %v5843_v22 = vpop.f32.mrb[0].mxu0 }
  0xe2   :  { %v177_v23 = vpop.f32.mrb[1].mxu0  ;;  %v186_v29 = vadd.f32 %v5843_v22, %v6407_v24  ;;  %v5893_v22 = vld [vmem:[%s7854_s3 + $0xf4] ss:$8 sps:$4 sm:$0xff]  }
  0xe3   :  { %v5844_v25 = vpop.f32.mrb[2].mxu0  ;;  %v178_v32 = vadd.f32 %v6407_v24, %v177_v23 }
  0xe4   :  { %v189_v26 = vadd.f32 %v5844_v25, %v6407_v24  ;;  %v180_v27 = vpop.f32.mrb[3].mxu0  ;;  %v6424_v38 = vmax.f32 %v186_v29, 0.0 }
  0xe5   :  { %v181_v39 = vadd.f32 %v6407_v24, %v180_v27  ;;  %v6427_v40 = vmax.f32 %v178_v32, 0.0 }
  0xe6   :  { %v6429_v41 = vmax.f32 %v189_v26, 0.0  ;;  %v1558_v46 = vrot.slane %v6424_v38, 1  ;;  %v1710_v47 = vrot.slane %v6424_v38, 3  ;;  %v1864_v52 = vrot.slane %v6424_v38, 5 }
  0xe7   :  { %v6431_v43 = vmax.f32 %v181_v39, 0.0  ;;  %v267_v50 = vrot.slane %v6427_v40, 1  ;;  %v636_v51 = vrot.slane %v6427_v40, 5  ;;  %v790_v56 = vrot.slane %v6427_v40, 7  ;;  %v5896_v39 = vld [vmem:[%s7854_s3 + $0x44] ss:$8 sps:$4 sm:$0xff]  }
  0xe8   :  { %v405_v57 = vrot.slane %v6427_v40, 2  ;;  %v482_v60 = vrot.slane %v6427_v40, 3  ;;  %v559_v61 = vrot.slane %v6427_v40, 4  ;;  %v713_v0 = vrot.slane %v6427_v40, 6 }
  0xe9   :  { %v5847_v28 = vpop.f32.mrb[4].mxu0  ;;  %v944_v62 = vrot.slane %v6431_v43, 1  ;;  %v1096_v63 = vrot.slane %v6431_v43, 3  ;;  %v1250_v25 = vrot.slane %v6431_v43, 5  ;;  %v1404_v32 = vrot.slane %v6431_v43, 7 }
  0xea   :  { %v6412_v30 = vadd.f32 %v5847_v28, %v6407_v24  ;;  %v193_v31 = vpop.f32.mrb[5].mxu0  ;;  %v5888_v28 = vld [vmem:[%s7854_s3 + $0x10] ss:$8 sps:$4 sm:$0xff]  }
  0xeb   :  { %v6416_v33 = vadd.f32 %v6407_v24, %v193_v31  ;;  %v5848_v34 = vpop.f32.mrb[6].mxu0 }
  0xec   :  { %v6419_v35 = vadd.f32 %v5848_v34, %v6407_v24  ;;  %v196_v36 = vpop.f32.mrb[7].mxu0 }
  0xed   :  { %v6422_v37 = vadd.f32 %v6407_v24, %v196_v36 }
  0xf1   :  { %v5851_v42 = vpop.f32.mrb[8].mxu0 }
  0xf2   :  { %v218_v44 = vadd.f32 %v5851_v42, %v6407_v24  ;;  %v209_v45 = vpop.f32.mrb[9].mxu0  ;;  %v1019_v42 = vrot.slane %v6431_v43, 2 }
  0xf3   :  { %v210_v48 = vadd.f32 %v6407_v24, %v209_v45  ;;  %v5852_v49 = vpop.f32.mrb[10].mxu0  ;;  %v1327_v45 = vrot.slane %v6431_v43, 6 }
  0xf4   :  { %v6440_v53 = vmax.f32 %v218_v44, 0.0  ;;  %v6443_v54 = vadd.f32 %v5852_v49, %v6407_v24  ;;  %v212_v55 = vpop.f32.mrb[11].mxu0  ;;  %v1173_v44 = vrot.slane %v6431_v43, 4 }
  0xf5   :  { %v6447_v58 = vmax.f32 %v210_v48, 0.0  ;;  %v213_v59 = vadd.f32 %v6407_v24, %v212_v55  ;;  %v5891_v48 = vld [vmem:[%s7854_s3 + $0xf0] ss:$8 sps:$4 sm:$0xff]  }
  0xf6   :  { %v6457_v1 = vsel %vm259_vm1, %v1558_v46, %v6440_v53 }
  0xf7   :  { %v6459_v2 = vmax.f32 %v213_v59, 0.0  ;;  %v269_v4 = vsel %vm259_vm1, %v267_v50, %v6447_v58  ;;  %v638_v5 = vrot.slane %v6447_v58, 4  ;;  %v257_v6 = vrot.slane %v6447_v58, 7 }
  0xf8   :  { %v270_v7 = vpack.c.bf16 %v269_v4, %v269_v4  ;;  %v792_v9 = vrot.slane %v6447_v58, 6  ;;  %v407_v10 = vrot.slane %v6447_v58, 1  ;;  %v484_v11 = vrot.slane %v6447_v58, 2 }
  0xf9   :  { %v5855_v12 = vpop.f32.mrb[12].mxu0  ;;  %v640_v13 = vsel %vm259_vm1, %v636_v51, %v638_v5  ;;  %v260_v15 = vsel %vm259_vm1, %v6427_v40, %v257_v6  ;;  %v6482_v16 = vsel %vm259_vm1, %v944_v62, %v6459_v2  ;;  %v1098_v17 = vrot.slane %v6459_v2, 2  ;;  %v5902_v5 = vld [vmem:[%s7854_s3 + $0x54] ss:$8 sps:$4 sm:$0xff]  }
  0xfa   :  { %v6486_v18 = vadd.f32 %v5855_v12, %v6407_v24  ;;  %v225_v19 = vpop.f32.mrb[13].mxu0  ;;  %5259 = vmatmul.mubr.msk.bf16.vlgmr.msra.gmra.mrb[0].mxu1 %vm296_vm2, %v270_v7  ;;  %v641_v21 = vpack.c.bf16 %v640_v13, %v640_v13  ;;  %v6493_v23 = vsel %vm259_vm1, %v790_v56, %v792_v9  ;;  %v6504_v29 = vsel %vm259_vm1, %v405_v57, %v407_v10  ;;  %v5905_v40 = vld [vmem:[%s7854_s3 + $0x134] ss:$8 sps:$4 sm:$0xff]  }
  0xfb   :  { %v6497_v26 = vadd.f32 %v6407_v24, %v225_v19  ;;  %365 = vmatpush1.bf16.msra.mxu1 %v5882_v3  ;;  %v5856_v27 = vpop.f32.mrb[14].mxu0  ;;  %396 = vmatprep.mubr.bf16.mxu1 %v7860_v20  ;;  %v561_v31 = vrot.slane %v6447_v58, 3  ;;  %v6526_v49 = vsel %vm259_vm1, %v482_v60, %v484_v11  ;;  %v6529_v50 = vsel %vm259_vm1, %v1096_v63, %v1098_v17  ;;  %v5894_v60 = vld [vmem:[%s7854_s3 + $0x40] ss:$8 sps:$4 sm:$0xff]  }
  0xfc   :  { %v6509_v34 = vadd.f32 %v5856_v27, %v6407_v24  ;;  %v228_v36 = vpop.f32.mrb[15].mxu0  ;;  %5300 = vmatmul.mubr.msk.bf16.vlgmr.msra.gmra.mrb[16].mxu0 %vm296_vm2, %v641_v21  ;;  %366 = vmatprep.subr.bf16.mxu1 %v5890_v8  ;;  %v1712_v51 = vrot.slane %v6440_v53, 2  ;;  %v2018_v56 = vrot.slane %v6424_v38, 7  ;;  %v2172_v57 = vrot.slane %v6429_v41, 1 }
  0xfd   :  { %v6519_v46 = vadd.f32 %v6407_v24, %v228_v36  ;;  %825 = vmatpush1.bf16.msra.mxu0 %v5885_v14  ;;  %856 = vmatprep.mubr.bf16.mxu0 %v7860_v20  ;;  %v5899_v24 = vld [vmem:[%s7854_s3 + $0x124] ss:$8 sps:$4 sm:$0xff]   ;;  %v6536_v55 = vsel %vm259_vm1, %v559_v61, %v561_v31  ;;  %v1633_v59 = vrot.slane %v6424_v38, 2  ;;  %v1252_v62 = vrot.slane %v6459_v2, 4 }
  0xfe   :  { %826 = vmatprep.subr.bf16.mxu0 %v5893_v22  ;;  %v715_v63 = vrot.slane %v6447_v58, 5  ;;  %v1866_v3 = vrot.slane %v6440_v53, 4  ;;  %v2324_v61 = vrot.slane %v6429_v41, 3  ;;  %v261_v4 = vpack.c.bf16 %v260_v15, %v260_v15  ;;  %v5897_v58 = vld [vmem:[%s7854_s3 + $0x120] ss:$8 sps:$4 sm:$0xff]  }
  0xff   :  { %367 = vmatpush1.bf16.msra.mxu1 %v5888_v28  ;;  %v1406_v6 = vrot.slane %v6459_v2, 6  ;;  %v868_v7 = vrot.slane %v6459_v2, 7  ;;  %v1021_v8 = vrot.slane %v6459_v2, 1  ;;  %v6558_v9 = vsel %vm259_vm1, %v1250_v25, %v1252_v62  ;;  %v5903_v25 = vld [vmem:[%s7854_s3 + $0x130] ss:$8 sps:$4 sm:$0xff]  }
 0x100   :  { %439 = vmatprep.subr.bf16.mxu1 %v5896_v39  ;;  %v6563_v10 = vsel %vm259_vm1, %v713_v0, %v715_v63  ;;  %v6568_v11 = vsel %vm259_vm1, %v1710_v47, %v1712_v51  ;;  %v1175_v12 = vrot.slane %v6459_v2, 3  ;;  %v6572_v13 = vmax.f32 %v6416_v33, 0.0  ;;  %v5900_v33 = vld [vmem:[%s7854_s3 + $0x50] ss:$8 sps:$4 sm:$0xff]  }
 0x101   :  { %827 = vmatpush1.bf16.msra.mxu0 %v5891_v48  ;;  %v795_v14 = vpack.c.bf16 %v6493_v23, %v6493_v23  ;;  %v6581_v0 = vsel %vm259_vm1, %v1404_v32, %v1406_v6  ;;  %v1329_v47 = vrot.slane %v6459_v2, 5  ;;  %v6585_v15 = vmax.f32 %v6443_v54, 0.0  ;;  %v5908_v54 = vld [vmem:[%s7854_s3 + $0x64] ss:$8 sps:$4 sm:$0xff]  }
 0x102   :  { %5264 = vmatmul.mubr.msk.bf16.vlgmr.msra.gmra.mrb[4].mxu1 %vm296_vm2, %v261_v4  ;;  %976 = vmatprep.subr.bf16.mxu0 %v5899_v24  ;;  %v6593_v17 = vsel %vm259_vm1, %v6431_v43, %v868_v7  ;;  %v6596_v19 = vsel %vm259_vm1, %v1019_v42, %v1021_v8  ;;  %v2020_v21 = vrot.slane %v6440_v53, 6  ;;  %v1482_v2 = vrot.slane %v6440_v53, 7  ;;  %v5911_v42 = vld [vmem:[%s7854_s3 + $0x164] ss:$8 sps:$4 sm:$0xff]   ;;  %v5912_v7 = vld [vmem:[%s7854_s3 + $0x70] ss:$8 sps:$4 sm:$0xff]  }
 0x103   :  { %440 = vmatpush1.bf16.msra.mxu1 %v5894_v60  ;;  %471 = vmatprep.mubr.bf16.mxu1 %v7860_v20  ;;  %v1787_v22 = vrot.slane %v6424_v38, 4  ;;  %v2478_v23 = vrot.slane %v6429_v41, 5  ;;  %v1941_v43 = vrot.slane %v6424_v38, 6  ;;  %v6612_v27 = vsel %vm259_vm1, %v1173_v44, %v1175_v12 }
 0x104   :  { %5318 = vmatmul.mubr.msk.bf16.vlgmr.msra.gmra.mrb[20].mxu0 %vm296_vm2, %v795_v14  ;;  %441 = vmatprep.subr.bf16.mxu1 %v5902_v5  ;;  %v6617_v28 = vsel %vm259_vm1, %v1864_v52, %v1866_v3  ;;  %v6620_v31 = vsel %vm259_vm1, %v1327_v45, %v1329_v47  ;;  %v1635_v32 = vrot.slane %v6440_v53, 1  ;;  %v6624_v36 = vmax.f32 %v6422_v37, 0.0  ;;  %v5906_v45 = vld [vmem:[%s7854_s3 + $0x60] ss:$8 sps:$4 sm:$0xff]   ;;  %v5917_v3 = vld [vmem:[%s7854_s3 + $0x174] ss:$8 sps:$4 sm:$0xff]  }
 0x105   :  { %977 = vmatpush1.bf16.msra.mxu0 %v5897_v58  ;;  %1008 = vmatprep.mubr.bf16.mxu0 %v7860_v20  ;;  %v6627_v39 = vmax.f32 %v6497_v26, 0.0  ;;  %v6633_v44 = vsel %vm259_vm1, %v2018_v56, %v2020_v21  ;;  %v2632_v52 = vrot.slane %v6429_v41, 7  ;;  %v6641_v37 = vsel %vm259_vm1, %v6424_v38, %v1482_v2  ;;  %v5914_v38 = vld [vmem:[%s7854_s3 + $0x74] ss:$8 sps:$4 sm:$0xff]   ;;  %v5920_v14 = vld [vmem:[%s7854_s3 + $0x84] ss:$8 sps:$4 sm:$0xff]  }
 0x106   :  { %978 = vmatprep.subr.bf16.mxu0 %v5905_v40  ;;  %v6645_v26 = vsel %vm259_vm1, %v2172_v57, %v6585_v15  ;;  %v6648_v48 = vsel %vm259_vm1, %v1633_v59, %v1635_v32  ;;  %v2786_v51 = vrot.slane %v6572_v13, 1  ;;  %v410_v24 = vpack.c.bf16 %v6504_v29, %v6504_v29  ;;  %v5909_v59 = vld [vmem:[%s7854_s3 + $0x160] ss:$8 sps:$4 sm:$0xff]   ;;  %v5915_v2 = vld [vmem:[%s7854_s3 + $0x170] ss:$8 sps:$4 sm:$0xff]  }
 0x107   :  { %442 = vmatpush1.bf16.msra.mxu1 %v5900_v33  ;;  %v947_v56 = vpack.c.bf16 %v6482_v16, %v6482_v16  ;;  %v2326_v60 = vrot.slane %v6585_v15, 2  ;;  %v2247_v57 = vrot.slane %v6429_v41, 2  ;;  %v1789_v62 = vrot.slane %v6440_v53, 3 }
 0x108   :  { %516 = vmatprep.subr.bf16.mxu1 %v5908_v54  ;;  %v2480_v29 = vrot.slane %v6585_v15, 4  ;;  %v1943_v63 = vrot.slane %v6440_v53, 5  ;;  %v2634_v16 = vrot.slane %v6585_v15, 6  ;;  %v2096_v5 = vrot.slane %v6585_v15, 7 }
 0x109   :  { %979 = vmatpush1.bf16.msra.mxu0 %v5903_v25  ;;  %v6674_v4 = vsel %vm259_vm1, %v2324_v61, %v2326_v60  ;;  %v6679_v6 = vsel %vm259_vm1, %v2786_v51, %v6627_v39  ;;  %v2249_v53 = vrot.slane %v6585_v15, 1  ;;  %v6687_v8 = vsel %vm259_vm1, %v1787_v22, %v1789_v62  ;;  %v5921_v62 = vld [vmem:[%s7854_s3 + $0x1a0] ss:$8 sps:$4 sm:$0xff]  }
 0x10a   :  { %5273 = vmatmul.mubr.msk.bf16.vlgmr.msra.gmra.mrb[8].mxu1 %vm296_vm2, %v410_v24  ;;  %1130 = vmatprep.subr.bf16.mxu0 %v5911_v42  ;;  %v6690_v61 = vsel %vm259_vm1, %v2478_v23, %v2480_v29  ;;  %v2938_v58 = vrot.slane %v6572_v13, 3  ;;  %v2940_v12 = vrot.slane %v6627_v39, 2  ;;  %v6699_v40 = vsel %vm259_vm1, %v1941_v43, %v1943_v63 }
 0x10b   :  { %517 = vmatpush1.bf16.msra.mxu1 %v5906_v45  ;;  %548 = vmatprep.mubr.bf16.mxu1 %v7860_v20  ;;  %v2401_v47 = vrot.slane %v6429_v41, 4  ;;  %v2403_v33 = vrot.slane %v6585_v15, 3  ;;  %v3092_v21 = vrot.slane %v6572_v13, 5  ;;  %v6705_v54 = vmax.f32 %v6519_v46, 0.0  ;;  %v5923_v46 = vld [vmem:[%s7854_s3 + $0x1a4] ss:$8 sps:$4 sm:$0xff]  }
 0x10c   :  { %5336 = vmatmul.mubr.msk.bf16.vlgmr.msra.gmra.mrb[24].mxu0 %vm296_vm2, %v947_v56  ;;  %518 = vmatprep.subr.bf16.mxu1 %v5914_v38  ;;  %v6712_v22 = vsel %vm259_vm1, %v2632_v52, %v2634_v16  ;;  %v6716_v23 = vsel %vm259_vm1, %v6429_v41, %v2096_v5  ;;  %v3094_v43 = vrot.slane %v6627_v39, 4  ;;  %v6723_v25 = vsel %vm259_vm1, %v2247_v57, %v2249_v53  ;;  %v5918_v52 = vld [vmem:[%s7854_s3 + $0x80] ss:$8 sps:$4 sm:$0xff]   ;;  %v5926_v38 = vld [vmem:[%s7854_s3 + $0x94] ss:$8 sps:$4 sm:$0xff]  }
 0x10d   :  { %1131 = vmatpush1.bf16.msra.mxu0 %v5909_v59  ;;  %1162 = vmatprep.mubr.bf16.mxu0 %v7860_v20  ;;  %v2555_v32 = vrot.slane %v6429_v41, 6  ;;  %v3246_v42 = vrot.slane %v6572_v13, 7  ;;  %v6731_v45 = vsel %vm259_vm1, %v2938_v58, %v2940_v12  ;;  %v6734_v51 = vsel %vm259_vm1, %v2401_v47, %v2403_v33  ;;  %v5924_v58 = vld [vmem:[%s7854_s3 + $0x90] ss:$8 sps:$4 sm:$0xff]  }
 0x10e   :  { %1132 = vmatprep.subr.bf16.mxu0 %v5917_v3  ;;  %v6737_v24 = vsel %vm259_vm1, %v3092_v21, %v3094_v43  ;;  %v3400_v56 = vrot.slane %v6624_v36, 1  ;;  %v487_v41 = vpack.c.bf16 %v6526_v49, %v6526_v49  ;;  %v2557_v60 = vrot.slane %v6585_v15, 5  ;;  %v5929_v3 = vld [vmem:[%s7854_s3 + $0x1b4] ss:$8 sps:$4 sm:$0xff]   ;;  %v5932_v21 = vld [vmem:[%s7854_s3 + $0xc4] ss:$8 sps:$4 sm:$0xff]  }
 0x10f   :  { %519 = vmatpush1.bf16.msra.mxu1 %v5912_v7  ;;  %v2861_v57 = vrot.slane %v6572_v13, 2  ;;  %v3552_v59 = vrot.slane %v6624_v36, 3  ;;  %v3248_v29 = vrot.slane %v6627_v39, 6  ;;  %v2710_v63 = vrot.slane %v6627_v39, 7 }
 0x110   :  { %593 = vmatprep.subr.bf16.mxu1 %v5920_v14  ;;  %v6755_v49 = vsel %vm259_vm1, %v3400_v56, %v6705_v54  ;;  %v2863_v16 = vrot.slane %v6627_v39, 1  ;;  %v1101_v15 = vpack.c.bf16 %v6529_v50, %v6529_v50  ;;  %v6765_v5 = vsel %vm259_vm1, %v2555_v32, %v2557_v60 }
 0x111   :  { %1133 = vmatpush1.bf16.msra.mxu0 %v5915_v2  ;;  %v3554_v53 = vrot.slane %v6705_v54, 2  ;;  %v3017_v7 = vrot.slane %v6627_v39, 3  ;;  %v6774_v50 = vsel %vm259_vm1, %v3246_v42, %v3248_v29  ;;  %v6778_v12 = vsel %vm259_vm1, %v6572_v13, %v2710_v63 }
 0x112   :  { %5282 = vmatmul.mubr.msk.bf16.vlgmr.msra.gmra.mrb[12].mxu1 %vm296_vm2, %v487_v41  ;;  %1284 = vmatprep.subr.bf16.mxu0 %v5923_v46  ;;  %v3015_v14 = vrot.slane %v6572_v13, 4  ;;  %v3708_v47 = vrot.slane %v6705_v54, 4  ;;  %v6783_v33 = vmax.f32 %v6412_v30, 0.0  ;;  %v6790_v2 = vsel %vm259_vm1, %v2861_v57, %v2863_v16  ;;  %v5927_v46 = vld [vmem:[%s7854_s3 + $0x1b0] ss:$8 sps:$4 sm:$0xff]  }
 0x113   :  { %594 = vmatpush1.bf16.msra.mxu1 %v5918_v52  ;;  %625 = vmatprep.mubr.bf16.mxu1 %v7860_v20  ;;  %v3706_v43 = vrot.slane %v6624_v36, 5  ;;  %v6798_v30 = vsel %vm259_vm1, %v3552_v59, %v3554_v53  ;;  %v3169_v42 = vrot.slane %v6572_v13, 6  ;;  %v3171_v52 = vrot.slane %v6627_v39, 5  ;;  %v5935_v41 = vld [vmem:[%s7854_s3 + $0x1e4] ss:$8 sps:$4 sm:$0xff]  }
 0x114   :  { %5354 = vmatmul.mubr.msk.bf16.vlgmr.msra.gmra.mrb[28].mxu0 %vm296_vm2, %v1101_v15  ;;  %595 = vmatprep.subr.bf16.mxu1 %v5926_v38  ;;  %v6801_v32 = vsel %vm259_vm1, %v3015_v14, %v3017_v7  ;;  %v6806_v56 = vmax.f32 %v6486_v18, 0.0  ;;  %v3860_v60 = vrot.slane %v6624_v36, 7  ;;  %v3862_v57 = vrot.slane %v6705_v54, 6  ;;  %v5930_v13 = vld [vmem:[%s7854_s3 + $0xc0] ss:$8 sps:$4 sm:$0xff]  }
 0x115   :  { %1285 = vmatpush1.bf16.msra.mxu0 %v5921_v62  ;;  %1316 = vmatprep.mubr.bf16.mxu0 %v7860_v20  ;;  %v6812_v38 = vsel %vm259_vm1, %v3706_v43, %v3708_v47  ;;  %v6820_v18 = vsel %vm259_vm1, %v3169_v42, %v3171_v52  ;;  %v564_v39 = vpack.c.bf16 %v6536_v55, %v6536_v55  ;;  %v5938_v59 = vld [vmem:[%s7854_s3 + $0xd4] ss:$8 sps:$4 sm:$0xff]   ;;  %v3324_v29 = vrot.slane %v6705_v54, 7  ;;  %v5933_v15 = vld [vmem:[%s7854_s3 + $0x1e0] ss:$8 sps:$4 sm:$0xff]  }
 0x116   :  { %1286 = vmatprep.subr.bf16.mxu0 %v5929_v3  ;;  %v6828_v62 = vsel %vm259_vm1, %v3860_v60, %v3862_v57  ;;  %v4014_v63 = vrot.slane %v6783_v33, 1  ;;  %v1255_v16 = vpack.c.bf16 %v6558_v9, %v6558_v9  ;;  %v3475_v55 = vrot.slane %v6624_v36, 2  ;;  %v5941_v53 = vld [vmem:[%s7854_s3 + $0x1f4] ss:$8 sps:$4 sm:$0xff]   ;;  %v5936_v47 = vld [vmem:[%s7854_s3 + $0xd0] ss:$8 sps:$4 sm:$0xff]  }
 0x117   :  { %596 = vmatpush1.bf16.msra.mxu1 %v5924_v58  ;;  %v3477_v3 = vrot.slane %v6705_v54, 1  ;;  %v6845_v7 = vsel %vm259_vm1, %v6624_v36, %v3324_v29  ;;  %v4166_v58 = vrot.slane %v6783_v33, 3  ;;  %v4168_v14 = vrot.slane %v6806_v56, 2  ;;  %v5944_v42 = vld [vmem:[%s7854_s3 + $0x104] ss:$8 sps:$4 sm:$0xff]  }
 0x118   :  { %747 = vmatprep.subr.bf16.mxu1 %v5932_v21  ;;  %v6849_v9 = vsel %vm259_vm1, %v4014_v63, %v6806_v56  ;;  %v3629_v43 = vrot.slane %v6624_v36, 4  ;;  %v5939_v60 = vld [vmem:[%s7854_s3 + $0x1f0] ss:$8 sps:$4 sm:$0xff]   ;;  %v3783_v29 = vrot.slane %v6624_v36, 6  ;;  %v3785_v63 = vrot.slane %v6705_v54, 5 }
 0x119   :  { %1287 = vmatpush1.bf16.msra.mxu0 %v5927_v46  ;;  %v6858_v21 = vsel %vm259_vm1, %v3475_v55, %v3477_v3  ;;  %v3631_v46 = vrot.slane %v6705_v54, 3  ;;  %v6867_v52 = vsel %vm259_vm1, %v4166_v58, %v4168_v14  ;;  %v5950_v55 = vld [vmem:[%s7854_s3 + $0x114] ss:$8 sps:$4 sm:$0xff]   ;;  %v4474_v54 = vrot.slane %v6783_v33, 7  ;;  %v5945_v58 = vld [vmem:[%s7854_s3 + $0x220] ss:$8 sps:$4 sm:$0xff]  }
 0x11a   :  { %5291 = vmatmul.mubr.msk.bf16.vlgmr.msra.gmra.mrb[16].mxu1 %vm296_vm2, %v564_v39  ;;  %1438 = vmatprep.subr.bf16.mxu0 %v5935_v41  ;;  %v6870_v41 = vmax.f32 %v6419_v35, 0.0  ;;  %v4322_v39 = vrot.slane %v6806_v56, 4  ;;  %v5947_v35 = vld [vmem:[%s7854_s3 + $0x224] ss:$8 sps:$4 sm:$0xff]   ;;  %v6901_v36 = vsel %vm259_vm1, %v3783_v29, %v3785_v63  ;;  %v4476_v3 = vrot.slane %v6806_v56, 6 }
 0x11b   :  { %748 = vmatpush1.bf16.msra.mxu1 %v5930_v13  ;;  %779 = vmatprep.mubr.bf16.mxu1 %v7860_v20  ;;  %v6877_v57 = vsel %vm259_vm1, %v3629_v43, %v3631_v46  ;;  %v4320_v13 = vrot.slane %v6783_v33, 5  ;;  %v4091_v43 = vrot.slane %v6806_v56, 1  ;;  %v5953_v46 = vld [vmem:[%s7854_s3 + $0x234] ss:$8 sps:$4 sm:$0xff]   ;;  %v5956_v29 = vld [vmem:[%s7854_s3 + $0x144] ss:$8 sps:$4 sm:$0xff]  }
 0x11c   :  { %5372 = vmatmul.mubr.msk.bf16.vlgmr.msra.gmra.mrb[32].mxu0 %vm296_vm2, %v1255_v16  ;;  %749 = vmatprep.subr.bf16.mxu1 %v5938_v59  ;;  %v6882_v59 = vmax.f32 %v6509_v34, 0.0  ;;  %v5942_v16 = vld [vmem:[%s7854_s3 + $0x100] ss:$8 sps:$4 sm:$0xff]   ;;  %v4628_v14 = vrot.slane %v6870_v41, 1 }
 0x11d   :  { %1439 = vmatpush1.bf16.msra.mxu0 %v5933_v15  ;;  %1470 = vmatprep.mubr.bf16.mxu0 %v7860_v20  ;;  %v718_v15 = vpack.c.bf16 %v6563_v10, %v6563_v10  ;;  %v6895_v34 = vsel %vm259_vm1, %v4320_v13, %v4322_v39  ;;  %v1409_v10 = vpack.c.bf16 %v6581_v0, %v6581_v0  ;;  %v5948_v39 = vld [vmem:[%s7854_s3 + $0x110] ss:$8 sps:$4 sm:$0xff]  }
 0x11e   :  { %1440 = vmatprep.subr.bf16.mxu0 %v5941_v53  ;;  %v3938_v53 = vrot.slane %v6806_v56, 7  ;;  %v4782_v13 = vrot.slane %v6882_v59, 2 }
 0x11f   :  { %750 = vmatpush1.bf16.msra.mxu1 %v5936_v47  ;;  %v4089_v47 = vrot.slane %v6783_v33, 2 }
 0x120   :  { %900 = vmatprep.subr.bf16.mxu1 %v5944_v42  ;;  %v6919_v42 = vsel %vm259_vm1, %v4474_v54, %v4476_v3  ;;  %v6923_v0 = vsel %vm259_vm1, %v6783_v33, %v3938_v53  ;;  %v4243_v54 = vrot.slane %v6783_v33, 4  ;;  %v5959_v3 = vld [vmem:[%s7854_s3 + $0x264] ss:$8 sps:$4 sm:$0xff]   ;;  %v4934_v53 = vrot.slane %v6870_v41, 5 }
 0x121   :  { %1441 = vmatpush1.bf16.msra.mxu0 %v5939_v60  ;;  %v4780_v60 = vrot.slane %v6870_v41, 3  ;;  %v6940_v63 = vsel %vm259_vm1, %v4089_v47, %v4091_v43  ;;  %v5954_v47 = vld [vmem:[%s7854_s3 + $0x140] ss:$8 sps:$4 sm:$0xff]   ;;  %v871_v43 = vpack.c.bf16 %v6593_v17, %v6593_v17  ;;  %v1561_v17 = vpack.c.bf16 %v6457_v1, %v6457_v1 }
 0x122   :  { %5309 = vmatmul.mubr.msk.bf16.vlgmr.msra.gmra.mrb[20].mxu1 %vm296_vm2, %v718_v15  ;;  %1590 = vmatprep.subr.bf16.mxu0 %v5947_v35  ;;  %v6933_v35 = vsel %vm259_vm1, %v4628_v14, %v6882_v59  ;;  %v5951_v15 = vld [vmem:[%s7854_s3 + $0x230] ss:$8 sps:$4 sm:$0xff]   ;;  %v4399_v14 = vrot.slane %v6806_v56, 5  ;;  %v4705_v1 = vrot.slane %v6882_v59, 1 }
 0x123   :  { %901 = vmatpush1.bf16.msra.mxu1 %v5942_v16  ;;  %932 = vmatprep.mubr.bf16.mxu1 %v7860_v20  ;;  %v6943_v16 = vsel %vm259_vm1, %v4780_v60, %v4782_v13  ;;  %v5962_v60 = vld [vmem:[%s7854_s3 + $0x154] ss:$8 sps:$4 sm:$0xff]   ;;  %v5088_v13 = vrot.slane %v6870_v41, 7 }
 0x124   :  { %5390 = vmatmul.mubr.msk.bf16.vlgmr.msra.gmra.mrb[36].mxu0 %vm296_vm2, %v1409_v10  ;;  %902 = vmatprep.subr.bf16.mxu1 %v5950_v55  ;;  %v4245_v55 = vrot.slane %v6806_v56, 3  ;;  %v4936_v10 = vrot.slane %v6882_v59, 4 }
 0x125   :  { %1591 = vmatpush1.bf16.msra.mxu0 %v5945_v58  ;;  %1622 = vmatprep.mubr.bf16.mxu0 %v7860_v20  ;;  %v4397_v58 = vrot.slane %v6783_v33, 6 }
 0x126   :  { %1592 = vmatprep.subr.bf16.mxu0 %v5953_v46  ;;  %v6964_v46 = vsel %vm259_vm1, %v4243_v54, %v4245_v55  ;;  %v6970_v33 = vsel %vm259_vm1, %v4934_v53, %v4936_v10  ;;  %v4552_v54 = vrot.slane %v6882_v59, 7  ;;  %v4703_v55 = vrot.slane %v6870_v41, 2  ;;  %v5965_v53 = vld [vmem:[%s7854_s3 + $0x274] ss:$8 sps:$4 sm:$0xff]  }
 0x127   :  { %903 = vmatpush1.bf16.msra.mxu1 %v5948_v39  ;;  %v6973_v56 = vsel %vm259_vm1, %v4397_v58, %v4399_v14  ;;  %v5090_v39 = vrot.slane %v6882_v59, 6  ;;  %v4857_v10 = vrot.slane %v6870_v41, 4  ;;  %v4859_v58 = vrot.slane %v6882_v59, 3  ;;  %v5960_v14 = vld [vmem:[%s7854_s3 + $0x150] ss:$8 sps:$4 sm:$0xff]  }
 0x128   :  { %1053 = vmatprep.subr.bf16.mxu1 %v5956_v29  ;;  %v5957_v29 = vld [vmem:[%s7854_s3 + $0x260] ss:$8 sps:$4 sm:$0xff]  }
 0x129   :  { %1593 = vmatpush1.bf16.msra.mxu0 %v5951_v15  ;;  %v6989_v15 = vsel %vm259_vm1, %v5088_v13, %v5090_v39  ;;  %v5013_v13 = vrot.slane %v6882_v59, 5  ;;  %v7009_v39 = vsel %vm259_vm1, %v4703_v55, %v4705_v1  ;;  %v5974_v55 = vld [vmem:[%s7854_s3 + $0x194] ss:$8 sps:$4 sm:$0xff]   ;;  %v1715_v1 = vpack.c.bf16 %v6568_v11, %v6568_v11  ;;  %v5975_v11 = vld [vmem:[%s7854_s3 + $0x2b0] ss:$8 sps:$4 sm:$0xff]  }
 0x12a   :  { %5327 = vmatmul.mubr.msk.bf16.vlgmr.msra.gmra.mrb[24].mxu1 %vm296_vm2, %v871_v43  ;;  %1744 = vmatprep.subr.bf16.mxu0 %v5959_v3  ;;  %v7000_v3 = vsel %vm259_vm1, %v6870_v41, %v4552_v54  ;;  %v5011_v43 = vrot.slane %v6870_v41, 6  ;;  %v5963_v41 = vld [vmem:[%s7854_s3 + $0x270] ss:$8 sps:$4 sm:$0xff]   ;;  %v7862_v54 = vmov 0  }
 0x12b   :  { %1054 = vmatpush1.bf16.msra.mxu1 %v5954_v47  ;;  %1085 = vmatprep.mubr.bf16.mxu1 %v7860_v20  ;;  %v5968_v47 = vld [vmem:[%s7854_s3 + $0x184] ss:$8 sps:$4 sm:$0xff]   ;;  %v7012_v20 = vsel %vm259_vm1, %v4857_v10, %v4859_v58  ;;  %v5977_v10 = vld [vmem:[%s7854_s3 + $0x2b4] ss:$8 sps:$4 sm:$0xff]  }
 0x12c   :  { %5408 = vmatmul.mubr.msk.bf16.vlgmr.msra.gmra.mrb[40].mxu0 %vm296_vm2, %v1561_v17  ;;  %1055 = vmatprep.subr.bf16.mxu1 %v5962_v60  ;;  %v7019_v59 = vsel %vm259_vm1, %v5011_v43, %v5013_v13  ;;  %v5971_v60 = vld [vmem:[%s7854_s3 + $0x2a4] ss:$8 sps:$4 sm:$0xff]   ;;  %v5966_v17 = vld [vmem:[%s7854_s3 + $0x180] ss:$8 sps:$4 sm:$0xff]   ;;  %v1178_v13 = vpack.c.bf16 %v6612_v27, %v6612_v27  ;;  %v5984_v27 = vld [vmem:[%s7854_s3 + $0x1d0] ss:$8 sps:$4 sm:$0xff]  }
 0x12d   :  { %1745 = vmatpush1.bf16.msra.mxu0 %v5957_v29  ;;  %1776 = vmatprep.mubr.bf16.mxu0 %v7862_v54  ;;  %v1024_v29 = vpack.c.bf16 %v6596_v19, %v6596_v19  ;;  %v5972_v19 = vld [vmem:[%s7854_s3 + $0x190] ss:$8 sps:$4 sm:$0xff]   ;;  %v5980_v58 = vld [vmem:[%s7854_s3 + $0x1c4] ss:$8 sps:$4 sm:$0xff]   ;;  %v5978_v43 = vld [vmem:[%s7854_s3 + $0x1c0] ss:$8 sps:$4 sm:$0xff]  }
 0x12e   :  { %1746 = vmatprep.subr.bf16.mxu0 %v5965_v53  ;;  %v5969_v53 = vld [vmem:[%s7854_s3 + $0x2a0] ss:$8 sps:$4 sm:$0xff]  }
 0x12f   :  { %1056 = vmatpush1.bf16.msra.mxu1 %v5960_v14  ;;  %v5983_v14 = vld [vmem:[%s7854_s3 + $0x2e4] ss:$8 sps:$4 sm:$0xff]  }
 0x130   :  { %1207 = vmatprep.subr.bf16.mxu1 %v5968_v47  ;;  %v5986_v47 = vld [vmem:[%s7854_s3 + $0x1d4] ss:$8 sps:$4 sm:$0xff]  }
 0x131   :  { %1747 = vmatpush1.bf16.msra.mxu0 %v5963_v41  ;;  %v5981_v41 = vld [vmem:[%s7854_s3 + $0x2e0] ss:$8 sps:$4 sm:$0xff]  }
 0x132   :  { %5345 = vmatmul.mubr.msk.bf16.vlgmr.msra.gmra.mrb[28].mxu1 %vm296_vm2, %v1024_v29  ;;  %1898 = vmatprep.subr.bf16.mxu0 %v5971_v60  ;;  %v1869_v60 = vpack.c.bf16 %v6617_v28, %v6617_v28  ;;  %v5992_v29 = vld [vmem:[%s7854_s3 + $0x204] ss:$8 sps:$4 sm:$0xff]   ;;  %v5987_v28 = vld [vmem:[%s7854_s3 + $0x2f0] ss:$8 sps:$4 sm:$0xff]  }
 0x133   :  { %1208 = vmatpush1.bf16.msra.mxu1 %v5966_v17  ;;  %1239 = vmatprep.mubr.bf16.mxu1 %v7862_v54  ;;  %v5989_v17 = vld [vmem:[%s7854_s3 + $0x2f4] ss:$8 sps:$4 sm:$0xff]  }
 0x134   :  { %5426 = vmatmul.mubr.msk.bf16.vlgmr.msra.gmra.mrb[44].mxu0 %vm296_vm2, %v1715_v1  ;;  %1209 = vmatprep.subr.bf16.mxu1 %v5974_v55  ;;  %v5995_v55 = vld [vmem:[%s7854_s3 + $0x324] ss:$8 sps:$4 sm:$0xff]   ;;  %v1332_v1 = vpack.c.bf16 %v6620_v31, %v6620_v31  ;;  %v5996_v31 = vld [vmem:[%s7854_s3 + $0x210] ss:$8 sps:$4 sm:$0xff]  }
 0x135   :  { %1899 = vmatpush1.bf16.msra.mxu0 %v5969_v53  ;;  %1930 = vmatprep.mubr.bf16.mxu0 %v7862_v54  ;;  %v5990_v53 = vld [vmem:[%s7854_s3 + $0x200] ss:$8 sps:$4 sm:$0xff]  }
 0x136   :  { %1900 = vmatprep.subr.bf16.mxu0 %v5977_v10  ;;  %v5998_v10 = vld [vmem:[%s7854_s3 + $0x214] ss:$8 sps:$4 sm:$0xff]  }
 0x137   :  { %1210 = vmatpush1.bf16.msra.mxu1 %v5972_v19  ;;  %v5993_v19 = vld [vmem:[%s7854_s3 + $0x320] ss:$8 sps:$4 sm:$0xff]  }
 0x138   :  { %1361 = vmatprep.subr.bf16.mxu1 %v5980_v58  ;;  %v2023_v58 = vpack.c.bf16 %v6633_v44, %v6633_v44  ;;  %v5999_v44 = vld [vmem:[%s7854_s3 + $0x330] ss:$8 sps:$4 sm:$0xff]  }
 0x139   :  { %1901 = vmatpush1.bf16.msra.mxu0 %v5975_v11  ;;  %v6001_v11 = vld [vmem:[%s7854_s3 + $0x334] ss:$8 sps:$4 sm:$0xff]  }
 0x13a   :  { %5363 = vmatmul.mubr.msk.bf16.vlgmr.msra.gmra.mrb[32].mxu1 %vm296_vm2, %v1178_v13  ;;  %2052 = vmatprep.subr.bf16.mxu0 %v5983_v14  ;;  %v6004_v14 = vld [vmem:[%s7854_s3 + $0x244] ss:$8 sps:$4 sm:$0xff]   ;;  %v6002_v13 = vld [vmem:[%s7854_s3 + $0x240] ss:$8 sps:$4 sm:$0xff]  }
 0x13b   :  { %1362 = vmatpush1.bf16.msra.mxu1 %v5978_v43  ;;  %1393 = vmatprep.mubr.bf16.mxu1 %v7862_v54  ;;  %v6007_v43 = vld [vmem:[%s7854_s3 + $0x364] ss:$8 sps:$4 sm:$0xff]  }
 0x13c   :  { %5444 = vmatmul.mubr.msk.bf16.vlgmr.msra.gmra.mrb[48].mxu0 %vm296_vm2, %v1869_v60  ;;  %1363 = vmatprep.subr.bf16.mxu1 %v5986_v47  ;;  %v1485_v47 = vpack.c.bf16 %v6641_v37, %v6641_v37  ;;  %v6005_v60 = vld [vmem:[%s7854_s3 + $0x360] ss:$8 sps:$4 sm:$0xff]   ;;  %v6008_v37 = vld [vmem:[%s7854_s3 + $0x250] ss:$8 sps:$4 sm:$0xff]  }
 0x13d   :  { %2053 = vmatpush1.bf16.msra.mxu0 %v5981_v41  ;;  %2084 = vmatprep.mubr.bf16.mxu0 %v7862_v54  ;;  %v6010_v41 = vld [vmem:[%s7854_s3 + $0x254] ss:$8 sps:$4 sm:$0xff]  }
 0x13e   :  { %2054 = vmatprep.subr.bf16.mxu0 %v5989_v17  ;;  %v2175_v17 = vpack.c.bf16 %v6645_v26, %v6645_v26  ;;  %v6011_v26 = vld [vmem:[%s7854_s3 + $0x370] ss:$8 sps:$4 sm:$0xff]  }
 0x13f   :  { %1364 = vmatpush1.bf16.msra.mxu1 %v5984_v27  ;;  %v6013_v27 = vld [vmem:[%s7854_s3 + $0x374] ss:$8 sps:$4 sm:$0xff]  }
 0x140   :  { %1514 = vmatprep.subr.bf16.mxu1 %v5992_v29  ;;  %v6016_v29 = vld [vmem:[%s7854_s3 + $0x284] ss:$8 sps:$4 sm:$0xff]  }
 0x141   :  { %2055 = vmatpush1.bf16.msra.mxu0 %v5987_v28  ;;  %v6019_v28 = vld [vmem:[%s7854_s3 + $0x3a4] ss:$8 sps:$4 sm:$0xff]  }
 0x142   :  { %5381 = vmatmul.mubr.msk.bf16.vlgmr.msra.gmra.mrb[36].mxu1 %vm296_vm2, %v1332_v1  ;;  %2204 = vmatprep.subr.bf16.mxu0 %v5995_v55  ;;  %v6014_v55 = vld [vmem:[%s7854_s3 + $0x280] ss:$8 sps:$4 sm:$0xff]   ;;  %v6022_v1 = vld [vmem:[%s7854_s3 + $0x294] ss:$8 sps:$4 sm:$0xff]  }
 0x143   :  { %1515 = vmatpush1.bf16.msra.mxu1 %v5990_v53  ;;  %1546 = vmatprep.mubr.bf16.mxu1 %v7862_v54  ;;  %v1638_v53 = vpack.c.bf16 %v6648_v48, %v6648_v48  ;;  %v6020_v48 = vld [vmem:[%s7854_s3 + $0x290] ss:$8 sps:$4 sm:$0xff]  }
 0x144   :  { %5462 = vmatmul.mubr.msk.bf16.vlgmr.msra.gmra.mrb[52].mxu0 %vm296_vm2, %v2023_v58  ;;  %1516 = vmatprep.subr.bf16.mxu1 %v5998_v10  ;;  %v6017_v10 = vld [vmem:[%s7854_s3 + $0x3a0] ss:$8 sps:$4 sm:$0xff]   ;;  %v6025_v58 = vld [vmem:[%s7854_s3 + $0x3b4] ss:$8 sps:$4 sm:$0xff]  }
 0x145   :  { %2205 = vmatpush1.bf16.msra.mxu0 %v5993_v19  ;;  %2236 = vmatprep.mubr.bf16.mxu0 %v7862_v54  ;;  %v2329_v19 = vpack.c.bf16 %v6674_v4, %v6674_v4  ;;  %v6023_v4 = vld [vmem:[%s7854_s3 + $0x3b0] ss:$8 sps:$4 sm:$0xff]  }
 0x146   :  { %2206 = vmatprep.subr.bf16.mxu0 %v6001_v11  ;;  %v6028_v11 = vld [vmem:[%s7854_s3 + $0x2c4] ss:$8 sps:$4 sm:$0xff]  }
 0x147   :  { %1517 = vmatpush1.bf16.msra.mxu1 %v5996_v31  ;;  %v6031_v31 = vld [vmem:[%s7854_s3 + $0x3e4] ss:$8 sps:$4 sm:$0xff]  }
 0x148   :  { %1667 = vmatprep.subr.bf16.mxu1 %v6004_v14  ;;  %v6026_v14 = vld [vmem:[%s7854_s3 + $0x2c0] ss:$8 sps:$4 sm:$0xff]  }
 0x149   :  { %2207 = vmatpush1.bf16.msra.mxu0 %v5999_v44  ;;  %v1792_v44 = vpack.c.bf16 %v6687_v8, %v6687_v8  ;;  %v6032_v8 = vld [vmem:[%s7854_s3 + $0x2d0] ss:$8 sps:$4 sm:$0xff]  }
 0x14a   :  { %5399 = vmatmul.mubr.msk.bf16.vlgmr.msra.gmra.mrb[40].mxu1 %vm296_vm2, %v1485_v47  ;;  %2358 = vmatprep.subr.bf16.mxu0 %v6007_v43  ;;  %v6034_v43 = vld [vmem:[%s7854_s3 + $0x2d4] ss:$8 sps:$4 sm:$0xff]   ;;  %v2483_v47 = vpack.c.bf16 %v6690_v61, %v6690_v61  ;;  %v6035_v61 = vld [vmem:[%s7854_s3 + $0x3f0] ss:$8 sps:$4 sm:$0xff]  }
 0x14b   :  { %1668 = vmatpush1.bf16.msra.mxu1 %v6002_v13  ;;  %1699 = vmatprep.mubr.bf16.mxu1 %v7862_v54  ;;  %v6029_v13 = vld [vmem:[%s7854_s3 + $0x3e0] ss:$8 sps:$4 sm:$0xff]  }
 0x14c   :  { %5480 = vmatmul.mubr.msk.bf16.vlgmr.msra.gmra.mrb[56].mxu0 %vm296_vm2, %v2175_v17  ;;  %1669 = vmatprep.subr.bf16.mxu1 %v6010_v41  ;;  %v6037_v41 = vld [vmem:[%s7854_s3 + $0x3f4] ss:$8 sps:$4 sm:$0xff]   ;;  %v6043_v17 = vld [vmem:[%s7854_s3 + $0x424] ss:$8 sps:$4 sm:$0xff]  }
 0x14d   :  { %2359 = vmatpush1.bf16.msra.mxu0 %v6005_v60  ;;  %2390 = vmatprep.mubr.bf16.mxu0 %v7862_v54  ;;  %v6040_v60 = vld [vmem:[%s7854_s3 + $0x304] ss:$8 sps:$4 sm:$0xff]  }
 0x14e   :  { %2360 = vmatprep.subr.bf16.mxu0 %v6013_v27  ;;  %v6038_v27 = vld [vmem:[%s7854_s3 + $0x300] ss:$8 sps:$4 sm:$0xff]  }
 0x14f   :  { %1670 = vmatpush1.bf16.msra.mxu1 %v6008_v37  ;;  %v1946_v37 = vpack.c.bf16 %v6699_v40, %v6699_v40  ;;  %v6044_v40 = vld [vmem:[%s7854_s3 + $0x310] ss:$8 sps:$4 sm:$0xff]  }
 0x150   :  { %1821 = vmatprep.subr.bf16.mxu1 %v6016_v29  ;;  %v6046_v29 = vld [vmem:[%s7854_s3 + $0x314] ss:$8 sps:$4 sm:$0xff]  }
 0x151   :  { %2361 = vmatpush1.bf16.msra.mxu0 %v6011_v26  ;;  %v6041_v26 = vld [vmem:[%s7854_s3 + $0x420] ss:$8 sps:$4 sm:$0xff]  }
 0x152   :  { %5417 = vmatmul.mubr.msk.bf16.vlgmr.msra.gmra.mrb[44].mxu1 %vm296_vm2, %v1638_v53  ;;  %2512 = vmatprep.subr.bf16.mxu0 %v6019_v28  ;;  %v2637_v28 = vpack.c.bf16 %v6712_v22, %v6712_v22  ;;  %v6052_v53 = vld [vmem:[%s7854_s3 + $0x344] ss:$8 sps:$4 sm:$0xff]   ;;  %v6047_v22 = vld [vmem:[%s7854_s3 + $0x430] ss:$8 sps:$4 sm:$0xff]  }
 0x153   :  { %1822 = vmatpush1.bf16.msra.mxu1 %v6014_v55  ;;  %1853 = vmatprep.mubr.bf16.mxu1 %v7862_v54  ;;  %v6049_v55 = vld [vmem:[%s7854_s3 + $0x434] ss:$8 sps:$4 sm:$0xff]  }
 0x154   :  { %5498 = vmatmul.mubr.msk.bf16.vlgmr.msra.gmra.mrb[60].mxu0 %vm296_vm2, %v2329_v19  ;;  %1823 = vmatprep.subr.bf16.mxu1 %v6022_v1  ;;  %v6055_v1 = vld [vmem:[%s7854_s3 + $0x464] ss:$8 sps:$4 sm:$0xff]   ;;  %v2099_v19 = vpack.c.bf16 %v6716_v23, %v6716_v23  ;;  %v6056_v23 = vld [vmem:[%s7854_s3 + $0x350] ss:$8 sps:$4 sm:$0xff]  }
 0x155   :  { %2513 = vmatpush1.bf16.msra.mxu0 %v6017_v10  ;;  %2544 = vmatprep.mubr.bf16.mxu0 %v7862_v54  ;;  %v6050_v10 = vld [vmem:[%s7854_s3 + $0x340] ss:$8 sps:$4 sm:$0xff]  }
 0x156   :  { %2514 = vmatprep.subr.bf16.mxu0 %v6025_v58  ;;  %v6058_v58 = vld [vmem:[%s7854_s3 + $0x354] ss:$8 sps:$4 sm:$0xff]  }
 0x157   :  { %1824 = vmatpush1.bf16.msra.mxu1 %v6020_v48  ;;  %v6053_v48 = vld [vmem:[%s7854_s3 + $0x460] ss:$8 sps:$4 sm:$0xff]  }
 0x158   :  { %1975 = vmatprep.subr.bf16.mxu1 %v6028_v11  ;;  %v2789_v11 = vpack.c.bf16 %v6679_v6, %v6679_v6  ;;  %v6059_v6 = vld [vmem:[%s7854_s3 + $0x470] ss:$8 sps:$4 sm:$0xff]  }
 0x159   :  { %2515 = vmatpush1.bf16.msra.mxu0 %v6023_v4  ;;  %v6061_v4 = vld [vmem:[%s7854_s3 + $0x474] ss:$8 sps:$4 sm:$0xff]  }
 0x15a   :  { %5435 = vmatmul.mubr.msk.bf16.vlgmr.msra.gmra.mrb[48].mxu1 %vm296_vm2, %v1792_v44  ;;  %2666 = vmatprep.subr.bf16.mxu0 %v6031_v31  ;;  %v6064_v31 = vld [vmem:[%s7854_s3 + $0x384] ss:$8 sps:$4 sm:$0xff]   ;;  %v6062_v44 = vld [vmem:[%s7854_s3 + $0x380] ss:$8 sps:$4 sm:$0xff]  }
 0x15b   :  { %1976 = vmatpush1.bf16.msra.mxu1 %v6026_v14  ;;  %2007 = vmatprep.mubr.bf16.mxu1 %v7862_v54  ;;  %v6067_v14 = vld [vmem:[%s7854_s3 + $0x4a4] ss:$8 sps:$4 sm:$0xff]  }
 0x15c   :  { %5516 = vmatmul.mubr.msk.bf16.vlgmr.msra.gmra.mrb[64].mxu0 %vm296_vm2, %v2483_v47  ;;  %1977 = vmatprep.subr.bf16.mxu1 %v6034_v43  ;;  %v2252_v43 = vpack.c.bf16 %v6723_v25, %v6723_v25  ;;  %v6065_v47 = vld [vmem:[%s7854_s3 + $0x4a0] ss:$8 sps:$4 sm:$0xff]   ;;  %v6068_v25 = vld [vmem:[%s7854_s3 + $0x390] ss:$8 sps:$4 sm:$0xff]  }
 0x15d   :  { %2667 = vmatpush1.bf16.msra.mxu0 %v6029_v13  ;;  %2698 = vmatprep.mubr.bf16.mxu0 %v7862_v54  ;;  %v6070_v13 = vld [vmem:[%s7854_s3 + $0x394] ss:$8 sps:$4 sm:$0xff]  }
 0x15e   :  { %2668 = vmatprep.subr.bf16.mxu0 %v6037_v41  ;;  %v2943_v41 = vpack.c.bf16 %v6731_v45, %v6731_v45  ;;  %v6071_v45 = vld [vmem:[%s7854_s3 + $0x4b0] ss:$8 sps:$4 sm:$0xff]  }
 0x15f   :  { %1978 = vmatpush1.bf16.msra.mxu1 %v6032_v8  ;;  %v6073_v8 = vld [vmem:[%s7854_s3 + $0x4b4] ss:$8 sps:$4 sm:$0xff]  }
 0x160   :  { %2128 = vmatprep.subr.bf16.mxu1 %v6040_v60  ;;  %v6076_v60 = vld [vmem:[%s7854_s3 + $0x3c4] ss:$8 sps:$4 sm:$0xff]  }
 0x161   :  { %2669 = vmatpush1.bf16.msra.mxu0 %v6035_v61  ;;  %v6079_v61 = vld [vmem:[%s7854_s3 + $0x4e4] ss:$8 sps:$4 sm:$0xff]  }
 0x162   :  { %5453 = vmatmul.mubr.msk.bf16.vlgmr.msra.gmra.mrb[52].mxu1 %vm296_vm2, %v1946_v37  ;;  %2818 = vmatprep.subr.bf16.mxu0 %v6043_v17  ;;  %v6074_v17 = vld [vmem:[%s7854_s3 + $0x3c0] ss:$8 sps:$4 sm:$0xff]   ;;  %v6082_v37 = vld [vmem:[%s7854_s3 + $0x3d4] ss:$8 sps:$4 sm:$0xff]  }
 0x163   :  { %2129 = vmatpush1.bf16.msra.mxu1 %v6038_v27  ;;  %2160 = vmatprep.mubr.bf16.mxu1 %v7862_v54  ;;  %v2406_v27 = vpack.c.bf16 %v6734_v51, %v6734_v51  ;;  %v6080_v51 = vld [vmem:[%s7854_s3 + $0x3d0] ss:$8 sps:$4 sm:$0xff]  }
 0x164   :  { %5534 = vmatmul.mubr.msk.bf16.vlgmr.msra.gmra.mrb[68].mxu0 %vm296_vm2, %v2637_v28  ;;  %2130 = vmatprep.subr.bf16.mxu1 %v6046_v29  ;;  %v6077_v29 = vld [vmem:[%s7854_s3 + $0x4e0] ss:$8 sps:$4 sm:$0xff]   ;;  %v6085_v28 = vld [vmem:[%s7854_s3 + $0x4f4] ss:$8 sps:$4 sm:$0xff]  }
 0x165   :  { %2819 = vmatpush1.bf16.msra.mxu0 %v6041_v26  ;;  %2850 = vmatprep.mubr.bf16.mxu0 %v7862_v54  ;;  %v3097_v26 = vpack.c.bf16 %v6737_v24, %v6737_v24  ;;  %v6083_v24 = vld [vmem:[%s7854_s3 + $0x4f0] ss:$8 sps:$4 sm:$0xff]  }
 0x166   :  { %2820 = vmatprep.subr.bf16.mxu0 %v6049_v55  ;;  %v6088_v55 = vld [vmem:[%s7854_s3 + $0x404] ss:$8 sps:$4 sm:$0xff]  }
 0x167   :  { %2131 = vmatpush1.bf16.msra.mxu1 %v6044_v40  ;;  %v6091_v40 = vld [vmem:[%s7854_s3 + $0x524] ss:$8 sps:$4 sm:$0xff]  }
 0x168   :  { %2281 = vmatprep.subr.bf16.mxu1 %v6052_v53  ;;  %v6086_v53 = vld [vmem:[%s7854_s3 + $0x400] ss:$8 sps:$4 sm:$0xff]  }
 0x169   :  { %2821 = vmatpush1.bf16.msra.mxu0 %v6047_v22  ;;  %v2560_v22 = vpack.c.bf16 %v6765_v5, %v6765_v5  ;;  %v6092_v5 = vld [vmem:[%s7854_s3 + $0x410] ss:$8 sps:$4 sm:$0xff]  }
 0x16a   :  { %5471 = vmatmul.mubr.msk.bf16.vlgmr.msra.gmra.mrb[56].mxu1 %vm296_vm2, %v2099_v19  ;;  %2972 = vmatprep.subr.bf16.mxu0 %v6055_v1  ;;  %v6094_v1 = vld [vmem:[%s7854_s3 + $0x414] ss:$8 sps:$4 sm:$0xff]   ;;  %v3251_v19 = vpack.c.bf16 %v6774_v50, %v6774_v50  ;;  %v6095_v50 = vld [vmem:[%s7854_s3 + $0x530] ss:$8 sps:$4 sm:$0xff]  }
 0x16b   :  { %2282 = vmatpush1.bf16.msra.mxu1 %v6050_v10  ;;  %2313 = vmatprep.mubr.bf16.mxu1 %v7862_v54  ;;  %v6089_v10 = vld [vmem:[%s7854_s3 + $0x520] ss:$8 sps:$4 sm:$0xff]  }
 0x16c   :  { %5552 = vmatmul.mubr.msk.bf16.vlgmr.msra.gmra.mrb[72].mxu0 %vm296_vm2, %v2789_v11  ;;  %2283 = vmatprep.subr.bf16.mxu1 %v6058_v58  ;;  %v6097_v58 = vld [vmem:[%s7854_s3 + $0x534] ss:$8 sps:$4 sm:$0xff]   ;;  %v6103_v11 = vld [vmem:[%s7854_s3 + $0x564] ss:$8 sps:$4 sm:$0xff]  }
 0x16d   :  { %2973 = vmatpush1.bf16.msra.mxu0 %v6053_v48  ;;  %3004 = vmatprep.mubr.bf16.mxu0 %v7862_v54  ;;  %v6100_v48 = vld [vmem:[%s7854_s3 + $0x444] ss:$8 sps:$4 sm:$0xff]  }
 0x16e   :  { %2974 = vmatprep.subr.bf16.mxu0 %v6061_v4  ;;  %v6098_v4 = vld [vmem:[%s7854_s3 + $0x440] ss:$8 sps:$4 sm:$0xff]  }
 0x16f   :  { %2284 = vmatpush1.bf16.msra.mxu1 %v6056_v23  ;;  %v2713_v23 = vpack.c.bf16 %v6778_v12, %v6778_v12  ;;  %v6104_v12 = vld [vmem:[%s7854_s3 + $0x450] ss:$8 sps:$4 sm:$0xff]  }
 0x170   :  { %2435 = vmatprep.subr.bf16.mxu1 %v6064_v31  ;;  %v6106_v31 = vld [vmem:[%s7854_s3 + $0x454] ss:$8 sps:$4 sm:$0xff]  }
 0x171   :  { %2975 = vmatpush1.bf16.msra.mxu0 %v6059_v6  ;;  %v6101_v6 = vld [vmem:[%s7854_s3 + $0x560] ss:$8 sps:$4 sm:$0xff]  }
 0x172   :  { %5489 = vmatmul.mubr.msk.bf16.vlgmr.msra.gmra.mrb[60].mxu1 %vm296_vm2, %v2252_v43  ;;  %3126 = vmatprep.subr.bf16.mxu0 %v6067_v14  ;;  %v3403_v14 = vpack.c.bf16 %v6755_v49, %v6755_v49  ;;  %v6112_v43 = vld [vmem:[%s7854_s3 + $0x484] ss:$8 sps:$4 sm:$0xff]   ;;  %v6107_v49 = vld [vmem:[%s7854_s3 + $0x570] ss:$8 sps:$4 sm:$0xff]  }
 0x173   :  { %2436 = vmatpush1.bf16.msra.mxu1 %v6062_v44  ;;  %2467 = vmatprep.mubr.bf16.mxu1 %v7862_v54  ;;  %v6109_v44 = vld [vmem:[%s7854_s3 + $0x574] ss:$8 sps:$4 sm:$0xff]  }
 0x174   :  { %5570 = vmatmul.mubr.msk.bf16.vlgmr.msra.gmra.mrb[76].mxu0 %vm296_vm2, %v2943_v41  ;;  %2437 = vmatprep.subr.bf16.mxu1 %v6070_v13  ;;  %v6115_v13 = vld [vmem:[%s7854_s3 + $0x5a4] ss:$8 sps:$4 sm:$0xff]   ;;  %v2866_v41 = vpack.c.bf16 %v6790_v2, %v6790_v2  ;;  %v6116_v2 = vld [vmem:[%s7854_s3 + $0x490] ss:$8 sps:$4 sm:$0xff]  }
 0x175   :  { %3127 = vmatpush1.bf16.msra.mxu0 %v6065_v47  ;;  %3158 = vmatprep.mubr.bf16.mxu0 %v7862_v54  ;;  %v6110_v47 = vld [vmem:[%s7854_s3 + $0x480] ss:$8 sps:$4 sm:$0xff]  }
 0x176   :  { %3128 = vmatprep.subr.bf16.mxu0 %v6073_v8  ;;  %v6118_v8 = vld [vmem:[%s7854_s3 + $0x494] ss:$8 sps:$4 sm:$0xff]  }
 0x177   :  { %2438 = vmatpush1.bf16.msra.mxu1 %v6068_v25  ;;  %v6113_v25 = vld [vmem:[%s7854_s3 + $0x5a0] ss:$8 sps:$4 sm:$0xff]  }
 0x178   :  { %2589 = vmatprep.subr.bf16.mxu1 %v6076_v60  ;;  %v3557_v60 = vpack.c.bf16 %v6798_v30, %v6798_v30  ;;  %v6119_v30 = vld [vmem:[%s7854_s3 + $0x5b0] ss:$8 sps:$4 sm:$0xff]  }
 0x179   :  { %3129 = vmatpush1.bf16.msra.mxu0 %v6071_v45  ;;  %v6121_v45 = vld [vmem:[%s7854_s3 + $0x5b4] ss:$8 sps:$4 sm:$0xff]  }
 0x17a   :  { %5507 = vmatmul.mubr.msk.bf16.vlgmr.msra.gmra.mrb[64].mxu1 %vm296_vm2, %v2406_v27  ;;  %3280 = vmatprep.subr.bf16.mxu0 %v6079_v61  ;;  %v6124_v61 = vld [vmem:[%s7854_s3 + $0x4c4] ss:$8 sps:$4 sm:$0xff]   ;;  %v6122_v27 = vld [vmem:[%s7854_s3 + $0x4c0] ss:$8 sps:$4 sm:$0xff]  }
 0x17b   :  { %2590 = vmatpush1.bf16.msra.mxu1 %v6074_v17  ;;  %2621 = vmatprep.mubr.bf16.mxu1 %v7862_v54  ;;  %v6127_v17 = vld [vmem:[%s7854_s3 + $0x5e4] ss:$8 sps:$4 sm:$0xff]  }
 0x17c   :  { %5588 = vmatmul.mubr.msk.bf16.vlgmr.msra.gmra.mrb[80].mxu0 %vm296_vm2, %v3097_v26  ;;  %2591 = vmatprep.subr.bf16.mxu1 %v6082_v37  ;;  %v3020_v37 = vpack.c.bf16 %v6801_v32, %v6801_v32  ;;  %v6125_v26 = vld [vmem:[%s7854_s3 + $0x5e0] ss:$8 sps:$4 sm:$0xff]   ;;  %v6128_v32 = vld [vmem:[%s7854_s3 + $0x4d0] ss:$8 sps:$4 sm:$0xff]  }
 0x17d   :  { %3281 = vmatpush1.bf16.msra.mxu0 %v6077_v29  ;;  %3312 = vmatprep.mubr.bf16.mxu0 %v7862_v54  ;;  %v6130_v29 = vld [vmem:[%s7854_s3 + $0x4d4] ss:$8 sps:$4 sm:$0xff]  }
 0x17e   :  { %3282 = vmatprep.subr.bf16.mxu0 %v6085_v28  ;;  %v3711_v28 = vpack.c.bf16 %v6812_v38, %v6812_v38  ;;  %v6131_v38 = vld [vmem:[%s7854_s3 + $0x5f0] ss:$8 sps:$4 sm:$0xff]  }
 0x17f   :  { %2592 = vmatpush1.bf16.msra.mxu1 %v6080_v51  ;;  %v6133_v51 = vld [vmem:[%s7854_s3 + $0x5f4] ss:$8 sps:$4 sm:$0xff]  }
 0x180   :  { %2742 = vmatprep.subr.bf16.mxu1 %v6088_v55  ;;  %v6136_v55 = vld [vmem:[%s7854_s3 + $0x504] ss:$8 sps:$4 sm:$0xff]  }
 0x181   :  { %3283 = vmatpush1.bf16.msra.mxu0 %v6083_v24  ;;  %v6139_v24 = vld [vmem:[%s7854_s3 + $0x624] ss:$8 sps:$4 sm:$0xff]  }
 0x182   :  { %5525 = vmatmul.mubr.msk.bf16.vlgmr.msra.gmra.mrb[68].mxu1 %vm296_vm2, %v2560_v22  ;;  %3432 = vmatprep.subr.bf16.mxu0 %v6091_v40  ;;  %v6134_v40 = vld [vmem:[%s7854_s3 + $0x500] ss:$8 sps:$4 sm:$0xff]   ;;  %v6142_v22 = vld [vmem:[%s7854_s3 + $0x514] ss:$8 sps:$4 sm:$0xff]  }
 0x183   :  { %2743 = vmatpush1.bf16.msra.mxu1 %v6086_v53  ;;  %2774 = vmatprep.mubr.bf16.mxu1 %v7862_v54  ;;  %v3174_v53 = vpack.c.bf16 %v6820_v18, %v6820_v18  ;;  %v6140_v18 = vld [vmem:[%s7854_s3 + $0x510] ss:$8 sps:$4 sm:$0xff]  }
 0x184   :  { %5606 = vmatmul.mubr.msk.bf16.vlgmr.msra.gmra.mrb[84].mxu0 %vm296_vm2, %v3251_v19  ;;  %2744 = vmatprep.subr.bf16.mxu1 %v6094_v1  ;;  %v6137_v1 = vld [vmem:[%s7854_s3 + $0x620] ss:$8 sps:$4 sm:$0xff]   ;;  %v6145_v19 = vld [vmem:[%s7854_s3 + $0x634] ss:$8 sps:$4 sm:$0xff]  }
 0x185   :  { %3433 = vmatpush1.bf16.msra.mxu0 %v6089_v10  ;;  %3464 = vmatprep.mubr.bf16.mxu0 %v7862_v54  ;;  %v3865_v10 = vpack.c.bf16 %v6828_v62, %v6828_v62  ;;  %v6143_v62 = vld [vmem:[%s7854_s3 + $0x630] ss:$8 sps:$4 sm:$0xff]  }
 0x186   :  { %3434 = vmatprep.subr.bf16.mxu0 %v6097_v58  ;;  %v6148_v58 = vld [vmem:[%s7854_s3 + $0x544] ss:$8 sps:$4 sm:$0xff]  }
 0x187   :  { %2745 = vmatpush1.bf16.msra.mxu1 %v6092_v5  ;;  %v6151_v5 = vld [vmem:[%s7854_s3 + $0x664] ss:$8 sps:$4 sm:$0xff]  }
 0x188   :  { %2895 = vmatprep.subr.bf16.mxu1 %v6100_v48  ;;  %v6146_v48 = vld [vmem:[%s7854_s3 + $0x540] ss:$8 sps:$4 sm:$0xff]  }
 0x189   :  { %3435 = vmatpush1.bf16.msra.mxu0 %v6095_v50  ;;  %v3327_v50 = vpack.c.bf16 %v6845_v7, %v6845_v7  ;;  %v6152_v7 = vld [vmem:[%s7854_s3 + $0x550] ss:$8 sps:$4 sm:$0xff]  }
 0x18a   :  { %5543 = vmatmul.mubr.msk.bf16.vlgmr.msra.gmra.mrb[72].mxu1 %vm296_vm2, %v2713_v23  ;;  %3586 = vmatprep.subr.bf16.mxu0 %v6103_v11  ;;  %v6154_v11 = vld [vmem:[%s7854_s3 + $0x554] ss:$8 sps:$4 sm:$0xff]   ;;  %v4017_v23 = vpack.c.bf16 %v6849_v9, %v6849_v9  ;;  %v6155_v9 = vld [vmem:[%s7854_s3 + $0x670] ss:$8 sps:$4 sm:$0xff]  }
 0x18b   :  { %2896 = vmatpush1.bf16.msra.mxu1 %v6098_v4  ;;  %2927 = vmatprep.mubr.bf16.mxu1 %v7862_v54  ;;  %v6149_v4 = vld [vmem:[%s7854_s3 + $0x660] ss:$8 sps:$4 sm:$0xff]  }
 0x18c   :  { %5624 = vmatmul.mubr.msk.bf16.vlgmr.msra.gmra.mrb[88].mxu0 %vm296_vm2, %v3403_v14  ;;  %2897 = vmatprep.subr.bf16.mxu1 %v6106_v31  ;;  %v6157_v31 = vld [vmem:[%s7854_s3 + $0x674] ss:$8 sps:$4 sm:$0xff]   ;;  %v6163_v14 = vld [vmem:[%s7854_s3 + $0x6a4] ss:$8 sps:$4 sm:$0xff]  }
 0x18d   :  { %3587 = vmatpush1.bf16.msra.mxu0 %v6101_v6  ;;  %3618 = vmatprep.mubr.bf16.mxu0 %v7862_v54  ;;  %v6160_v6 = vld [vmem:[%s7854_s3 + $0x584] ss:$8 sps:$4 sm:$0xff]  }
 0x18e   :  { %3588 = vmatprep.subr.bf16.mxu0 %v6109_v44  ;;  %v6158_v44 = vld [vmem:[%s7854_s3 + $0x580] ss:$8 sps:$4 sm:$0xff]  }
 0x18f   :  { %2898 = vmatpush1.bf16.msra.mxu1 %v6104_v12  ;;  %v3480_v12 = vpack.c.bf16 %v6858_v21, %v6858_v21  ;;  %v6164_v21 = vld [vmem:[%s7854_s3 + $0x590] ss:$8 sps:$4 sm:$0xff]  }
 0x190   :  { %3049 = vmatprep.subr.bf16.mxu1 %v6112_v43  ;;  %v6166_v43 = vld [vmem:[%s7854_s3 + $0x594] ss:$8 sps:$4 sm:$0xff]  }
 0x191   :  { %3589 = vmatpush1.bf16.msra.mxu0 %v6107_v49  ;;  %v6161_v49 = vld [vmem:[%s7854_s3 + $0x6a0] ss:$8 sps:$4 sm:$0xff]  }
 0x192   :  { %5561 = vmatmul.mubr.msk.bf16.vlgmr.msra.gmra.mrb[76].mxu1 %vm296_vm2, %v2866_v41  ;;  %3740 = vmatprep.subr.bf16.mxu0 %v6115_v13  ;;  %v4171_v13 = vpack.c.bf16 %v6867_v52, %v6867_v52  ;;  %v6172_v41 = vld [vmem:[%s7854_s3 + $0x5c4] ss:$8 sps:$4 sm:$0xff]   ;;  %v6167_v52 = vld [vmem:[%s7854_s3 + $0x6b0] ss:$8 sps:$4 sm:$0xff]  }
 0x193   :  { %3050 = vmatpush1.bf16.msra.mxu1 %v6110_v47  ;;  %3081 = vmatprep.mubr.bf16.mxu1 %v7862_v54  ;;  %v6169_v47 = vld [vmem:[%s7854_s3 + $0x6b4] ss:$8 sps:$4 sm:$0xff]  }
 0x194   :  { %5642 = vmatmul.mubr.msk.bf16.vlgmr.msra.gmra.mrb[92].mxu0 %vm296_vm2, %v3557_v60  ;;  %3051 = vmatprep.subr.bf16.mxu1 %v6118_v8  ;;  %v6175_v8 = vld [vmem:[%s7854_s3 + $0x6e4] ss:$8 sps:$4 sm:$0xff]   ;;  %v3634_v60 = vpack.c.bf16 %v6877_v57, %v6877_v57  ;;  %v6176_v57 = vld [vmem:[%s7854_s3 + $0x5d0] ss:$8 sps:$4 sm:$0xff]  }
 0x195   :  { %3741 = vmatpush1.bf16.msra.mxu0 %v6113_v25  ;;  %3772 = vmatprep.mubr.bf16.mxu0 %v7862_v54  ;;  %v6170_v25 = vld [vmem:[%s7854_s3 + $0x5c0] ss:$8 sps:$4 sm:$0xff]  }
 0x196   :  { %3742 = vmatprep.subr.bf16.mxu0 %v6121_v45  ;;  %v6178_v45 = vld [vmem:[%s7854_s3 + $0x5d4] ss:$8 sps:$4 sm:$0xff]  }
 0x197   :  { %3052 = vmatpush1.bf16.msra.mxu1 %v6116_v2  ;;  %v6173_v2 = vld [vmem:[%s7854_s3 + $0x6e0] ss:$8 sps:$4 sm:$0xff]  }
 0x198   :  { %3203 = vmatprep.subr.bf16.mxu1 %v6124_v61  ;;  %v4325_v61 = vpack.c.bf16 %v6895_v34, %v6895_v34  ;;  %v6179_v34 = vld [vmem:[%s7854_s3 + $0x6f0] ss:$8 sps:$4 sm:$0xff]  }
 0x199   :  { %3743 = vmatpush1.bf16.msra.mxu0 %v6119_v30  ;;  %v6181_v30 = vld [vmem:[%s7854_s3 + $0x6f4] ss:$8 sps:$4 sm:$0xff]  }
 0x19a   :  { %5579 = vmatmul.mubr.msk.bf16.vlgmr.msra.gmra.mrb[80].mxu1 %vm296_vm2, %v3020_v37  ;;  %3894 = vmatprep.subr.bf16.mxu0 %v6127_v17  ;;  %v6184_v17 = vld [vmem:[%s7854_s3 + $0x604] ss:$8 sps:$4 sm:$0xff]   ;;  %v6182_v37 = vld [vmem:[%s7854_s3 + $0x600] ss:$8 sps:$4 sm:$0xff]  }
 0x19b   :  { %3204 = vmatpush1.bf16.msra.mxu1 %v6122_v27  ;;  %3235 = vmatprep.mubr.bf16.mxu1 %v7862_v54  ;;  %v6187_v27 = vld [vmem:[%s7854_s3 + $0x724] ss:$8 sps:$4 sm:$0xff]  }
 0x19c   :  { %5660 = vmatmul.mubr.msk.bf16.vlgmr.msra.gmra.mrb[96].mxu0 %vm296_vm2, %v3711_v28  ;;  %3205 = vmatprep.subr.bf16.mxu1 %v6130_v29  ;;  %v3788_v29 = vpack.c.bf16 %v6901_v36, %v6901_v36  ;;  %v6185_v28 = vld [vmem:[%s7854_s3 + $0x720] ss:$8 sps:$4 sm:$0xff]   ;;  %v6188_v36 = vld [vmem:[%s7854_s3 + $0x610] ss:$8 sps:$4 sm:$0xff]  }
 0x19d   :  { %3895 = vmatpush1.bf16.msra.mxu0 %v6125_v26  ;;  %3926 = vmatprep.mubr.bf16.mxu0 %v7862_v54  ;;  %v6190_v26 = vld [vmem:[%s7854_s3 + $0x614] ss:$8 sps:$4 sm:$0xff]  }
 0x19e   :  { %3896 = vmatprep.subr.bf16.mxu0 %v6133_v51  ;;  %v4479_v51 = vpack.c.bf16 %v6919_v42, %v6919_v42  ;;  %v6191_v42 = vld [vmem:[%s7854_s3 + $0x730] ss:$8 sps:$4 sm:$0xff]  }
 0x19f   :  { %3206 = vmatpush1.bf16.msra.mxu1 %v6128_v32  ;;  %v6193_v32 = vld [vmem:[%s7854_s3 + $0x734] ss:$8 sps:$4 sm:$0xff]  }
 0x1a0   :  { %3356 = vmatprep.subr.bf16.mxu1 %v6136_v55  ;;  %v6196_v55 = vld [vmem:[%s7854_s3 + $0x644] ss:$8 sps:$4 sm:$0xff]  }
 0x1a1   :  { %3897 = vmatpush1.bf16.msra.mxu0 %v6131_v38  ;;  %v6199_v38 = vld [vmem:[%s7854_s3 + $0x764] ss:$8 sps:$4 sm:$0xff]  }
 0x1a2   :  { %5597 = vmatmul.mubr.msk.bf16.vlgmr.msra.gmra.mrb[84].mxu1 %vm296_vm2, %v3174_v53  ;;  %4046 = vmatprep.subr.bf16.mxu0 %v6139_v24  ;;  %v6194_v24 = vld [vmem:[%s7854_s3 + $0x640] ss:$8 sps:$4 sm:$0xff]   ;;  %v6202_v53 = vld [vmem:[%s7854_s3 + $0x654] ss:$8 sps:$4 sm:$0xff]  }
 0x1a3   :  { %3357 = vmatpush1.bf16.msra.mxu1 %v6134_v40  ;;  %3388 = vmatprep.mubr.bf16.mxu1 %v7862_v54  ;;  %v3941_v40 = vpack.c.bf16 %v6923_v0, %v6923_v0  ;;  %v6200_v0 = vld [vmem:[%s7854_s3 + $0x650] ss:$8 sps:$4 sm:$0xff]  }
 0x1a4   :  { %5678 = vmatmul.mubr.msk.bf16.vlgmr.msra.gmra.mrb[100].mxu0 %vm296_vm2, %v3865_v10  ;;  %3358 = vmatprep.subr.bf16.mxu1 %v6142_v22  ;;  %v6197_v22 = vld [vmem:[%s7854_s3 + $0x760] ss:$8 sps:$4 sm:$0xff]   ;;  %v6205_v10 = vld [vmem:[%s7854_s3 + $0x774] ss:$8 sps:$4 sm:$0xff]  }
 0x1a5   :  { %4047 = vmatpush1.bf16.msra.mxu0 %v6137_v1  ;;  %4078 = vmatprep.mubr.bf16.mxu0 %v7862_v54  ;;  %v4631_v1 = vpack.c.bf16 %v6933_v35, %v6933_v35 }
 0x1a6   :  { %4048 = vmatprep.subr.bf16.mxu0 %v6145_v19  ;;  %v6208_v19 = vld [vmem:[%s7854_s3 + $0x684] ss:$8 sps:$4 sm:$0xff]  }
 0x1a7   :  { %3359 = vmatpush1.bf16.msra.mxu1 %v6140_v18  ;;  %v6203_v18 = vld [vmem:[%s7854_s3 + $0x770] ss:$8 sps:$4 sm:$0xff]  }
 0x1a8   :  { %3509 = vmatprep.subr.bf16.mxu1 %v6148_v58 }
 0x1a9   :  { %4049 = vmatpush1.bf16.msra.mxu0 %v6143_v62  ;;  %v6211_v62 = vld [vmem:[%s7854_s3 + $0x7a4] ss:$8 sps:$4 sm:$0xff]  }
 0x1aa   :  { %5615 = vmatmul.mubr.msk.bf16.vlgmr.msra.gmra.mrb[88].mxu1 %vm296_vm2, %v3327_v50  ;;  %4200 = vmatprep.subr.bf16.mxu0 %v6151_v5  ;;  %v6206_v50 = vld [vmem:[%s7854_s3 + $0x680] ss:$8 sps:$4 sm:$0xff]  }
 0x1ab   :  { %3510 = vmatpush1.bf16.msra.mxu1 %v6146_v48  ;;  %3541 = vmatprep.mubr.bf16.mxu1 %v7862_v54 }
 0x1ac   :  { %5696 = vmatmul.mubr.msk.bf16.vlgmr.msra.gmra.mrb[104].mxu0 %vm296_vm2, %v4017_v23  ;;  %3511 = vmatprep.subr.bf16.mxu1 %v6154_v11  ;;  %v4094_v23 = vpack.c.bf16 %v6940_v63, %v6940_v63  ;;  %v6217_v63 = vld [vmem:[%s7854_s3 + $0x7b4] ss:$8 sps:$4 sm:$0xff]  }
 0x1ad   :  { %4201 = vmatpush1.bf16.msra.mxu0 %v6149_v4  ;;  %4232 = vmatprep.mubr.bf16.mxu0 %v7862_v54 }
 0x1ae   :  { %4202 = vmatprep.subr.bf16.mxu0 %v6157_v31  ;;  %v6214_v31 = vld [vmem:[%s7854_s3 + $0x694] ss:$8 sps:$4 sm:$0xff]  }
 0x1af   :  { %3512 = vmatpush1.bf16.msra.mxu1 %v6152_v7 }
 0x1b0   :  { %3663 = vmatprep.subr.bf16.mxu1 %v6160_v6  ;;  %v6209_v6 = vld [vmem:[%s7854_s3 + $0x7a0] ss:$8 sps:$4 sm:$0xff]  }
 0x1b1   :  { %4203 = vmatpush1.bf16.msra.mxu0 %v6155_v9 }
 0x1b2   :  { %5633 = vmatmul.mubr.msk.bf16.vlgmr.msra.gmra.mrb[92].mxu1 %vm296_vm2, %v3480_v12  ;;  %4354 = vmatprep.subr.bf16.mxu0 %v6163_v14  ;;  %v4785_v14 = vpack.c.bf16 %v6943_v16, %v6943_v16  ;;  %v6220_v12 = vld [vmem:[%s7854_s3 + $0x6c4] ss:$8 sps:$4 sm:$0xff]  }
 0x1b3   :  { %3664 = vmatpush1.bf16.msra.mxu1 %v6158_v44  ;;  %3695 = vmatprep.mubr.bf16.mxu1 %v7862_v54  ;;  %v6212_v44 = vld [vmem:[%s7854_s3 + $0x690] ss:$8 sps:$4 sm:$0xff]  }
 0x1b4   :  { %5714 = vmatmul.mubr.msk.bf16.vlgmr.msra.gmra.mrb[108].mxu0 %vm296_vm2, %v4171_v13  ;;  %3665 = vmatprep.subr.bf16.mxu1 %v6166_v43  ;;  %v6215_v43 = vld [vmem:[%s7854_s3 + $0x7b0] ss:$8 sps:$4 sm:$0xff]  }
 0x1b5   :  { %4355 = vmatpush1.bf16.msra.mxu0 %v6161_v49  ;;  %4386 = vmatprep.mubr.bf16.mxu0 %v7862_v54 }
 0x1b6   :  { %4356 = vmatprep.subr.bf16.mxu0 %v6169_v47  ;;  %v6223_v47 = vld [vmem:[%s7854_s3 + $0x7e4] ss:$8 sps:$4 sm:$0xff]  }
 0x1b7   :  { %3666 = vmatpush1.bf16.msra.mxu1 %v6164_v21 }
 0x1b8   :  { %3817 = vmatprep.subr.bf16.mxu1 %v6172_v41 }
 0x1b9   :  { %4357 = vmatpush1.bf16.msra.mxu0 %v6167_v52 }
 0x1ba   :  { %5651 = vmatmul.mubr.msk.bf16.vlgmr.msra.gmra.mrb[96].mxu1 %vm296_vm2, %v3634_v60  ;;  %4508 = vmatprep.subr.bf16.mxu0 %v6175_v8  ;;  %v6218_v8 = vld [vmem:[%s7854_s3 + $0x6c0] ss:$8 sps:$4 sm:$0xff]  }
 0x1bb   :  { %3818 = vmatpush1.bf16.msra.mxu1 %v6170_v25  ;;  %3849 = vmatprep.mubr.bf16.mxu1 %v7862_v54 }
 0x1bc   :  { %5732 = vmatmul.mubr.msk.bf16.vlgmr.msra.gmra.mrb[112].mxu0 %vm296_vm2, %v4325_v61  ;;  %3819 = vmatprep.subr.bf16.mxu1 %v6178_v45  ;;  %v4248_v45 = vpack.c.bf16 %v6964_v46, %v6964_v46  ;;  %v6229_v46 = vld [vmem:[%s7854_s3 + $0x7f4] ss:$8 sps:$4 sm:$0xff]  }
 0x1bd   :  { %4509 = vmatpush1.bf16.msra.mxu0 %v6173_v2  ;;  %4540 = vmatprep.mubr.bf16.mxu0 %v7862_v54  ;;  %v6226_v2 = vld [vmem:[%s7854_s3 + $0x6d4] ss:$8 sps:$4 sm:$0xff]  }
 0x1be   :  { %4510 = vmatprep.subr.bf16.mxu0 %v6181_v30  ;;  %v6221_v30 = vld [vmem:[%s7854_s3 + $0x7e0] ss:$8 sps:$4 sm:$0xff]  }
 0x1bf   :  { %3820 = vmatpush1.bf16.msra.mxu1 %v6176_v57 }
 0x1c0   :  { %3970 = vmatprep.subr.bf16.mxu1 %v6184_v17  ;;  %v4939_v17 = vpack.c.bf16 %v6970_v33, %v6970_v33 }
 0x1c1   :  { %4511 = vmatpush1.bf16.msra.mxu0 %v6179_v34  ;;  %v6224_v34 = vld [vmem:[%s7854_s3 + $0x6d0] ss:$8 sps:$4 sm:$0xff]  }
 0x1c2   :  { %5669 = vmatmul.mubr.msk.bf16.vlgmr.msra.gmra.mrb[100].mxu1 %vm296_vm2, %v3788_v29  ;;  %4660 = vmatprep.subr.bf16.mxu0 %v6187_v27  ;;  %v6232_v27 = vld [vmem:[%s7854_s3 + $0x704] ss:$8 sps:$4 sm:$0xff]  }
 0x1c3   :  { %3971 = vmatpush1.bf16.msra.mxu1 %v6182_v37  ;;  %4002 = vmatprep.mubr.bf16.mxu1 %v7862_v54  ;;  %v6227_v37 = vld [vmem:[%s7854_s3 + $0x7f0] ss:$8 sps:$4 sm:$0xff]  }
 0x1c4   :  { %5750 = vmatmul.mubr.msk.bf16.vlgmr.msra.gmra.mrb[116].mxu0 %vm296_vm2, %v4479_v51  ;;  %3972 = vmatprep.subr.bf16.mxu1 %v6190_v26 }
 0x1c5   :  { %4661 = vmatpush1.bf16.msra.mxu0 %v6185_v28  ;;  %4692 = vmatprep.mubr.bf16.mxu0 %v7862_v54 }
 0x1c6   :  { %4662 = vmatprep.subr.bf16.mxu0 %v6193_v32 }
 0x1c7   :  { %3973 = vmatpush1.bf16.msra.mxu1 %v6188_v36  ;;  %v6230_v36 = vld [vmem:[%s7854_s3 + $0x700] ss:$8 sps:$4 sm:$0xff]  }
 0x1c8   :  { %4123 = vmatprep.subr.bf16.mxu1 %v6196_v55 }
 0x1c9   :  { %4663 = vmatpush1.bf16.msra.mxu0 %v6191_v42 }
 0x1ca   :  { %5687 = vmatmul.mubr.msk.bf16.vlgmr.msra.gmra.mrb[104].mxu1 %vm296_vm2, %v3941_v40  ;;  %4814 = vmatprep.subr.bf16.mxu0 %v6199_v38  ;;  %v4402_v38 = vpack.c.bf16 %v6973_v56, %v6973_v56  ;;  %v6238_v56 = vld [vmem:[%s7854_s3 + $0x744] ss:$8 sps:$4 sm:$0xff]  }
 0x1cb   :  { %4124 = vmatpush1.bf16.msra.mxu1 %v6194_v24  ;;  %4155 = vmatprep.mubr.bf16.mxu1 %v7862_v54  ;;  %v6235_v24 = vld [vmem:[%s7854_s3 + $0x714] ss:$8 sps:$4 sm:$0xff]  }
 0x1cc   :  { %5768 = vmatmul.mubr.msk.bf16.vlgmr.msra.gmra.mrb[120].mxu0 %vm296_vm2, %v4631_v1  ;;  %4125 = vmatprep.subr.bf16.mxu1 %v6202_v53  ;;  %v6233_v1 = vld [vmem:[%s7854_s3 + $0x710] ss:$8 sps:$4 sm:$0xff]  }
 0x1cd   :  { %v334_v35 = vpop.f32.mrb[0].mxu1  ;;  %4815 = vmatpush1.bf16.msra.mxu0 %v6197_v22  ;;  %4846 = vmatprep.mubr.bf16.mxu0 %v7862_v54  ;;  %v5093_v22 = vpack.c.bf16 %v6989_v15, %v6989_v15 }
 0x1ce   :  { %v336_v58 = vpop.f32.mrb[1].mxu1  ;;  %4816 = vmatprep.subr.bf16.mxu0 %v6205_v10 }
 0x1cf   :  { %4126 = vmatpush1.bf16.msra.mxu1 %v6200_v0  ;;  %v338_v5 = vpop.f32.mrb[2].mxu1  ;;  %v7664_v48 = vpop.f32.mrb[16].mxu0 }
 0x1d0   :  { %v339_v11 = vpop.f32.mrb[3].mxu1  ;;  %v7669_v4 = vpop.f32.mrb[17].mxu0  ;;  %4277 = vmatprep.subr.bf16.mxu1 %v6208_v19 }
 0x1d1   :  { %v708_v7 = vpop.f32.mrb[18].mxu0  ;;  %4817 = vmatpush1.bf16.msra.mxu0 %v6203_v18  ;;  %v6241_v11 = vld [vmem:[%s7854_s3 + $0x754] ss:$8 sps:$4 sm:$0xff]  }
 0x1d2   :  { %v709_v9 = vpop.f32.mrb[19].mxu0  ;;  %5705 = vmatmul.mubr.msk.bf16.vlgmr.msra.gmra.mrb[108].mxu1 %vm296_vm2, %v4094_v23  ;;  %4968 = vmatprep.subr.bf16.mxu0 %v6211_v62  ;;  %v6239_v7 = vld [vmem:[%s7854_s3 + $0x750] ss:$8 sps:$4 sm:$0xff]  }
 0x1d3   :  { %4278 = vmatpush1.bf16.msra.mxu1 %v6206_v50  ;;  %4309 = vmatprep.mubr.bf16.mxu1 %v7862_v54  ;;  %v4555_v50 = vpack.c.bf16 %v7000_v3, %v7000_v3  ;;  %v6244_v3 = vld [vmem:[%s7854_s3 + $0x784] ss:$8 sps:$4 sm:$0xff]  }
 0x1d4   :  { %5786 = vmatmul.mubr.msk.bf16.vlgmr.msra.gmra.mrb[124].mxu0 %vm296_vm2, %v4785_v14  ;;  %4279 = vmatprep.subr.bf16.mxu1 %v6214_v31 }
 0x1d5   :  { %v398_v16 = vpop.f32.mrb[4].mxu1  ;;  %4969 = vmatpush1.bf16.msra.mxu0 %v6209_v6  ;;  %5000 = vmatprep.mubr.bf16.mxu0 %v7862_v54 }
 0x1d6   :  { %v399_v49 = vadd.f32 %v398_v16, %v334_v35  ;;  %v400_v13 = vpop.f32.mrb[5].mxu1  ;;  %4970 = vmatprep.subr.bf16.mxu0 %v6217_v63  ;;  %v6242_v16 = vld [vmem:[%s7854_s3 + $0x780] ss:$8 sps:$4 sm:$0xff]  }
 0x1d7   :  { %v401_v21 = vadd.f32 %v400_v13, %v336_v58  ;;  %4280 = vmatpush1.bf16.msra.mxu1 %v6212_v44  ;;  %v402_v41 = vpop.f32.mrb[6].mxu1  ;;  %v7700_v52 = vpop.f32.mrb[20].mxu0  ;;  %v6236_v58 = vld [vmem:[%s7854_s3 + $0x740] ss:$8 sps:$4 sm:$0xff]   ;;  %v4708_v13 = vpack.c.bf16 %v7009_v39, %v7009_v39  ;;  %v6250_v39 = vld [vmem:[%s7854_s3 + $0x7c4] ss:$8 sps:$4 sm:$0xff]  }
 0x1d8   :  { %v403_v25 = vpop.f32.mrb[7].mxu1  ;;  %v7705_v60 = vpop.f32.mrb[21].mxu0  ;;  %4431 = vmatprep.subr.bf16.mxu1 %v6220_v12 }
 0x1d9   :  { %v862_v61 = vpop.f32.mrb[22].mxu0  ;;  %4971 = vmatpush1.bf16.msra.mxu0 %v6215_v43 }
 0x1da   :  { %v863_v57 = vpop.f32.mrb[23].mxu0  ;;  %5723 = vmatmul.mubr.msk.bf16.vlgmr.msra.gmra.mrb[112].mxu1 %vm296_vm2, %v4248_v45  ;;  %5122 = vmatprep.subr.bf16.mxu0 %v6223_v47  ;;  %v6245_v45 = vld [vmem:[%s7854_s3 + $0x790] ss:$8 sps:$4 sm:$0xff]  }
 0x1db   :  { %4432 = vmatpush1.bf16.msra.mxu1 %v6218_v8  ;;  %4463 = vmatprep.mubr.bf16.mxu1 %v7862_v54 }
 0x1dc   :  { %5804 = vmatmul.mubr.msk.bf16.vlgmr.msra.gmra.mrb[128].mxu0 %vm296_vm2, %v4939_v17  ;;  %4433 = vmatprep.subr.bf16.mxu1 %v6226_v2  ;;  %v6248_v17 = vld [vmem:[%s7854_s3 + $0x7c0] ss:$8 sps:$4 sm:$0xff]  }
 0x1dd   :  { %v473_v33 = vpop.f32.mrb[8].mxu1  ;;  %5123 = vmatpush1.bf16.msra.mxu0 %v6221_v30  ;;  %5154 = vmatprep.mubr.bf16.mxu0 %v7862_v54 }
 0x1de   :  { %v480_v29 = vadd.f32 %v473_v33, %v399_v49  ;;  %v475_v26 = vpop.f32.mrb[9].mxu1  ;;  %5124 = vmatprep.subr.bf16.mxu0 %v6229_v46 }
 0x1df   :  { %v481_v28 = vadd.f32 %v475_v26, %v401_v21  ;;  %4434 = vmatpush1.bf16.msra.mxu1 %v6224_v34  ;;  %v477_v51 = vpop.f32.mrb[10].mxu1  ;;  %v7733_v32 = vpop.f32.mrb[24].mxu0  ;;  %v6247_v21 = vld [vmem:[%s7854_s3 + $0x794] ss:$8 sps:$4 sm:$0xff]  }
 0x1e0   :  { %v478_v55 = vpop.f32.mrb[11].mxu1  ;;  %v7738_v42 = vpop.f32.mrb[25].mxu0  ;;  %4584 = vmatprep.subr.bf16.mxu1 %v6232_v27  ;;  %v4862_v27 = vpack.c.bf16 %v7012_v20, %v7012_v20  ;;  %v6251_v51 = vld [vmem:[%s7854_s3 + $0x7d0] ss:$8 sps:$4 sm:$0xff]  }
 0x1e1   :  { %v1014_v40 = vpop.f32.mrb[26].mxu0  ;;  %5125 = vmatpush1.bf16.msra.mxu0 %v6227_v37  ;;  %v6253_v37 = vld [vmem:[%s7854_s3 + $0x7d4] ss:$8 sps:$4 sm:$0xff]  }
 0x1e2   :  { %v1015_v53 = vpop.f32.mrb[27].mxu0  ;;  %5741 = vmatmul.mubr.msk.bf16.vlgmr.msra.gmra.mrb[116].mxu1 %vm296_vm2, %v4402_v38 }
 0x1e3   :  { %4585 = vmatpush1.bf16.msra.mxu1 %v6230_v36  ;;  %4616 = vmatprep.mubr.bf16.mxu1 %v7862_v54  ;;  %v5016_v53 = vpack.c.bf16 %v7019_v59, %v7019_v59 }
 0x1e4   :  { %5822 = vmatmul.mubr.msk.bf16.vlgmr.msra.gmra.mrb[132].mxu0 %vm296_vm2, %v5093_v22  ;;  %4586 = vmatprep.subr.bf16.mxu1 %v6235_v24 }
 0x1e5   :  { %v550_v10 = vpop.f32.mrb[12].mxu1 }
 0x1e6   :  { %v557_v0 = vadd.f32 %v550_v10, %v480_v29  ;;  %v552_v19 = vpop.f32.mrb[13].mxu1 }
 0x1e7   :  { %v558_v35 = vadd.f32 %v552_v19, %v481_v28  ;;  %4587 = vmatpush1.bf16.msra.mxu1 %v6233_v1  ;;  %v554_v15 = vpop.f32.mrb[14].mxu1  ;;  %v7756_v18 = vpop.f32.mrb[28].mxu0 }
 0x1e8   :  { %v555_v62 = vpop.f32.mrb[15].mxu1  ;;  %v7761_v5 = vpop.f32.mrb[29].mxu0  ;;  %4737 = vmatprep.subr.bf16.mxu1 %v6238_v56 }
 0x1e9   :  { %v1168_v23 = vpop.f32.mrb[30].mxu0 }
 0x1ea   :  { %v1169_v31 = vpop.f32.mrb[31].mxu0  ;;  %5759 = vmatmul.mubr.msk.bf16.vlgmr.msra.gmra.mrb[120].mxu1 %vm296_vm2, %v4555_v50 }
 0x1eb   :  { %4738 = vmatpush1.bf16.msra.mxu1 %v6236_v58  ;;  %4769 = vmatprep.mubr.bf16.mxu1 %v7862_v54 }
 0x1ec   :  { %4739 = vmatprep.subr.bf16.mxu1 %v6241_v11 }
 0x1ed   :  { %v627_v6 = vpop.f32.mrb[16].mxu1 }
 0x1ee   :  { %v634_v9 = vadd.f32 %v627_v6, %v557_v0  ;;  %v629_v14 = vpop.f32.mrb[17].mxu1 }
 0x1ef   :  { %v635_v63 = vadd.f32 %v629_v14, %v558_v35  ;;  %4740 = vmatpush1.bf16.msra.mxu1 %v6239_v7  ;;  %v631_v44 = vpop.f32.mrb[18].mxu1  ;;  %v7776_v12 = vpop.f32.mrb[32].mxu0 }
 0x1f0   :  { %v632_v43 = vpop.f32.mrb[19].mxu1  ;;  %v7781_v49 = vpop.f32.mrb[33].mxu0  ;;  %4891 = vmatprep.subr.bf16.mxu1 %v6244_v3  ;;  %v711_v47 = vadd.f32 %v7664_v48, %v634_v9 }
 0x1f1   :  { %v1322_v41 = vpop.f32.mrb[34].mxu0  ;;  %v712_v8 = vadd.f32 %v7669_v4, %v635_v63 }
 0x1f2   :  { %v1323_v25 = vpop.f32.mrb[35].mxu0  ;;  %5777 = vmatmul.mubr.msk.bf16.vlgmr.msra.gmra.mrb[124].mxu1 %vm296_vm2, %v4708_v13 }
 0x1f3   :  { %4892 = vmatpush1.bf16.msra.mxu1 %v6242_v16  ;;  %4923 = vmatprep.mubr.bf16.mxu1 %v7862_v54 }
 0x1f4   :  { %4893 = vmatprep.subr.bf16.mxu1 %v6247_v21 }
 0x1f5   :  { %v781_v48 = vpop.f32.mrb[20].mxu1 }
 0x1f6   :  { %v788_v2 = vadd.f32 %v781_v48, %v711_v47  ;;  %v783_v61 = vpop.f32.mrb[21].mxu1 }
 0x1f7   :  { %v789_v30 = vadd.f32 %v783_v61, %v712_v8  ;;  %4894 = vmatpush1.bf16.msra.mxu1 %v6245_v45  ;;  %v785_v4 = vpop.f32.mrb[22].mxu1  ;;  %v7798_v57 = vpop.f32.mrb[36].mxu0 }
 0x1f8   :  { %v786_v46 = vpop.f32.mrb[23].mxu1  ;;  %v1474_v34 = vpop.f32.mrb[37].mxu0  ;;  %5045 = vmatprep.subr.bf16.mxu1 %v6250_v39  ;;  %v865_v33 = vadd.f32 %v7700_v52, %v788_v2 }
 0x1f9   :  { %v1476_v29 = vpop.f32.mrb[38].mxu0  ;;  %v866_v26 = vadd.f32 %v7705_v60, %v789_v30 }
 0x1fa   :  { %v1477_v28 = vpop.f32.mrb[39].mxu0  ;;  %5795 = vmatmul.mubr.msk.bf16.vlgmr.msra.gmra.mrb[128].mxu1 %vm296_vm2, %v4862_v27 }
 0x1fb   :  { %5046 = vmatpush1.bf16.msra.mxu1 %v6248_v17  ;;  %5077 = vmatprep.mubr.bf16.mxu1 %v7862_v54 }
 0x1fc   :  { %5047 = vmatprep.subr.bf16.mxu1 %v6253_v37 }
 0x1fd   :  { %v934_v20 = vpop.f32.mrb[24].mxu1 }
 0x1fe   :  { %v941_v52 = vadd.f32 %v934_v20, %v865_v33  ;;  %v936_v36 = vpop.f32.mrb[25].mxu1 }
 0x1ff   :  { %v942_v55 = vadd.f32 %v936_v36, %v866_v26  ;;  %5048 = vmatpush1.bf16.msra.mxu1 %v6251_v51  ;;  %v938_v38 = vpop.f32.mrb[26].mxu1  ;;  %v1624_v24 = vpop.f32.mrb[40].mxu0 }
 0x200   :  { %v939_v40 = vpop.f32.mrb[27].mxu1  ;;  %v1626_v60 = vpop.f32.mrb[41].mxu0  ;;  %v1017_v22 = vadd.f32 %v7733_v32, %v941_v52 }
 0x201   :  { %v1628_v1 = vpop.f32.mrb[42].mxu0  ;;  %v1018_v56 = vadd.f32 %v7738_v42, %v942_v55 }
 0x202   :  { %v1629_v10 = vpop.f32.mrb[43].mxu0  ;;  %5813 = vmatmul.mubr.msk.bf16.vlgmr.msra.gmra.mrb[132].mxu1 %vm296_vm2, %v5016_v53 }
 0x205   :  { %v1087_v54 = vpop.f32.mrb[28].mxu1 }
 0x206   :  { %v1094_v0 = vadd.f32 %v1087_v54, %v1017_v22  ;;  %v1089_v19 = vpop.f32.mrb[29].mxu1 }
 0x207   :  { %v1095_v35 = vadd.f32 %v1089_v19, %v1018_v56  ;;  %v1091_v15 = vpop.f32.mrb[30].mxu1  ;;  %v1778_v58 = vpop.f32.mrb[44].mxu0 }
 0x208   :  { %v1092_v62 = vpop.f32.mrb[31].mxu1  ;;  %v1780_v50 = vpop.f32.mrb[45].mxu0  ;;  %v1171_v11 = vadd.f32 %v7756_v18, %v1094_v0 }
 0x209   :  { %v1782_v23 = vpop.f32.mrb[46].mxu0  ;;  %v1172_v59 = vadd.f32 %v7761_v5, %v1095_v35 }
 0x20a   :  { %v1783_v32 = vpop.f32.mrb[47].mxu0 }
 0x20d   :  { %v1241_v31 = vpop.f32.mrb[32].mxu1 }
 0x20e   :  { %v1248_v7 = vadd.f32 %v1241_v31, %v1171_v11  ;;  %v1243_v42 = vpop.f32.mrb[33].mxu1 }
 0x20f   :  { %v1249_v3 = vadd.f32 %v1243_v42, %v1172_v59  ;;  %v1245_v6 = vpop.f32.mrb[34].mxu1  ;;  %v1932_v9 = vpop.f32.mrb[48].mxu0 }
 0x210   :  { %v1246_v14 = vpop.f32.mrb[35].mxu1  ;;  %v1934_v63 = vpop.f32.mrb[49].mxu0  ;;  %v1325_v44 = vadd.f32 %v7776_v12, %v1248_v7 }
 0x211   :  { %v1936_v16 = vpop.f32.mrb[50].mxu0  ;;  %v1326_v43 = vadd.f32 %v7781_v49, %v1249_v3 }
 0x212   :  { %v1937_v13 = vpop.f32.mrb[51].mxu0 }
 0x215   :  { %v1395_v47 = vpop.f32.mrb[36].mxu1 }
 0x216   :  { %v1402_v18 = vadd.f32 %v1395_v47, %v1325_v44  ;;  %v1397_v21 = vpop.f32.mrb[37].mxu1 }
 0x217   :  { %v1403_v41 = vadd.f32 %v1397_v21, %v1326_v43  ;;  %v1399_v5 = vpop.f32.mrb[38].mxu1  ;;  %v2086_v8 = vpop.f32.mrb[52].mxu0 }
 0x218   :  { %v1400_v25 = vpop.f32.mrb[39].mxu1  ;;  %v2088_v45 = vpop.f32.mrb[53].mxu0  ;;  %v1479_v39 = vadd.f32 %v7798_v57, %v1402_v18 }
 0x219   :  { %v2090_v48 = vpop.f32.mrb[54].mxu0  ;;  %v1480_v2 = vadd.f32 %v1474_v34, %v1403_v41 }
 0x21a   :  { %v2091_v61 = vpop.f32.mrb[55].mxu0 }
 0x21d   :  { %v1548_v30 = vpop.f32.mrb[40].mxu1 }
 0x21e   :  { %v1555_v4 = vadd.f32 %v1548_v30, %v1479_v39  ;;  %v1550_v12 = vpop.f32.mrb[41].mxu1 }
 0x21f   :  { %v1556_v17 = vadd.f32 %v1550_v12, %v1480_v2  ;;  %v1552_v46 = vpop.f32.mrb[42].mxu1  ;;  %v2238_v49 = vpop.f32.mrb[56].mxu0 }
 0x220   :  { %v1553_v27 = vpop.f32.mrb[43].mxu1  ;;  %v2240_v33 = vpop.f32.mrb[57].mxu0  ;;  %v1631_v37 = vadd.f32 %v1624_v24, %v1555_v4 }
 0x221   :  { %v2242_v29 = vpop.f32.mrb[58].mxu0  ;;  %v1632_v26 = vadd.f32 %v1626_v60, %v1556_v17 }
 0x222   :  { %v2243_v28 = vpop.f32.mrb[59].mxu0 }
 0x225   :  { %v1701_v51 = vpop.f32.mrb[44].mxu1 }
 0x226   :  { %v1708_v20 = vadd.f32 %v1701_v51, %v1631_v37  ;;  %v1703_v52 = vpop.f32.mrb[45].mxu1 }
 0x227   :  { %v1709_v36 = vadd.f32 %v1703_v52, %v1632_v26  ;;  %v1705_v57 = vpop.f32.mrb[46].mxu1  ;;  %v2392_v55 = vpop.f32.mrb[60].mxu0 }
 0x228   :  { %v1706_v34 = vpop.f32.mrb[47].mxu1  ;;  %v2394_v38 = vpop.f32.mrb[61].mxu0  ;;  %v1785_v40 = vadd.f32 %v1778_v58, %v1708_v20 }
 0x229   :  { %v2396_v53 = vpop.f32.mrb[62].mxu0  ;;  %v1786_v22 = vadd.f32 %v1780_v50, %v1709_v36 }
 0x22a   :  { %v2397_v1 = vpop.f32.mrb[63].mxu0 }
 0x22d   :  { %v1855_v56 = vpop.f32.mrb[48].mxu1 }
 0x22e   :  { %v1862_v10 = vadd.f32 %v1855_v56, %v1785_v40  ;;  %v1857_v54 = vpop.f32.mrb[49].mxu1 }
 0x22f   :  { %v1863_v0 = vadd.f32 %v1857_v54, %v1786_v22  ;;  %v1859_v24 = vpop.f32.mrb[50].mxu1  ;;  %v2546_v19 = vpop.f32.mrb[64].mxu0 }
 0x230   :  { %v1860_v60 = vpop.f32.mrb[51].mxu1  ;;  %v2548_v35 = vpop.f32.mrb[65].mxu0  ;;  %v1939_v15 = vadd.f32 %v1932_v9, %v1862_v10 }
 0x231   :  { %v2550_v62 = vpop.f32.mrb[66].mxu0  ;;  %v1940_v11 = vadd.f32 %v1934_v63, %v1863_v0 }
 0x232   :  { %v2551_v23 = vpop.f32.mrb[67].mxu0 }
 0x235   :  { %v2009_v59 = vpop.f32.mrb[52].mxu1 }
 0x236   :  { %v2016_v32 = vadd.f32 %v2009_v59, %v1939_v15  ;;  %v2011_v31 = vpop.f32.mrb[53].mxu1 }
 0x237   :  { %v2017_v7 = vadd.f32 %v2011_v31, %v1940_v11  ;;  %v2013_v58 = vpop.f32.mrb[54].mxu1  ;;  %v2700_v42 = vpop.f32.mrb[68].mxu0 }
 0x238   :  { %v2014_v50 = vpop.f32.mrb[55].mxu1  ;;  %v2702_v3 = vpop.f32.mrb[69].mxu0  ;;  %v2093_v6 = vadd.f32 %v2086_v8, %v2016_v32 }
 0x239   :  { %v2704_v14 = vpop.f32.mrb[70].mxu0  ;;  %v2094_v44 = vadd.f32 %v2088_v45, %v2017_v7 }
 0x23a   :  { %v2705_v16 = vpop.f32.mrb[71].mxu0 }
 0x23d   :  { %v2162_v43 = vpop.f32.mrb[56].mxu1 }
 0x23e   :  { %v2169_v13 = vadd.f32 %v2162_v43, %v2093_v6  ;;  %v2164_v47 = vpop.f32.mrb[57].mxu1 }
 0x23f   :  { %v2170_v18 = vadd.f32 %v2164_v47, %v2094_v44  ;;  %v2166_v9 = vpop.f32.mrb[58].mxu1  ;;  %v2852_v21 = vpop.f32.mrb[72].mxu0 }
 0x240   :  { %v2167_v63 = vpop.f32.mrb[59].mxu1  ;;  %v2854_v41 = vpop.f32.mrb[73].mxu0  ;;  %v2245_v5 = vadd.f32 %v2238_v49, %v2169_v13 }
 0x241   :  { %v2856_v25 = vpop.f32.mrb[74].mxu0  ;;  %v2246_v39 = vadd.f32 %v2240_v33, %v2170_v18 }
 0x242   :  { %v2857_v48 = vpop.f32.mrb[75].mxu0 }
 0x245   :  { %v2315_v2 = vpop.f32.mrb[60].mxu1 }
 0x246   :  { %v2322_v61 = vadd.f32 %v2315_v2, %v2245_v5  ;;  %v2317_v30 = vpop.f32.mrb[61].mxu1 }
 0x247   :  { %v2323_v4 = vadd.f32 %v2317_v30, %v2246_v39  ;;  %v2319_v8 = vpop.f32.mrb[62].mxu1  ;;  %v3006_v12 = vpop.f32.mrb[76].mxu0 }
 0x248   :  { %v2320_v45 = vpop.f32.mrb[63].mxu1  ;;  %v3008_v17 = vpop.f32.mrb[77].mxu0  ;;  %v2399_v46 = vadd.f32 %v2392_v55, %v2322_v61 }
 0x249   :  { %v3010_v27 = vpop.f32.mrb[78].mxu0  ;;  %v2400_v37 = vadd.f32 %v2394_v38, %v2323_v4 }
 0x24a   :  { %v3011_v29 = vpop.f32.mrb[79].mxu0 }
 0x24d   :  { %v2469_v26 = vpop.f32.mrb[64].mxu1 }
 0x24e   :  { %v2476_v28 = vadd.f32 %v2469_v26, %v2399_v46  ;;  %v2471_v51 = vpop.f32.mrb[65].mxu1 }
 0x24f   :  { %v2477_v20 = vadd.f32 %v2471_v51, %v2400_v37  ;;  %v2473_v49 = vpop.f32.mrb[66].mxu1  ;;  %v3160_v52 = vpop.f32.mrb[80].mxu0 }
 0x250   :  { %v2474_v33 = vpop.f32.mrb[67].mxu1  ;;  %v3162_v36 = vpop.f32.mrb[81].mxu0  ;;  %v2553_v57 = vadd.f32 %v2546_v19, %v2476_v28 }
 0x251   :  { %v3164_v34 = vpop.f32.mrb[82].mxu0  ;;  %v2554_v40 = vadd.f32 %v2548_v35, %v2477_v20 }
 0x252   :  { %v3165_v53 = vpop.f32.mrb[83].mxu0 }
 0x255   :  { %v2623_v22 = vpop.f32.mrb[68].mxu1 }
 0x256   :  { %v2630_v1 = vadd.f32 %v2623_v22, %v2553_v57  ;;  %v2625_v56 = vpop.f32.mrb[69].mxu1 }
 0x257   :  { %v2631_v10 = vadd.f32 %v2625_v56, %v2554_v40  ;;  %v2627_v55 = vpop.f32.mrb[70].mxu1  ;;  %v3314_v54 = vpop.f32.mrb[84].mxu0 }
 0x258   :  { %v2628_v38 = vpop.f32.mrb[71].mxu1  ;;  %v3316_v0 = vpop.f32.mrb[85].mxu0  ;;  %v2707_v24 = vadd.f32 %v2700_v42, %v2630_v1 }
 0x259   :  { %v3318_v60 = vpop.f32.mrb[86].mxu0  ;;  %v2708_v15 = vadd.f32 %v2702_v3, %v2631_v10 }
 0x25a   :  { %v3319_v62 = vpop.f32.mrb[87].mxu0 }
 0x25d   :  { %v2776_v11 = vpop.f32.mrb[72].mxu1 }
 0x25e   :  { %v2783_v23 = vadd.f32 %v2776_v11, %v2707_v24  ;;  %v2778_v59 = vpop.f32.mrb[73].mxu1 }
 0x25f   :  { %v2784_v32 = vadd.f32 %v2778_v59, %v2708_v15  ;;  %v2780_v19 = vpop.f32.mrb[74].mxu1  ;;  %v3466_v31 = vpop.f32.mrb[88].mxu0 }
 0x260   :  { %v2781_v35 = vpop.f32.mrb[75].mxu1  ;;  %v3468_v7 = vpop.f32.mrb[89].mxu0  ;;  %v2859_v58 = vadd.f32 %v2852_v21, %v2783_v23 }
 0x261   :  { %v3470_v50 = vpop.f32.mrb[90].mxu0  ;;  %v2860_v6 = vadd.f32 %v2854_v41, %v2784_v32 }
 0x262   :  { %v3471_v14 = vpop.f32.mrb[91].mxu0 }
 0x265   :  { %v2929_v44 = vpop.f32.mrb[76].mxu1 }
 0x266   :  { %v2936_v16 = vadd.f32 %v2929_v44, %v2859_v58  ;;  %v2931_v43 = vpop.f32.mrb[77].mxu1 }
 0x267   :  { %v2937_v13 = vadd.f32 %v2931_v43, %v2860_v6  ;;  %v2933_v42 = vpop.f32.mrb[78].mxu1  ;;  %v3620_v47 = vpop.f32.mrb[92].mxu0 }
 0x268   :  { %v2934_v3 = vpop.f32.mrb[79].mxu1  ;;  %v3622_v18 = vpop.f32.mrb[93].mxu0  ;;  %v3013_v9 = vadd.f32 %v3006_v12, %v2936_v16 }
 0x269   :  { %v3624_v63 = vpop.f32.mrb[94].mxu0  ;;  %v3014_v5 = vadd.f32 %v3008_v17, %v2937_v13 }
 0x26a   :  { %v3625_v25 = vpop.f32.mrb[95].mxu0 }
 0x26d   :  { %v3083_v39 = vpop.f32.mrb[80].mxu1 }
 0x26e   :  { %v3090_v48 = vadd.f32 %v3083_v39, %v3013_v9  ;;  %v3085_v2 = vpop.f32.mrb[81].mxu1 }
 0x26f   :  { %v3091_v61 = vadd.f32 %v3085_v2, %v3014_v5  ;;  %v3087_v21 = vpop.f32.mrb[82].mxu1  ;;  %v3774_v30 = vpop.f32.mrb[96].mxu0 }
 0x270   :  { %v3088_v41 = vpop.f32.mrb[83].mxu1  ;;  %v3776_v4 = vpop.f32.mrb[97].mxu0  ;;  %v3167_v8 = vadd.f32 %v3160_v52, %v3090_v48 }
 0x271   :  { %v3778_v45 = vpop.f32.mrb[98].mxu0  ;;  %v3168_v46 = vadd.f32 %v3162_v36, %v3091_v61 }
 0x272   :  { %v3779_v27 = vpop.f32.mrb[99].mxu0 }
 0x275   :  { %v3237_v37 = vpop.f32.mrb[84].mxu1 }
 0x276   :  { %v3244_v29 = vadd.f32 %v3237_v37, %v3167_v8  ;;  %v3239_v26 = vpop.f32.mrb[85].mxu1 }
 0x277   :  { %v3245_v28 = vadd.f32 %v3239_v26, %v3168_v46  ;;  %v3241_v12 = vpop.f32.mrb[86].mxu1  ;;  %v3928_v51 = vpop.f32.mrb[100].mxu0 }
 0x278   :  { %v3242_v17 = vpop.f32.mrb[87].mxu1  ;;  %v3930_v20 = vpop.f32.mrb[101].mxu0  ;;  %v3321_v49 = vadd.f32 %v3314_v54, %v3244_v29 }
 0x279   :  { %v3932_v33 = vpop.f32.mrb[102].mxu0  ;;  %v3322_v57 = vadd.f32 %v3316_v0, %v3245_v28 }
 0x27a   :  { %v3933_v34 = vpop.f32.mrb[103].mxu0 }
 0x27d   :  { %v3390_v40 = vpop.f32.mrb[88].mxu1 }
 0x27e   :  { %v3397_v53 = vadd.f32 %v3390_v40, %v3321_v49  ;;  %v3392_v22 = vpop.f32.mrb[89].mxu1 }
 0x27f   :  { %v3398_v1 = vadd.f32 %v3392_v22, %v3322_v57  ;;  %v3394_v52 = vpop.f32.mrb[90].mxu1  ;;  %v4080_v56 = vpop.f32.mrb[104].mxu0 }
 0x280   :  { %v3395_v36 = vpop.f32.mrb[91].mxu1  ;;  %v4082_v10 = vpop.f32.mrb[105].mxu0  ;;  %v3473_v55 = vadd.f32 %v3466_v31, %v3397_v53 }
 0x281   :  { %v4084_v38 = vpop.f32.mrb[106].mxu0  ;;  %v3474_v24 = vadd.f32 %v3468_v7, %v3398_v1 }
 0x282   :  { %v4085_v60 = vpop.f32.mrb[107].mxu0 }
 0x285   :  { %v3543_v15 = vpop.f32.mrb[92].mxu1 }
 0x286   :  { %v3550_v62 = vadd.f32 %v3543_v15, %v3473_v55  ;;  %v3545_v11 = vpop.f32.mrb[93].mxu1 }
 0x287   :  { %v3551_v23 = vadd.f32 %v3545_v11, %v3474_v24  ;;  %v3547_v54 = vpop.f32.mrb[94].mxu1  ;;  %v4234_v59 = vpop.f32.mrb[108].mxu0 }
 0x288   :  { %v3548_v0 = vpop.f32.mrb[95].mxu1  ;;  %v4236_v32 = vpop.f32.mrb[109].mxu0  ;;  %v3627_v19 = vadd.f32 %v3620_v47, %v3550_v62 }
 0x289   :  { %v4238_v35 = vpop.f32.mrb[110].mxu0  ;;  %v3628_v58 = vadd.f32 %v3622_v18, %v3551_v23 }
 0x28a   :  { %v4239_v50 = vpop.f32.mrb[111].mxu0 }
 0x28d   :  { %v3697_v6 = vpop.f32.mrb[96].mxu1 }
 0x28e   :  { %v3704_v14 = vadd.f32 %v3697_v6, %v3627_v19  ;;  %v3699_v44 = vpop.f32.mrb[97].mxu1 }
 0x28f   :  { %v3705_v16 = vadd.f32 %v3699_v44, %v3628_v58  ;;  %v3701_v31 = vpop.f32.mrb[98].mxu1  ;;  %v4388_v43 = vpop.f32.mrb[112].mxu0 }
 0x290   :  { %v3702_v7 = vpop.f32.mrb[99].mxu1  ;;  %v4390_v13 = vpop.f32.mrb[113].mxu0  ;;  %v3781_v42 = vadd.f32 %v3774_v30, %v3704_v14 }
 0x291   :  { %v4392_v3 = vpop.f32.mrb[114].mxu0  ;;  %v3782_v9 = vadd.f32 %v3776_v4, %v3705_v16 }
 0x292   :  { %v4393_v63 = vpop.f32.mrb[115].mxu0 }
 0x295   :  { %v3851_v5 = vpop.f32.mrb[100].mxu1 }
 0x296   :  { %v3858_v25 = vadd.f32 %v3851_v5, %v3781_v42  ;;  %v3853_v39 = vpop.f32.mrb[101].mxu1 }
 0x297   :  { %v3859_v48 = vadd.f32 %v3853_v39, %v3782_v9  ;;  %v3855_v47 = vpop.f32.mrb[102].mxu1  ;;  %v4542_v2 = vpop.f32.mrb[116].mxu0 }
 0x298   :  { %v3856_v18 = vpop.f32.mrb[103].mxu1  ;;  %v4544_v61 = vpop.f32.mrb[117].mxu0  ;;  %v3935_v21 = vadd.f32 %v3928_v51, %v3858_v25 }
 0x299   :  { %v4546_v41 = vpop.f32.mrb[118].mxu0  ;;  %v3936_v8 = vadd.f32 %v3930_v20, %v3859_v48 }
 0x29a   :  { %v4547_v45 = vpop.f32.mrb[119].mxu0 }
 0x29d   :  { %v4004_v46 = vpop.f32.mrb[104].mxu1 }
 0x29e   :  { %v4011_v27 = vadd.f32 %v4004_v46, %v3935_v21  ;;  %v4006_v37 = vpop.f32.mrb[105].mxu1 }
 0x29f   :  { %v4012_v29 = vadd.f32 %v4006_v37, %v3936_v8  ;;  %v4008_v30 = vpop.f32.mrb[106].mxu1  ;;  %v4694_v26 = vpop.f32.mrb[120].mxu0 }
 0x2a0   :  { %v4009_v4 = vpop.f32.mrb[107].mxu1  ;;  %v4696_v28 = vpop.f32.mrb[121].mxu0  ;;  %v4087_v12 = vadd.f32 %v4080_v56, %v4011_v27 }
 0x2a1   :  { %v4698_v17 = vpop.f32.mrb[122].mxu0  ;;  %v4088_v49 = vadd.f32 %v4082_v10, %v4012_v29 }
 0x2a2   :  { %v4699_v33 = vpop.f32.mrb[123].mxu0 }
 0x2a5   :  { %v4157_v57 = vpop.f32.mrb[108].mxu1 }
 0x2a6   :  { %v4164_v34 = vadd.f32 %v4157_v57, %v4087_v12  ;;  %v4159_v40 = vpop.f32.mrb[109].mxu1 }
 0x2a7   :  { %v4165_v53 = vadd.f32 %v4159_v40, %v4088_v49  ;;  %v4161_v51 = vpop.f32.mrb[110].mxu1  ;;  %v4848_v22 = vpop.f32.mrb[124].mxu0 }
 0x2a8   :  { %v4162_v20 = vpop.f32.mrb[111].mxu1  ;;  %v4850_v1 = vpop.f32.mrb[125].mxu0  ;;  %v4241_v52 = vadd.f32 %v4234_v59, %v4164_v34 }
 0x2a9   :  { %v4852_v36 = vpop.f32.mrb[126].mxu0  ;;  %v4242_v55 = vadd.f32 %v4236_v32, %v4165_v53 }
 0x2aa   :  { %v4853_v38 = vpop.f32.mrb[127].mxu0 }
 0x2ad   :  { %v4311_v24 = vpop.f32.mrb[112].mxu1 }
 0x2ae   :  { %v4318_v60 = vadd.f32 %v4311_v24, %v4241_v52  ;;  %v4313_v15 = vpop.f32.mrb[113].mxu1 }
 0x2af   :  { %v4319_v62 = vadd.f32 %v4313_v15, %v4242_v55  ;;  %v4315_v56 = vpop.f32.mrb[114].mxu1  ;;  %v5002_v11 = vpop.f32.mrb[128].mxu0  ;;  %v5823_v15 = vld [vmem:[%s7856_s5] ss:$0 sm:$0xff] }
 0x2b0   :  { %v4316_v10 = vpop.f32.mrb[115].mxu1  ;;  %v5004_v23 = vpop.f32.mrb[129].mxu0  ;;  %v4395_v54 = vadd.f32 %v4388_v43, %v4318_v60 }
 0x2b1   :  { %v5006_v0 = vpop.f32.mrb[130].mxu0  ;;  %v4396_v19 = vadd.f32 %v4390_v13, %v4319_v62 }
 0x2b2   :  { %v5007_v35 = vpop.f32.mrb[131].mxu0  ;;  %v5208_v0 = vstv %s7857_s6  ;;  %s5219_s6 = sshll.u32 %s6285_s21, 4  ;;  %s5220_s6 = int_to_ptr.vmem [resolvable:$true] %s5219_s6 }
 0x2b3   :  { %s6260_s22 = scalar_lea.vmem %s5220_s6, 32  ;;  %p6265_p1 = scmp.lt.s32.totalorder %s5220_s6, %s5220_s6 }
 0x2b4   :  { %p6261_p0 = scmp.ne.s32.totalorder %s5220_s6, %s6260_s22  ;;  %p6266_p2 = scmp.lt.s32.totalorder %s6260_s22, %s6260_s22 }
 0x2b5   :  { %v4465_v58 = vpop.f32.mrb[116].mxu1 }
 0x2b6   :  { %v4472_v50 = vadd.f32 %v4465_v58, %v4395_v54  ;;  %v4467_v6 = vpop.f32.mrb[117].mxu1  ;;  %p6267_p3 = por %p6266_p2, %p6265_p1 }
 0x2b7   :  { %v4473_v14 = vadd.f32 %v4467_v6, %v4396_v19  ;;  %v4469_v59 = vpop.f32.mrb[118].mxu1  ;;  %v5156_v44 = vpop.f32.mrb[132].mxu0 }
 0x2b8   :  { %v4470_v32 = vpop.f32.mrb[119].mxu1  ;;  %v5158_v16 = vpop.f32.mrb[133].mxu0  ;;  %v4549_v31 = vadd.f32 %v4542_v2, %v4472_v50  ;;  %v5167_v2 = vlaneseq  ;;  %p6268_p4 = pnand %p6267_p3, %p6261_p0 }
 0x2b9   :  { %v5160_v7 = vpop.f32.mrb[134].mxu0  ;;  %v4550_v42 = vadd.f32 %v4544_v61, %v4473_v14 }
 0x2ba   :  { %v5161_v3 = vpop.f32.mrb[135].mxu0  ;;  %v5168_v30 = vshrl.u32 %v5167_v2, 7 }
 0x2bc   :  { %v5173_v57 = vsub.s32 1, %v5168_v30 }
 0x2bd   :  { %v4618_v9 = vpop.f32.mrb[120].mxu1 }
 0x2be   :  { %v4625_v63 = vadd.f32 %v4618_v9, %v4549_v31  ;;  %v4620_v5 = vpop.f32.mrb[121].mxu1 }
 0x2bf   :  { %v4626_v25 = vadd.f32 %v4620_v5, %v4550_v42  ;;  %v4622_v43 = vpop.f32.mrb[122].mxu1 }
 0x2c0   :  { %v4623_v39 = vpop.f32.mrb[123].mxu1  ;;  %v4701_v13 = vadd.f32 %v4694_v26, %v4625_v63  ;;  %v5169_v26 = vsub.s32 0, %v5168_v30 }
 0x2c1   :  { %v4702_v48 = vadd.f32 %v4696_v28, %v4626_v25  ;;  %v5165_v28 = vld [vmem:[%s7855_s4] sm:$0x3] }
 0x2c2   :  { %v5170_v51 = vrot.slane %v5165_v28, %v5169_v26 }
 0x2c5   :  { %v4771_v47 = vpop.f32.mrb[124].mxu1 }
 0x2c6   :  { %v4778_v18 = vadd.f32 %v4771_v47, %v4701_v13  ;;  %v4773_v21 = vpop.f32.mrb[125].mxu1 }
 0x2c7   :  { %v4779_v41 = vadd.f32 %v4773_v21, %v4702_v48  ;;  %v4775_v8 = vpop.f32.mrb[126].mxu1 }
 0x2c8   :  { %v4776_v45 = vpop.f32.mrb[127].mxu1  ;;  %v4855_v46 = vadd.f32 %v4848_v22, %v4778_v18 }
 0x2c9   :  { %v4856_v27 = vadd.f32 %v4850_v1, %v4779_v41  ;;  %v5174_v1 = vrot.slane %v5165_v28, %v5173_v57 }
 0x2cd   :  { %v4925_v37 = vpop.f32.mrb[128].mxu1 }
 0x2ce   :  { %v4932_v61 = vadd.f32 %v4925_v37, %v4855_v46  ;;  %v4927_v29 = vpop.f32.mrb[129].mxu1 }
 0x2cf   :  { %v4933_v4 = vadd.f32 %v4927_v29, %v4856_v27  ;;  %v4929_v12 = vpop.f32.mrb[130].mxu1 }
 0x2d0   :  { %v4930_v17 = vpop.f32.mrb[131].mxu1  ;;  %v5009_v49 = vadd.f32 %v5002_v11, %v4932_v61 }
 0x2d1   :  { %v5010_v33 = vadd.f32 %v5004_v23, %v4933_v4 }
 0x2d5   :  { %v5079_v34 = vpop.f32.mrb[132].mxu1 }
 0x2d6   :  { %v5086_v40 = vadd.f32 %v5079_v34, %v5009_v49  ;;  %v5081_v53 = vpop.f32.mrb[133].mxu1 }
 0x2d7   :  { %v5087_v22 = vadd.f32 %v5081_v53, %v5010_v33  ;;  %v5083_v20 = vpop.f32.mrb[134].mxu1 }
 0x2d8   :  { %v5163_v52 = vadd.f32 %v5156_v44, %v5086_v40  ;;  %v5084_v36 = vpop.f32.mrb[135].mxu1 }
 0x2d9   :  { %v5164_v55 = vadd.f32 %v5158_v16, %v5087_v22 }
 0x2da   :  { %v5177_v38 = vadd.f32 %v5170_v51, %v5163_v52 }
 0x2db   :  { %v5178_v24 = vadd.f32 %v5174_v1, %v5164_v55 }
 0x2dc   :  { %v5180_v60 = vsel %vm5179_vm3, %v5177_v38, -inf }
 0x2dd   :  { %5181 = vmax.xlane.f32.xlu0 %v5180_v60  ;;  %v5194_v62 = vmax.f32 %v5178_v24, 0.0 }
 0x2df   :  { %v5202_v56 = vmul.f32 %v5823_v15, %v5194_v62 }
 0x2e1   :  { %v5204_v11 = vsel %vm5203_vm4, %v5202_v56, 0.0 }
 0x2e2   :  { %5205 = vadd.xlane.f32.xlu1 %v5204_v11 }
 0x36a   :  { %v5182_v10 = vpop.xlane.xlu0 %5181 }
 0x36b   :  { %v5183_v23 = vsub.f32 %v5177_v38, %v5182_v10 }
 0x36d   :  { %v5184_v54 = vmul.f32 1.442695, %v5183_v23 }
 0x36f   :  { %6254 = vpow2.f32 %v5184_v54  ;;  %v5206_v19 = vpop.xlane.xlu1 %5205 }
 0x370   :  { %v5209_v35 = vadd.f32 %v5208_v0, %v5206_v19 }
 0x372   :  { %6256 = vtanh.f32 %v5209_v35 }
 0x379   :  { %v6255_v58 = vpop.eup %6254 }
 0x37a   :  { %v5186_v50 = vsel %vm5179_vm3, %v6255_v58, 0.0 }
 0x37b   :  { %5187 = vadd.xlane.f32.xlu0 %v5186_v50 }
 0x37c   :  { %v6257_v6 = vpop.eup %6256 }
 0x37d   :  { %5212 = vst.msk [vmem:[%s7859_s8] sm:$0x3] %vm5211_vm5, %v6257_v6 }
 0x408   :  { %v5188_v14 = vpop.xlane.xlu0 %5187 }
 0x409   :  { %6258 = vlog2.f32 %v5188_v14 }
 0x413   :  { %v6259_v59 = vpop.eup %6258 }
 0x414   :  { %v5190_v44 = vmul.f32 0.6931472, %v6259_v59 }
 0x416   :  { %v5191_v32 = vadd.f32 %v5190_v44, %v5182_v10 }
 0x418   :  { %v5192_v16 = vsub.f32 %v5177_v38, %v5191_v32 }
 0x41a   :  { %5193 = vst [vmem:[#allocation3] sm:$0x3] %v5192_v16 }
 0x41b   :  { %6271 = shalt.err (!%p6268_p4)
}
 0x41c   :  { %s6272_s8 = scalar_lea.hbm %s7858_s7, 32 }
 0x41d   :  { %p6273_p5 = scmp.ne.s32.totalorder %s7858_s7, %s6272_s8  ;;  %p6276_p6 = scmp.lt.u32.totalorder %s6272_s8, %s7858_s7 }
 0x41f   :  { %p6278_p7 = pnand %p6276_p6, %p6273_p5 }
 0x421   :  { %6281 = shalt.err (!%p6278_p7)
}
 0x422   :  { %5222 = dma.vmem_to_hbm [thread:$0]  %s5220_s6, 32, %s7858_s7, [#allocation4]  }
 0x423   :  { %6282 = dma.done.wait [#allocation4], 32  }
 0x424   :  { %6283 = vsyncadd [#allocation4], 4294967264 }
 0x425   :  { %5230 = vsyncpa [#allocation4], 1 }

</bundles_post_ra>
